<compile_context>
chip_gen: v7x
topology: tpu7x:2x2x1
jax: 0.10.0
libtpu: 0.0.40
codegen_flags: <defaults>
</compile_context>

<pallas_src>
import functools

import jax
import jax.numpy as jnp
from jax.experimental import pallas as pl
from jax.experimental.pallas import tpu as pltpu

LN_EPS = 1e-5
NEG_INF = -1e30

PARAM_ORDER = [
    "ln1_w", "ln1_b",
    "q_w", "q_b", "k_w", "k_b", "v_w", "v_b",
    "proj_w", "proj_b",
    "ln2_w", "ln2_b",
    "fc1_w", "fc1_b",
    "fc2_w", "fc2_b",
]


def _round_up(x, m):
    return ((x + m - 1) // m) * m


def _layernorm(x, w, b):
    """Row-wise LayerNorm in f32; w/b are (1, E) and broadcast over rows."""
    mu = jnp.mean(x, axis=-1, keepdims=True)
    var = jnp.mean((x - mu) ** 2, axis=-1, keepdims=True)
    return (x - mu) * jax.lax.rsqrt(var + LN_EPS) * w + b


def _erf(x):
    # Abramowitz & Stegun 7.1.26 (max abs error ~1.5e-7).  Only exp/mul/add/
    # where -- all natively lowered by Mosaic; no erf primitive required.
    a1, a2, a3, a4, a5 = (0.254829592, -0.284496736, 1.421413741,
                          -1.453152027, 1.061405429)
    pp = 0.3275911
    ax = jnp.abs(x)
    t = 1.0 / (1.0 + pp * ax)
    poly = ((((a5 * t + a4) * t + a3) * t + a2) * t + a1) * t
    y = 1.0 - poly * jnp.exp(-ax * ax)
    return jnp.where(x < 0, -y, y)


def _gelu_exact(x):
    # torch.nn.GELU default (erf) semantics.
    # TODO(synk): approximate='tanh' is cheaper on v5e's single EUP if tolerable.
    return 0.5 * x * (1.0 + _erf(x * 0.7071067811865476))


def make_block_kernel(num_heads, tb, n_real, n_pad, e):
    d = e // num_heads
    h = num_heads
    rows = tb * n_pad

    def kernel(x_ref,
               ln1w_ref, ln1b_ref,
               qw_ref, qb_ref, kw_ref, kb_ref, vw_ref, vb_ref,
               projw_ref, projb_ref,
               ln2w_ref, ln2b_ref,
               fc1w_ref, fc1b_ref,
               fc2w_ref, fc2b_ref,
               o_ref):
        # (tb, Np, E) -> (tb*Np, E).  Np % 16 == 0, so this only regroups whole
        # sublane tiles (no repacking relayout).  All dense matmuls then have
        # M = tb*Np rows.
        x = x_ref[...].astype(jnp.float32).reshape(rows, e)

        # ---- attention branch: x + proj(MHA(LN1(x))) ----
        xn = _layernorm(x, ln1w_ref[...], ln1b_ref[...]).astype(jnp.bfloat16)
        # Separate q/k/v projections (weights stay VMEM resident).  The
        # 1/sqrt(d) scale is pre-folded into q_w / q_b by the wrapper.
        q = jnp.dot(xn, qw_ref[...], preferred_element_type=jnp.float32) + qb_ref[...]
        k = jnp.dot(xn, kw_ref[...], preferred_element_type=jnp.float32) + kb_ref[...]
        v = jnp.dot(xn, vw_ref[...], preferred_element_type=jnp.float32) + vb_ref[...]

        def to_head_major(t):
            # (tb*Np, h*d) -> (h*tb, Np, d) head-major: per-head lane slices +
            # a leading-axis stack.  No (b,n,h,d)<->(b,h,n,d) transposes and
            # no minor-dim reshapes; every reshape only regroups aligned
            # leading/sublane dims (Np is a multiple of 16).
            parts = [t[:, hh * d:(hh + 1) * d].reshape(tb, n_pad, d)
                     for hh in range(h)]
            return jnp.stack(parts, axis=0).reshape(h * tb, n_pad, d)

        qh = to_head_major(q).astype(jnp.bfloat16)
        kh = to_head_major(k).astype(jnp.bfloat16)
        vh = to_head_major(v).astype(jnp.bfloat16)

        # One batched matmul over batch dim h*tb (scale already in q).
        s = jnp.einsum("bqd,bkd->bqk", qh, kh,
                       preferred_element_type=jnp.float32)       # (h*tb, Np, Np)
        if n_pad != n_real:
            key_idx = jax.lax.broadcasted_iota(jnp.int32, (1, 1, n_pad), 2)
            s = jnp.where(key_idx < n_real, s, NEG_INF)          # mask padded keys
        s = s - jnp.max(s, axis=-1, keepdims=True)
        p = jnp.exp(s)
        # EUP reciprocal instead of a VALU divide.
        p = p * pl.reciprocal(jnp.sum(p, axis=-1, keepdims=True), approx=True)

        a = jnp.einsum("bqk,bkd->bqd", p.astype(jnp.bfloat16), vh,
                       preferred_element_type=jnp.float32)       # (h*tb, Np, d)
        a = a.reshape(h, tb, n_pad, d)
        a = jnp.concatenate([a[hh].reshape(rows, d) for hh in range(h)],
                            axis=-1)                             # (rows, e)

        attn = jnp.dot(a.astype(jnp.bfloat16), projw_ref[...],
                       preferred_element_type=jnp.float32) + projb_ref[...]
        x = x + attn

        # ---- MLP branch: x + fc2(GELU(fc1(LN2(x)))) ----
        xn2 = _layernorm(x, ln2w_ref[...], ln2b_ref[...]).astype(jnp.bfloat16)
        h1 = jnp.dot(xn2, fc1w_ref[...],
                     preferred_element_type=jnp.float32) + fc1b_ref[...]
        h1 = _gelu_exact(h1)
        h2 = jnp.dot(h1.astype(jnp.bfloat16), fc2w_ref[...],
                     preferred_element_type=jnp.float32) + fc2b_ref[...]

        # NOTE: with E=32 this store is lane-sparse; production should keep
        # E % 128 == 0 so the out block is lane-dense (unmasked vst).
        o_ref[...] = (x + h2).reshape(tb, n_pad, e).astype(o_ref.dtype)

    return kernel


def _chip_info():
    """Generation-aware knobs derived only from documented fields."""
    try:
        vmem = int(pltpu.get_tpu_info().vmem_capacity_bytes)
    except Exception:
        vmem = 64 << 20  # conservative default: assume the smallest VMEM (v7x-like)
    # 64 MiB VMEM per core <=> v7x-style part with 2 TensorCores per chip.
    return {"vmem_bytes": vmem, "small_vmem_two_cores": vmem <= (64 << 20)}


def _pick_block_batch(B, n_pad, info):
    if info["small_vmem_two_cores"]:
        cap = B if B < 2 else B // 2      # keep >= 2 parallel grid steps (2 TCs)
        max_rows = 512                    # 64 MiB VMEM budget
    else:
        cap = B                           # single TC: the grid is a serial loop,
        max_rows = 2048                   # so take the biggest block that fits
    cap = max(1, min(cap, max(1, max_rows // max(n_pad, 1))))
    for tb in range(cap, 0, -1):
        if B % tb == 0:
            return tb
    return 1


def _vmem_limit_bytes(tb, n_pad, E, num_heads, params, info):
    rows = tb * n_pad
    hidden = params["fc1_w"].shape[1]
    act = rows * (6 * E + hidden) * 4                  # x/xn/q/k/v/attn + fc1 act (f32)
    act += tb * num_heads * n_pad * n_pad * 4 * 2      # scores + probs (f32)
    weights = sum(int(v.size) * v.dtype.itemsize for v in params.values())
    io = 4 * rows * E * 4                              # double-buffered in/out tiles
    total = io + weights + 3 * act
    limit = int(total * 1.5) + (4 << 20)
    cap = (48 << 20) if info["small_vmem_two_cores"] else (100 << 20)
    return max(16 << 20, min(limit, cap))


def _param_spec(arr):
    # Grid-invariant parameter: same block every step.  Buffered(1) keeps a
    # single VMEM copy of each weight instead of the default double buffer
    # (halves weight VMEM at production dims; the DMA happens only once).
    idx = lambda i: (0,) * arr.ndim
    try:
        return pl.BlockSpec(arr.shape, idx, pipeline_mode=pl.Buffered(1))
    except Exception:
        return pl.BlockSpec(arr.shape, idx)


def run_block(x, params, num_heads, *, block_batch=None):
    """Apply one pre-LN transformer Block to x of shape (B, N, E)."""
    B, N, E = x.shape
    assert E % num_heads == 0
    d = E // num_heads
    scale = 1.0 / float(d) ** 0.5

    info = _chip_info()

    # Pad the token dim to a multiple of 16 so all in-kernel sublane regroupings
    # are tile-aligned; padded keys are masked out of the softmax and padded
    # query rows are dropped when un-padding below.
    Np = max(16, _round_up(N, 16))
    xp = x if Np == N else jnp.pad(x, ((0, 0), (0, Np - N), (0, 0)))

    tb = block_batch if block_batch is not None else _pick_block_batch(B, Np, info)
    assert B % tb == 0, (B, tb)
    grid = (B // tb,)

    # Fold the 1/sqrt(d) attention scale into the q projection (free).
    prm = dict(params)
    prm["q_w"] = (params["q_w"].astype(jnp.float32) * scale).astype(params["q_w"].dtype)
    prm["q_b"] = params["q_b"] * scale

    kernel = make_block_kernel(num_heads, tb, N, Np, E)

    in_specs = [pl.BlockSpec((tb, Np, E), lambda i: (i, 0, 0))]
    in_specs += [_param_spec(prm[name]) for name in PARAM_ORDER]
    out_spec = pl.BlockSpec((tb, Np, E), lambda i: (i, 0, 0))

    fn = pl.pallas_call(
        kernel,
        out_shape=jax.ShapeDtypeStruct((B, Np, E), x.dtype),
        grid=grid,
        in_specs=in_specs,
        out_specs=out_spec,
        compiler_params=pltpu.CompilerParams(
            dimension_semantics=("parallel",),
            vmem_limit_bytes=_vmem_limit_bytes(tb, Np, E, num_heads, prm, info)),
    )
    out = fn(xp, *[prm[name] for name in PARAM_ORDER])
    return out if Np == N else out[:, :N, :]


def init_block_params(key, embed_dim, mlp_ratio=4.0, matmul_dtype=jnp.bfloat16):
    """Linear weights stored (in_features, out_features) in bf16 for the MXU;
    biases / LayerNorm params stay f32 (all elementwise math is f32)."""
    E = embed_dim
    H = int(E * mlp_ratio)
    ks = jax.random.split(key, 10)
    std = 0.02
    return {
        "ln1_w": jnp.ones((1, E), jnp.float32),
        "ln1_b": jnp.zeros((1, E), jnp.float32),
        "q_w": (jax.random.normal(ks[0], (E, E)) * std).astype(matmul_dtype),
        "q_b": (jax.random.normal(ks[1], (1, E)) * std).astype(jnp.float32),
        "k_w": (jax.random.normal(ks[2], (E, E)) * std).astype(matmul_dtype),
        "k_b": (jax.random.normal(ks[3], (1, E)) * std).astype(jnp.float32),
        "v_w": (jax.random.normal(ks[4], (E, E)) * std).astype(matmul_dtype),
        "v_b": (jax.random.normal(ks[5], (1, E)) * std).astype(jnp.float32),
        "proj_w": (jax.random.normal(ks[6], (E, E)) * std).astype(matmul_dtype),
        "proj_b": jnp.zeros((1, E), jnp.float32),
        "ln2_w": jnp.ones((1, E), jnp.float32),
        "ln2_b": jnp.zeros((1, E), jnp.float32),
        "fc1_w": (jax.random.normal(ks[7], (E, H)) * std).astype(matmul_dtype),
        "fc1_b": (jax.random.normal(ks[8], (1, H)) * std).astype(jnp.float32),
        "fc2_w": (jax.random.normal(ks[9], (H, E)) * std).astype(matmul_dtype),
        "fc2_b": jnp.zeros((1, E), jnp.float32),
    }


@functools.partial(jax.jit, static_argnames=("nvar", "num_heads", "curr_layer",
                                             "fuse_frequency", "no_fusion",
                                             "mean_fuse"))
def encoder_layer_forward(x, variate_params, fusion_params, *, nvar, num_heads,
                          curr_layer=0, fuse_frequency=2,
                          no_fusion=False, mean_fuse=False):
    """x: (bs*nvar, L+1, E) -> (bs*nvar, L+1, E)"""
    _, N, E = x.shape
    x_out = run_block(x, variate_params, num_heads)

    if curr_layer % fuse_frequency == 0 and (not no_fusion):
        x4 = jnp.reshape(x_out, (-1, nvar, N, E))
        if mean_fuse:
            cls = jnp.mean(x4, axis=2)                    # (bs, nvar, E)
        else:
            cls = x4[:, :, 0, :]                          # (bs, nvar, E)
        cls = run_block(cls, fusion_params, num_heads)
        # In-place-style writeback of the fused cls token (dynamic update
        # slice) -- no full-tensor concatenate / HBM round trip over patches.
        x4 = x4.at[:, :, 0, :].set(cls)
        x_out = jnp.reshape(x4, (-1, N, E))
    return x_out


if __name__ == "__main__":
    # Small, module-consistent shapes:
    #   embed_dim=32, num_heads=4, nvar=4, mlp_ratio=4, bs=2, L=8 -> N=L+1=9
    embed_dim = 32
    num_heads = 4
    nvar = 4
    bs = 2
    L = 8
    N = L + 1

    root = jax.random.PRNGKey(0)
    k_x, k_var, k_fuse = jax.random.split(root, 3)

    x = jax.random.normal(k_x, (bs * nvar, N, embed_dim), dtype=jnp.float32)
    variate_params = init_block_params(k_var, embed_dim, mlp_ratio=4.0)
    fusion_params = init_block_params(k_fuse, embed_dim, mlp_ratio=4.0)

    out = encoder_layer_forward(
        x, variate_params, fusion_params,
        nvar=nvar, num_heads=num_heads,
        curr_layer=0, fuse_frequency=2, no_fusion=False, mean_fuse=False)
    out = jax.block_until_ready(out)

    assert out.shape == (bs * nvar, N, embed_dim), out.shape
    assert bool(jnp.all(jnp.isfinite(out)))
    print("KERNEL_OK")
</pallas_src>

<mosaic_0001>
module attributes {stable_mosaic.version = 11 : i64} {
  func.func @kernel(%arg0: i32, %arg1: memref<4x16x32xf32, #tpu.memory_space<vmem>>, %arg2: memref<1x32xf32, #tpu.memory_space<vmem>>, %arg3: memref<1x32xf32, #tpu.memory_space<vmem>>, %arg4: memref<32x32xbf16, #tpu.memory_space<vmem>>, %arg5: memref<1x32xf32, #tpu.memory_space<vmem>>, %arg6: memref<32x32xbf16, #tpu.memory_space<vmem>>, %arg7: memref<1x32xf32, #tpu.memory_space<vmem>>, %arg8: memref<32x32xbf16, #tpu.memory_space<vmem>>, %arg9: memref<1x32xf32, #tpu.memory_space<vmem>>, %arg10: memref<32x32xbf16, #tpu.memory_space<vmem>>, %arg11: memref<1x32xf32, #tpu.memory_space<vmem>>, %arg12: memref<1x32xf32, #tpu.memory_space<vmem>>, %arg13: memref<1x32xf32, #tpu.memory_space<vmem>>, %arg14: memref<32x128xbf16, #tpu.memory_space<vmem>>, %arg15: memref<1x128xf32, #tpu.memory_space<vmem>>, %arg16: memref<128x32xbf16, #tpu.memory_space<vmem>>, %arg17: memref<1x32xf32, #tpu.memory_space<vmem>>, %arg18: memref<4x16x32xf32, #tpu.memory_space<vmem>>) attributes {dimension_semantics = [#tpu.dimension_semantics<parallel>], iteration_bounds = array<i64: 2>, scalar_prefetch = 0 : i64, scratch_operands = 0 : i64, tpu.core_type = #tpu.core_type<tc>, window_params = [{transform_indices = @transform_0, window_bounds = array<i64: 4, 16, 32>}, {pipeline_mode = #tpu.pipeline_mode<synchronous>, transform_indices = @transform_1, window_bounds = array<i64: 1, 32>}, {pipeline_mode = #tpu.pipeline_mode<synchronous>, transform_indices = @transform_2, window_bounds = array<i64: 1, 32>}, {pipeline_mode = #tpu.pipeline_mode<synchronous>, transform_indices = @transform_3, window_bounds = array<i64: 32, 32>}, {pipeline_mode = #tpu.pipeline_mode<synchronous>, transform_indices = @transform_4, window_bounds = array<i64: 1, 32>}, {pipeline_mode = #tpu.pipeline_mode<synchronous>, transform_indices = @transform_5, window_bounds = array<i64: 32, 32>}, {pipeline_mode = #tpu.pipeline_mode<synchronous>, transform_indices = @transform_6, window_bounds = array<i64: 1, 32>}, {pipeline_mode = #tpu.pipeline_mode<synchronous>, transform_indices = @transform_7, window_bounds = array<i64: 32, 32>}, {pipeline_mode = #tpu.pipeline_mode<synchronous>, transform_indices = @transform_8, window_bounds = array<i64: 1, 32>}, {pipeline_mode = #tpu.pipeline_mode<synchronous>, transform_indices = @transform_9, window_bounds = array<i64: 32, 32>}, {pipeline_mode = #tpu.pipeline_mode<synchronous>, transform_indices = @transform_10, window_bounds = array<i64: 1, 32>}, {pipeline_mode = #tpu.pipeline_mode<synchronous>, transform_indices = @transform_11, window_bounds = array<i64: 1, 32>}, {pipeline_mode = #tpu.pipeline_mode<synchronous>, transform_indices = @transform_12, window_bounds = array<i64: 1, 32>}, {pipeline_mode = #tpu.pipeline_mode<synchronous>, transform_indices = @transform_13, window_bounds = array<i64: 32, 128>}, {pipeline_mode = #tpu.pipeline_mode<synchronous>, transform_indices = @transform_14, window_bounds = array<i64: 1, 128>}, {pipeline_mode = #tpu.pipeline_mode<synchronous>, transform_indices = @transform_15, window_bounds = array<i64: 128, 32>}, {pipeline_mode = #tpu.pipeline_mode<synchronous>, transform_indices = @transform_16, window_bounds = array<i64: 1, 32>}, {transform_indices = @transform_17, window_bounds = array<i64: 4, 16, 32>}]} {
    %c0 = arith.constant 0 : index
    %c0_0 = arith.constant 0 : index
    %c0_1 = arith.constant 0 : index
    %0 = vector.load %arg1[%c0, %c0_0, %c0_1] : memref<4x16x32xf32, #tpu.memory_space<vmem>>, vector<4x16x32xf32>
    %1 = vector.shape_cast %0 : vector<4x16x32xf32> to vector<64x32xf32>
    %c0_2 = arith.constant 0 : index
    %c0_3 = arith.constant 0 : index
    %2 = vector.load %arg2[%c0_2, %c0_3] : memref<1x32xf32, #tpu.memory_space<vmem>>, vector<1x32xf32>
    %c0_4 = arith.constant 0 : index
    %c0_5 = arith.constant 0 : index
    %3 = vector.load %arg3[%c0_4, %c0_5] : memref<1x32xf32, #tpu.memory_space<vmem>>, vector<1x32xf32>
    %cst = arith.constant dense<0.000000e+00> : vector<64xf32>
    %4 = vector.multi_reduction <add>, %1, %cst [1] : vector<64x32xf32> to vector<64xf32>
    %5 = vector.shape_cast %4 : vector<64xf32> to vector<64x1xf32>
    %cst_6 = arith.constant 3.200000e+01 : f32
    %6 = vector.broadcast %cst_6 : f32 to vector<64x1xf32>
    %7 = arith.divf %5, %6 : vector<64x1xf32>
    %8 = vector.broadcast %7 : vector<64x1xf32> to vector<64x32xf32>
    %9 = arith.subf %1, %8 : vector<64x32xf32>
    %10 = arith.mulf %9, %9 : vector<64x32xf32>
    %cst_7 = arith.constant dense<0.000000e+00> : vector<64xf32>
    %11 = vector.multi_reduction <add>, %10, %cst_7 [1] : vector<64x32xf32> to vector<64xf32>
    %12 = vector.shape_cast %11 : vector<64xf32> to vector<64x1xf32>
    %cst_8 = arith.constant 3.200000e+01 : f32
    %13 = vector.broadcast %cst_8 : f32 to vector<64x1xf32>
    %14 = arith.divf %12, %13 : vector<64x1xf32>
    %15 = vector.broadcast %7 : vector<64x1xf32> to vector<64x32xf32>
    %16 = arith.subf %1, %15 : vector<64x32xf32>
    %cst_9 = arith.constant 9.99999974E-6 : f32
    %17 = vector.broadcast %cst_9 : f32 to vector<64x1xf32>
    %18 = arith.addf %14, %17 : vector<64x1xf32>
    %19 = math.rsqrt %18 : vector<64x1xf32>
    %20 = vector.broadcast %19 : vector<64x1xf32> to vector<64x32xf32>
    %21 = arith.mulf %16, %20 : vector<64x32xf32>
    %22 = vector.broadcast %2 : vector<1x32xf32> to vector<64x32xf32>
    %23 = arith.mulf %21, %22 : vector<64x32xf32>
    %24 = vector.broadcast %3 : vector<1x32xf32> to vector<64x32xf32>
    %25 = arith.addf %23, %24 : vector<64x32xf32>
    %26 = arith.truncf %25 : vector<64x32xf32> to vector<64x32xbf16>
    %c0_10 = arith.constant 0 : index
    %c0_11 = arith.constant 0 : index
    %27 = vector.load %arg4[%c0_10, %c0_11] : memref<32x32xbf16, #tpu.memory_space<vmem>>, vector<32x32xbf16>
    %cst_12 = arith.constant dense<0.000000e+00> : vector<64x32xf32>
    %28 = tpu.matmul %26, %27, %cst_12 {dimension_numbers = #tpu.dot_dimension_numbers<[1], [0], [0], [1], [0, 0, 1, 1], [], []>} : vector<64x32xbf16>, vector<32x32xbf16>, vector<64x32xf32> -> vector<64x32xf32>
    %c0_13 = arith.constant 0 : index
    %c0_14 = arith.constant 0 : index
    %29 = vector.load %arg5[%c0_13, %c0_14] : memref<1x32xf32, #tpu.memory_space<vmem>>, vector<1x32xf32>
    %30 = vector.broadcast %29 : vector<1x32xf32> to vector<64x32xf32>
    %31 = arith.addf %28, %30 : vector<64x32xf32>
    %c0_15 = arith.constant 0 : index
    %c0_16 = arith.constant 0 : index
    %32 = vector.load %arg6[%c0_15, %c0_16] : memref<32x32xbf16, #tpu.memory_space<vmem>>, vector<32x32xbf16>
    %cst_17 = arith.constant dense<0.000000e+00> : vector<64x32xf32>
    %33 = tpu.matmul %26, %32, %cst_17 {dimension_numbers = #tpu.dot_dimension_numbers<[1], [0], [0], [1], [0, 0, 1, 1], [], []>} : vector<64x32xbf16>, vector<32x32xbf16>, vector<64x32xf32> -> vector<64x32xf32>
    %c0_18 = arith.constant 0 : index
    %c0_19 = arith.constant 0 : index
    %34 = vector.load %arg7[%c0_18, %c0_19] : memref<1x32xf32, #tpu.memory_space<vmem>>, vector<1x32xf32>
    %35 = vector.broadcast %34 : vector<1x32xf32> to vector<64x32xf32>
    %36 = arith.addf %33, %35 : vector<64x32xf32>
    %c0_20 = arith.constant 0 : index
    %c0_21 = arith.constant 0 : index
    %37 = vector.load %arg8[%c0_20, %c0_21] : memref<32x32xbf16, #tpu.memory_space<vmem>>, vector<32x32xbf16>
    %cst_22 = arith.constant dense<0.000000e+00> : vector<64x32xf32>
    %38 = tpu.matmul %26, %37, %cst_22 {dimension_numbers = #tpu.dot_dimension_numbers<[1], [0], [0], [1], [0, 0, 1, 1], [], []>} : vector<64x32xbf16>, vector<32x32xbf16>, vector<64x32xf32> -> vector<64x32xf32>
    %c0_23 = arith.constant 0 : index
    %c0_24 = arith.constant 0 : index
    %39 = vector.load %arg9[%c0_23, %c0_24] : memref<1x32xf32, #tpu.memory_space<vmem>>, vector<1x32xf32>
    %40 = vector.broadcast %39 : vector<1x32xf32> to vector<64x32xf32>
    %41 = arith.addf %38, %40 : vector<64x32xf32>
    %42 = vector.extract_strided_slice %31 {offsets = [0, 0], sizes = [64, 8], strides = [1, 1]} : vector<64x32xf32> to vector<64x8xf32>
    %43 = vector.shape_cast %42 : vector<64x8xf32> to vector<4x16x8xf32>
    %44 = vector.extract_strided_slice %31 {offsets = [0, 8], sizes = [64, 8], strides = [1, 1]} : vector<64x32xf32> to vector<64x8xf32>
    %45 = vector.shape_cast %44 : vector<64x8xf32> to vector<4x16x8xf32>
    %46 = vector.extract_strided_slice %31 {offsets = [0, 16], sizes = [64, 8], strides = [1, 1]} : vector<64x32xf32> to vector<64x8xf32>
    %47 = vector.shape_cast %46 : vector<64x8xf32> to vector<4x16x8xf32>
    %48 = vector.extract_strided_slice %31 {offsets = [0, 24], sizes = [64, 8], strides = [1, 1]} : vector<64x32xf32> to vector<64x8xf32>
    %49 = vector.shape_cast %48 : vector<64x8xf32> to vector<4x16x8xf32>
    %50 = vector.shape_cast %43 : vector<4x16x8xf32> to vector<1x4x16x8xf32>
    %51 = vector.shape_cast %45 : vector<4x16x8xf32> to vector<1x4x16x8xf32>
    %52 = vector.shape_cast %47 : vector<4x16x8xf32> to vector<1x4x16x8xf32>
    %53 = vector.shape_cast %49 : vector<4x16x8xf32> to vector<1x4x16x8xf32>
    %54 = tpu.concatenate %50, %51, %52, %53 in 0 : vector<1x4x16x8xf32>, vector<1x4x16x8xf32>, vector<1x4x16x8xf32>, vector<1x4x16x8xf32> -> vector<4x4x16x8xf32>
    %55 = vector.shape_cast %54 : vector<4x4x16x8xf32> to vector<16x16x8xf32>
    %56 = arith.truncf %55 : vector<16x16x8xf32> to vector<16x16x8xbf16>
    %57 = vector.extract_strided_slice %36 {offsets = [0, 0], sizes = [64, 8], strides = [1, 1]} : vector<64x32xf32> to vector<64x8xf32>
    %58 = vector.shape_cast %57 : vector<64x8xf32> to vector<4x16x8xf32>
    %59 = vector.extract_strided_slice %36 {offsets = [0, 8], sizes = [64, 8], strides = [1, 1]} : vector<64x32xf32> to vector<64x8xf32>
    %60 = vector.shape_cast %59 : vector<64x8xf32> to vector<4x16x8xf32>
    %61 = vector.extract_strided_slice %36 {offsets = [0, 16], sizes = [64, 8], strides = [1, 1]} : vector<64x32xf32> to vector<64x8xf32>
    %62 = vector.shape_cast %61 : vector<64x8xf32> to vector<4x16x8xf32>
    %63 = vector.extract_strided_slice %36 {offsets = [0, 24], sizes = [64, 8], strides = [1, 1]} : vector<64x32xf32> to vector<64x8xf32>
    %64 = vector.shape_cast %63 : vector<64x8xf32> to vector<4x16x8xf32>
    %65 = vector.shape_cast %58 : vector<4x16x8xf32> to vector<1x4x16x8xf32>
    %66 = vector.shape_cast %60 : vector<4x16x8xf32> to vector<1x4x16x8xf32>
    %67 = vector.shape_cast %62 : vector<4x16x8xf32> to vector<1x4x16x8xf32>
    %68 = vector.shape_cast %64 : vector<4x16x8xf32> to vector<1x4x16x8xf32>
    %69 = tpu.concatenate %65, %66, %67, %68 in 0 : vector<1x4x16x8xf32>, vector<1x4x16x8xf32>, vector<1x4x16x8xf32>, vector<1x4x16x8xf32> -> vector<4x4x16x8xf32>
    %70 = vector.shape_cast %69 : vector<4x4x16x8xf32> to vector<16x16x8xf32>
    %71 = arith.truncf %70 : vector<16x16x8xf32> to vector<16x16x8xbf16>
    %72 = vector.extract_strided_slice %41 {offsets = [0, 0], sizes = [64, 8], strides = [1, 1]} : vector<64x32xf32> to vector<64x8xf32>
    %73 = vector.shape_cast %72 : vector<64x8xf32> to vector<4x16x8xf32>
    %74 = vector.extract_strided_slice %41 {offsets = [0, 8], sizes = [64, 8], strides = [1, 1]} : vector<64x32xf32> to vector<64x8xf32>
    %75 = vector.shape_cast %74 : vector<64x8xf32> to vector<4x16x8xf32>
    %76 = vector.extract_strided_slice %41 {offsets = [0, 16], sizes = [64, 8], strides = [1, 1]} : vector<64x32xf32> to vector<64x8xf32>
    %77 = vector.shape_cast %76 : vector<64x8xf32> to vector<4x16x8xf32>
    %78 = vector.extract_strided_slice %41 {offsets = [0, 24], sizes = [64, 8], strides = [1, 1]} : vector<64x32xf32> to vector<64x8xf32>
    %79 = vector.shape_cast %78 : vector<64x8xf32> to vector<4x16x8xf32>
    %80 = vector.shape_cast %73 : vector<4x16x8xf32> to vector<1x4x16x8xf32>
    %81 = vector.shape_cast %75 : vector<4x16x8xf32> to vector<1x4x16x8xf32>
    %82 = vector.shape_cast %77 : vector<4x16x8xf32> to vector<1x4x16x8xf32>
    %83 = vector.shape_cast %79 : vector<4x16x8xf32> to vector<1x4x16x8xf32>
    %84 = tpu.concatenate %80, %81, %82, %83 in 0 : vector<1x4x16x8xf32>, vector<1x4x16x8xf32>, vector<1x4x16x8xf32>, vector<1x4x16x8xf32> -> vector<4x4x16x8xf32>
    %85 = vector.shape_cast %84 : vector<4x4x16x8xf32> to vector<16x16x8xf32>
    %86 = arith.truncf %85 : vector<16x16x8xf32> to vector<16x16x8xbf16>
    "tpu.trace_start"() <{level = 10 : i32, message = "bqd,bkd->bqk"}> : () -> ()
    %cst_25 = arith.constant dense<0.000000e+00> : vector<16x16x16xf32>
    %87 = tpu.matmul %56, %71, %cst_25 {dimension_numbers = #tpu.dot_dimension_numbers<[2], [2], [1], [1], [0, 0, 0, 1, 1, 1], [0], [0]>} : vector<16x16x8xbf16>, vector<16x16x8xbf16>, vector<16x16x16xf32> -> vector<16x16x16xf32>
    "tpu.trace_stop"() : () -> ()
    %88 = tpu.iota {dimensions = array<i32: 2>} : vector<1x1x16xi32>
    %c9_i32 = arith.constant 9 : i32
    %89 = vector.broadcast %c9_i32 : i32 to vector<1x1x16xi32>
    %90 = arith.cmpi slt, %88, %89 : vector<1x1x16xi32>
    %cst_26 = arith.constant -1.000000e+30 : f32
    %91 = vector.shape_cast %90 : vector<1x1x16xi1> to vector<1x1x16xi1>
    %92 = vector.broadcast %91 : vector<1x1x16xi1> to vector<16x16x16xi1>
    %93 = vector.broadcast %cst_26 : f32 to vector<16x16x16xf32>
    %94 = arith.select %92, %87, %93 : vector<16x16x16xi1>, vector<16x16x16xf32>
    %cst_27 = arith.constant dense<0xFF800000> : vector<16x16xf32>
    %95 = vector.multi_reduction <maximumf>, %94, %cst_27 [2] : vector<16x16x16xf32> to vector<16x16xf32>
    %96 = vector.shape_cast %95 : vector<16x16xf32> to vector<16x16x1xf32>
    %97 = vector.broadcast %96 : vector<16x16x1xf32> to vector<16x16x16xf32>
    %98 = arith.subf %94, %97 : vector<16x16x16xf32>
    %99 = math.exp %98 : vector<16x16x16xf32>
    %cst_28 = arith.constant dense<0.000000e+00> : vector<16x16xf32>
    %100 = vector.multi_reduction <add>, %99, %cst_28 [2] : vector<16x16x16xf32> to vector<16x16xf32>
    %101 = vector.shape_cast %100 : vector<16x16xf32> to vector<16x16x1xf32>
    %102 = tpu.reciprocal %101 {approx = true} : vector<16x16x1xf32> -> vector<16x16x1xf32>
    %103 = vector.broadcast %102 : vector<16x16x1xf32> to vector<16x16x16xf32>
    %104 = arith.mulf %99, %103 : vector<16x16x16xf32>
    %105 = arith.truncf %104 : vector<16x16x16xf32> to vector<16x16x16xbf16>
    "tpu.trace_start"() <{level = 10 : i32, message = "bqk,bkd->bqd"}> : () -> ()
    %cst_29 = arith.constant dense<0.000000e+00> : vector<16x16x8xf32>
    %106 = tpu.matmul %105, %86, %cst_29 {dimension_numbers = #tpu.dot_dimension_numbers<[2], [1], [1], [2], [0, 0, 0, 1, 1, 2], [0], [0]>} : vector<16x16x16xbf16>, vector<16x16x8xbf16>, vector<16x16x8xf32> -> vector<16x16x8xf32>
    "tpu.trace_stop"() : () -> ()
    %107 = vector.shape_cast %106 : vector<16x16x8xf32> to vector<4x4x16x8xf32>
    %108 = vector.extract_strided_slice %107 {offsets = [0, 0, 0, 0], sizes = [1, 4, 16, 8], strides = [1, 1, 1, 1]} : vector<4x4x16x8xf32> to vector<1x4x16x8xf32>
    %109 = vector.shape_cast %108 : vector<1x4x16x8xf32> to vector<4x16x8xf32>
    %110 = vector.shape_cast %109 : vector<4x16x8xf32> to vector<64x8xf32>
    %111 = vector.extract_strided_slice %107 {offsets = [1, 0, 0, 0], sizes = [1, 4, 16, 8], strides = [1, 1, 1, 1]} : vector<4x4x16x8xf32> to vector<1x4x16x8xf32>
    %112 = vector.shape_cast %111 : vector<1x4x16x8xf32> to vector<4x16x8xf32>
    %113 = vector.shape_cast %112 : vector<4x16x8xf32> to vector<64x8xf32>
    %114 = vector.extract_strided_slice %107 {offsets = [2, 0, 0, 0], sizes = [1, 4, 16, 8], strides = [1, 1, 1, 1]} : vector<4x4x16x8xf32> to vector<1x4x16x8xf32>
    %115 = vector.shape_cast %114 : vector<1x4x16x8xf32> to vector<4x16x8xf32>
    %116 = vector.shape_cast %115 : vector<4x16x8xf32> to vector<64x8xf32>
    %117 = vector.extract_strided_slice %107 {offsets = [3, 0, 0, 0], sizes = [1, 4, 16, 8], strides = [1, 1, 1, 1]} : vector<4x4x16x8xf32> to vector<1x4x16x8xf32>
    %118 = vector.shape_cast %117 : vector<1x4x16x8xf32> to vector<4x16x8xf32>
    %119 = vector.shape_cast %118 : vector<4x16x8xf32> to vector<64x8xf32>
    %120 = tpu.concatenate %110, %113, %116, %119 in 1 : vector<64x8xf32>, vector<64x8xf32>, vector<64x8xf32>, vector<64x8xf32> -> vector<64x32xf32>
    %121 = arith.truncf %120 : vector<64x32xf32> to vector<64x32xbf16>
    %c0_30 = arith.constant 0 : index
    %c0_31 = arith.constant 0 : index
    %122 = vector.load %arg10[%c0_30, %c0_31] : memref<32x32xbf16, #tpu.memory_space<vmem>>, vector<32x32xbf16>
    %cst_32 = arith.constant dense<0.000000e+00> : vector<64x32xf32>
    %123 = tpu.matmul %121, %122, %cst_32 {dimension_numbers = #tpu.dot_dimension_numbers<[1], [0], [0], [1], [0, 0, 1, 1], [], []>} : vector<64x32xbf16>, vector<32x32xbf16>, vector<64x32xf32> -> vector<64x32xf32>
    %c0_33 = arith.constant 0 : index
    %c0_34 = arith.constant 0 : index
    %124 = vector.load %arg11[%c0_33, %c0_34] : memref<1x32xf32, #tpu.memory_space<vmem>>, vector<1x32xf32>
    %125 = vector.broadcast %124 : vector<1x32xf32> to vector<64x32xf32>
    %126 = arith.addf %123, %125 : vector<64x32xf32>
    %127 = arith.addf %1, %126 : vector<64x32xf32>
    %c0_35 = arith.constant 0 : index
    %c0_36 = arith.constant 0 : index
    %128 = vector.load %arg12[%c0_35, %c0_36] : memref<1x32xf32, #tpu.memory_space<vmem>>, vector<1x32xf32>
    %c0_37 = arith.constant 0 : index
    %c0_38 = arith.constant 0 : index
    %129 = vector.load %arg13[%c0_37, %c0_38] : memref<1x32xf32, #tpu.memory_space<vmem>>, vector<1x32xf32>
    %cst_39 = arith.constant dense<0.000000e+00> : vector<64xf32>
    %130 = vector.multi_reduction <add>, %127, %cst_39 [1] : vector<64x32xf32> to vector<64xf32>
    %131 = vector.shape_cast %130 : vector<64xf32> to vector<64x1xf32>
    %cst_40 = arith.constant 3.200000e+01 : f32
    %132 = vector.broadcast %cst_40 : f32 to vector<64x1xf32>
    %133 = arith.divf %131, %132 : vector<64x1xf32>
    %134 = vector.broadcast %133 : vector<64x1xf32> to vector<64x32xf32>
    %135 = arith.subf %127, %134 : vector<64x32xf32>
    %136 = arith.mulf %135, %135 : vector<64x32xf32>
    %cst_41 = arith.constant dense<0.000000e+00> : vector<64xf32>
    %137 = vector.multi_reduction <add>, %136, %cst_41 [1] : vector<64x32xf32> to vector<64xf32>
    %138 = vector.shape_cast %137 : vector<64xf32> to vector<64x1xf32>
    %cst_42 = arith.constant 3.200000e+01 : f32
    %139 = vector.broadcast %cst_42 : f32 to vector<64x1xf32>
    %140 = arith.divf %138, %139 : vector<64x1xf32>
    %141 = vector.broadcast %133 : vector<64x1xf32> to vector<64x32xf32>
    %142 = arith.subf %127, %141 : vector<64x32xf32>
    %cst_43 = arith.constant 9.99999974E-6 : f32
    %143 = vector.broadcast %cst_43 : f32 to vector<64x1xf32>
    %144 = arith.addf %140, %143 : vector<64x1xf32>
    %145 = math.rsqrt %144 : vector<64x1xf32>
    %146 = vector.broadcast %145 : vector<64x1xf32> to vector<64x32xf32>
    %147 = arith.mulf %142, %146 : vector<64x32xf32>
    %148 = vector.broadcast %128 : vector<1x32xf32> to vector<64x32xf32>
    %149 = arith.mulf %147, %148 : vector<64x32xf32>
    %150 = vector.broadcast %129 : vector<1x32xf32> to vector<64x32xf32>
    %151 = arith.addf %149, %150 : vector<64x32xf32>
    %152 = arith.truncf %151 : vector<64x32xf32> to vector<64x32xbf16>
    %c0_44 = arith.constant 0 : index
    %c0_45 = arith.constant 0 : index
    %153 = vector.load %arg14[%c0_44, %c0_45] : memref<32x128xbf16, #tpu.memory_space<vmem>>, vector<32x128xbf16>
    %cst_46 = arith.constant dense<0.000000e+00> : vector<64x128xf32>
    %154 = tpu.matmul %152, %153, %cst_46 {dimension_numbers = #tpu.dot_dimension_numbers<[1], [0], [0], [1], [0, 0, 1, 1], [], []>} : vector<64x32xbf16>, vector<32x128xbf16>, vector<64x128xf32> -> vector<64x128xf32>
    %c0_47 = arith.constant 0 : index
    %c0_48 = arith.constant 0 : index
    %155 = vector.load %arg15[%c0_47, %c0_48] : memref<1x128xf32, #tpu.memory_space<vmem>>, vector<1x128xf32>
    %156 = vector.broadcast %155 : vector<1x128xf32> to vector<64x128xf32>
    %157 = arith.addf %154, %156 : vector<64x128xf32>
    %cst_49 = arith.constant 5.000000e-01 : f32
    %158 = vector.broadcast %cst_49 : f32 to vector<64x128xf32>
    %159 = arith.mulf %158, %157 : vector<64x128xf32>
    %cst_50 = arith.constant 0.707106769 : f32
    %160 = vector.broadcast %cst_50 : f32 to vector<64x128xf32>
    %161 = arith.mulf %157, %160 : vector<64x128xf32>
    %162 = math.absf %161 : vector<64x128xf32>
    %cst_51 = arith.constant 0.327591091 : f32
    %163 = vector.broadcast %cst_51 : f32 to vector<64x128xf32>
    %164 = arith.mulf %163, %162 : vector<64x128xf32>
    %cst_52 = arith.constant 1.000000e+00 : f32
    %165 = vector.broadcast %cst_52 : f32 to vector<64x128xf32>
    %166 = arith.addf %165, %164 : vector<64x128xf32>
    %cst_53 = arith.constant 1.000000e+00 : f32
    %167 = vector.broadcast %cst_53 : f32 to vector<64x128xf32>
    %168 = arith.divf %167, %166 : vector<64x128xf32>
    %cst_54 = arith.constant 1.06140542 : f32
    %169 = vector.broadcast %cst_54 : f32 to vector<64x128xf32>
    %170 = arith.mulf %169, %168 : vector<64x128xf32>
    %cst_55 = arith.constant -1.45315206 : f32
    %171 = vector.broadcast %cst_55 : f32 to vector<64x128xf32>
    %172 = arith.addf %170, %171 : vector<64x128xf32>
    %173 = arith.mulf %172, %168 : vector<64x128xf32>
    %cst_56 = arith.constant 1.42141378 : f32
    %174 = vector.broadcast %cst_56 : f32 to vector<64x128xf32>
    %175 = arith.addf %173, %174 : vector<64x128xf32>
    %176 = arith.mulf %175, %168 : vector<64x128xf32>
    %cst_57 = arith.constant -0.284496725 : f32
    %177 = vector.broadcast %cst_57 : f32 to vector<64x128xf32>
    %178 = arith.addf %176, %177 : vector<64x128xf32>
    %179 = arith.mulf %178, %168 : vector<64x128xf32>
    %cst_58 = arith.constant 0.254829586 : f32
    %180 = vector.broadcast %cst_58 : f32 to vector<64x128xf32>
    %181 = arith.addf %179, %180 : vector<64x128xf32>
    %182 = arith.mulf %181, %168 : vector<64x128xf32>
    %cst_59 = arith.constant 0.000000e+00 : f32
    %183 = vector.broadcast %cst_59 : f32 to vector<64x128xf32>
    %184 = arith.subf %183, %162 : vector<64x128xf32>
    %185 = arith.mulf %184, %162 : vector<64x128xf32>
    %186 = math.exp %185 : vector<64x128xf32>
    %187 = arith.mulf %182, %186 : vector<64x128xf32>
    %cst_60 = arith.constant 1.000000e+00 : f32
    %188 = vector.broadcast %cst_60 : f32 to vector<64x128xf32>
    %189 = arith.subf %188, %187 : vector<64x128xf32>
    %cst_61 = arith.constant 0.000000e+00 : f32
    %190 = vector.broadcast %cst_61 : f32 to vector<64x128xf32>
    %191 = arith.cmpf olt, %161, %190 : vector<64x128xf32>
    %cst_62 = arith.constant 0.000000e+00 : f32
    %192 = vector.broadcast %cst_62 : f32 to vector<64x128xf32>
    %193 = arith.subf %192, %189 : vector<64x128xf32>
    %194 = arith.select %191, %193, %189 : vector<64x128xi1>, vector<64x128xf32>
    %cst_63 = arith.constant 1.000000e+00 : f32
    %195 = vector.broadcast %cst_63 : f32 to vector<64x128xf32>
    %196 = arith.addf %195, %194 : vector<64x128xf32>
    %197 = arith.mulf %159, %196 : vector<64x128xf32>
    %198 = arith.truncf %197 : vector<64x128xf32> to vector<64x128xbf16>
    %c0_64 = arith.constant 0 : index
    %c0_65 = arith.constant 0 : index
    %199 = vector.load %arg16[%c0_64, %c0_65] : memref<128x32xbf16, #tpu.memory_space<vmem>>, vector<128x32xbf16>
    %cst_66 = arith.constant dense<0.000000e+00> : vector<64x32xf32>
    %200 = tpu.matmul %198, %199, %cst_66 {dimension_numbers = #tpu.dot_dimension_numbers<[1], [0], [0], [1], [0, 0, 1, 1], [], []>} : vector<64x128xbf16>, vector<128x32xbf16>, vector<64x32xf32> -> vector<64x32xf32>
    %c0_67 = arith.constant 0 : index
    %c0_68 = arith.constant 0 : index
    %201 = vector.load %arg17[%c0_67, %c0_68] : memref<1x32xf32, #tpu.memory_space<vmem>>, vector<1x32xf32>
    %202 = vector.broadcast %201 : vector<1x32xf32> to vector<64x32xf32>
    %203 = arith.addf %200, %202 : vector<64x32xf32>
    %204 = arith.addf %127, %203 : vector<64x32xf32>
    %205 = vector.shape_cast %204 : vector<64x32xf32> to vector<4x16x32xf32>
    %c0_69 = arith.constant 0 : index
    %c0_70 = arith.constant 0 : index
    %c0_71 = arith.constant 0 : index
    %206 = vector.load %arg18[%c0_69, %c0_70, %c0_71] : memref<4x16x32xf32, #tpu.memory_space<vmem>>, vector<4x16x32xf32>
    tpu.vector_store %arg18[%c0_69, %c0_70, %c0_71], %205 {strides = array<i32>} : memref<4x16x32xf32, #tpu.memory_space<vmem>>, vector<4x16x32xf32>,
    return
  }
  func.func @transform_0(%arg0: i32) -> (i32, i32, i32) {
    %c0_i32 = arith.constant 0 : i32
    %c0_i32_0 = arith.constant 0 : i32
    %c0_i32_1 = arith.constant 0 : i32
    return %arg0, %c0_i32, %c0_i32_0 : i32, i32, i32
  }
  func.func @transform_1(%arg0: i32) -> (i32, i32) {
    %c0_i32 = arith.constant 0 : i32
    %c0_i32_0 = arith.constant 0 : i32
    %c0_i32_1 = arith.constant 0 : i32
    return %c0_i32, %c0_i32_0 : i32, i32
  }
  func.func @transform_2(%arg0: i32) -> (i32, i32) {
    %c0_i32 = arith.constant 0 : i32
    %c0_i32_0 = arith.constant 0 : i32
    %c0_i32_1 = arith.constant 0 : i32
    return %c0_i32, %c0_i32_0 : i32, i32
  }
  func.func @transform_3(%arg0: i32) -> (i32, i32) {
    %c0_i32 = arith.constant 0 : i32
    %c0_i32_0 = arith.constant 0 : i32
    %c0_i32_1 = arith.constant 0 : i32
    return %c0_i32, %c0_i32_0 : i32, i32
  }
  func.func @transform_4(%arg0: i32) -> (i32, i32) {
    %c0_i32 = arith.constant 0 : i32
    %c0_i32_0 = arith.constant 0 : i32
    %c0_i32_1 = arith.constant 0 : i32
    return %c0_i32, %c0_i32_0 : i32, i32
  }
  func.func @transform_5(%arg0: i32) -> (i32, i32) {
    %c0_i32 = arith.constant 0 : i32
    %c0_i32_0 = arith.constant 0 : i32
    %c0_i32_1 = arith.constant 0 : i32
    return %c0_i32, %c0_i32_0 : i32, i32
  }
  func.func @transform_6(%arg0: i32) -> (i32, i32) {
    %c0_i32 = arith.constant 0 : i32
    %c0_i32_0 = arith.constant 0 : i32
    %c0_i32_1 = arith.constant 0 : i32
    return %c0_i32, %c0_i32_0 : i32, i32
  }
  func.func @transform_7(%arg0: i32) -> (i32, i32) {
    %c0_i32 = arith.constant 0 : i32
    %c0_i32_0 = arith.constant 0 : i32
    %c0_i32_1 = arith.constant 0 : i32
    return %c0_i32, %c0_i32_0 : i32, i32
  }
  func.func @transform_8(%arg0: i32) -> (i32, i32) {
    %c0_i32 = arith.constant 0 : i32
    %c0_i32_0 = arith.constant 0 : i32
    %c0_i32_1 = arith.constant 0 : i32
    return %c0_i32, %c0_i32_0 : i32, i32
  }
  func.func @transform_9(%arg0: i32) -> (i32, i32) {
    %c0_i32 = arith.constant 0 : i32
    %c0_i32_0 = arith.constant 0 : i32
    %c0_i32_1 = arith.constant 0 : i32
    return %c0_i32, %c0_i32_0 : i32, i32
  }
  func.func @transform_10(%arg0: i32) -> (i32, i32) {
    %c0_i32 = arith.constant 0 : i32
    %c0_i32_0 = arith.constant 0 : i32
    %c0_i32_1 = arith.constant 0 : i32
    return %c0_i32, %c0_i32_0 : i32, i32
  }
  func.func @transform_11(%arg0: i32) -> (i32, i32) {
    %c0_i32 = arith.constant 0 : i32
    %c0_i32_0 = arith.constant 0 : i32
    %c0_i32_1 = arith.constant 0 : i32
    return %c0_i32, %c0_i32_0 : i32, i32
  }
  func.func @transform_12(%arg0: i32) -> (i32, i32) {
    %c0_i32 = arith.constant 0 : i32
    %c0_i32_0 = arith.constant 0 : i32
    %c0_i32_1 = arith.constant 0 : i32
    return %c0_i32, %c0_i32_0 : i32, i32
  }
  func.func @transform_13(%arg0: i32) -> (i32, i32) {
    %c0_i32 = arith.constant 0 : i32
    %c0_i32_0 = arith.constant 0 : i32
    %c0_i32_1 = arith.constant 0 : i32
    return %c0_i32, %c0_i32_0 : i32, i32
  }
  func.func @transform_14(%arg0: i32) -> (i32, i32) {
    %c0_i32 = arith.constant 0 : i32
    %c0_i32_0 = arith.constant 0 : i32
    %c0_i32_1 = arith.constant 0 : i32
    return %c0_i32, %c0_i32_0 : i32, i32
  }
  func.func @transform_15(%arg0: i32) -> (i32, i32) {
    %c0_i32 = arith.constant 0 : i32
    %c0_i32_0 = arith.constant 0 : i32
    %c0_i32_1 = arith.constant 0 : i32
    return %c0_i32, %c0_i32_0 : i32, i32
  }
  func.func @transform_16(%arg0: i32) -> (i32, i32) {
    %c0_i32 = arith.constant 0 : i32
    %c0_i32_0 = arith.constant 0 : i32
    %c0_i32_1 = arith.constant 0 : i32
    return %c0_i32, %c0_i32_0 : i32, i32
  }
  func.func @transform_17(%arg0: i32) -> (i32, i32, i32) {
    %c0_i32 = arith.constant 0 : i32
    %c0_i32_0 = arith.constant 0 : i32
    %c0_i32_1 = arith.constant 0 : i32
    return %arg0, %c0_i32, %c0_i32_0 : i32, i32, i32
  }
}

module attributes {stable_mosaic.version = 11 : i64} {
  func.func @kernel(%arg0: i32, %arg1: memref<1x16x32xf32, #tpu.memory_space<vmem>>, %arg2: memref<1x32xf32, #tpu.memory_space<vmem>>, %arg3: memref<1x32xf32, #tpu.memory_space<vmem>>, %arg4: memref<32x32xbf16, #tpu.memory_space<vmem>>, %arg5: memref<1x32xf32, #tpu.memory_space<vmem>>, %arg6: memref<32x32xbf16, #tpu.memory_space<vmem>>, %arg7: memref<1x32xf32, #tpu.memory_space<vmem>>, %arg8: memref<32x32xbf16, #tpu.memory_space<vmem>>, %arg9: memref<1x32xf32, #tpu.memory_space<vmem>>, %arg10: memref<32x32xbf16, #tpu.memory_space<vmem>>, %arg11: memref<1x32xf32, #tpu.memory_space<vmem>>, %arg12: memref<1x32xf32, #tpu.memory_space<vmem>>, %arg13: memref<1x32xf32, #tpu.memory_space<vmem>>, %arg14: memref<32x128xbf16, #tpu.memory_space<vmem>>, %arg15: memref<1x128xf32, #tpu.memory_space<vmem>>, %arg16: memref<128x32xbf16, #tpu.memory_space<vmem>>, %arg17: memref<1x32xf32, #tpu.memory_space<vmem>>, %arg18: memref<1x16x32xf32, #tpu.memory_space<vmem>>) attributes {dimension_semantics = [#tpu.dimension_semantics<parallel>], iteration_bounds = array<i64: 2>, scalar_prefetch = 0 : i64, scratch_operands = 0 : i64, tpu.core_type = #tpu.core_type<tc>, window_params = [{transform_indices = @transform_0, window_bounds = array<i64: 1, 16, 32>}, {pipeline_mode = #tpu.pipeline_mode<synchronous>, transform_indices = @transform_1, window_bounds = array<i64: 1, 32>}, {pipeline_mode = #tpu.pipeline_mode<synchronous>, transform_indices = @transform_2, window_bounds = array<i64: 1, 32>}, {pipeline_mode = #tpu.pipeline_mode<synchronous>, transform_indices = @transform_3, window_bounds = array<i64: 32, 32>}, {pipeline_mode = #tpu.pipeline_mode<synchronous>, transform_indices = @transform_4, window_bounds = array<i64: 1, 32>}, {pipeline_mode = #tpu.pipeline_mode<synchronous>, transform_indices = @transform_5, window_bounds = array<i64: 32, 32>}, {pipeline_mode = #tpu.pipeline_mode<synchronous>, transform_indices = @transform_6, window_bounds = array<i64: 1, 32>}, {pipeline_mode = #tpu.pipeline_mode<synchronous>, transform_indices = @transform_7, window_bounds = array<i64: 32, 32>}, {pipeline_mode = #tpu.pipeline_mode<synchronous>, transform_indices = @transform_8, window_bounds = array<i64: 1, 32>}, {pipeline_mode = #tpu.pipeline_mode<synchronous>, transform_indices = @transform_9, window_bounds = array<i64: 32, 32>}, {pipeline_mode = #tpu.pipeline_mode<synchronous>, transform_indices = @transform_10, window_bounds = array<i64: 1, 32>}, {pipeline_mode = #tpu.pipeline_mode<synchronous>, transform_indices = @transform_11, window_bounds = array<i64: 1, 32>}, {pipeline_mode = #tpu.pipeline_mode<synchronous>, transform_indices = @transform_12, window_bounds = array<i64: 1, 32>}, {pipeline_mode = #tpu.pipeline_mode<synchronous>, transform_indices = @transform_13, window_bounds = array<i64: 32, 128>}, {pipeline_mode = #tpu.pipeline_mode<synchronous>, transform_indices = @transform_14, window_bounds = array<i64: 1, 128>}, {pipeline_mode = #tpu.pipeline_mode<synchronous>, transform_indices = @transform_15, window_bounds = array<i64: 128, 32>}, {pipeline_mode = #tpu.pipeline_mode<synchronous>, transform_indices = @transform_16, window_bounds = array<i64: 1, 32>}, {transform_indices = @transform_17, window_bounds = array<i64: 1, 16, 32>}]} {
    %c0 = arith.constant 0 : index
    %c0_0 = arith.constant 0 : index
    %c0_1 = arith.constant 0 : index
    %0 = vector.load %arg1[%c0, %c0_0, %c0_1] : memref<1x16x32xf32, #tpu.memory_space<vmem>>, vector<1x16x32xf32>
    %1 = vector.shape_cast %0 : vector<1x16x32xf32> to vector<16x32xf32>
    %c0_2 = arith.constant 0 : index
    %c0_3 = arith.constant 0 : index
    %2 = vector.load %arg2[%c0_2, %c0_3] : memref<1x32xf32, #tpu.memory_space<vmem>>, vector<1x32xf32>
    %c0_4 = arith.constant 0 : index
    %c0_5 = arith.constant 0 : index
    %3 = vector.load %arg3[%c0_4, %c0_5] : memref<1x32xf32, #tpu.memory_space<vmem>>, vector<1x32xf32>
    %cst = arith.constant dense<0.000000e+00> : vector<16xf32>
    %4 = vector.multi_reduction <add>, %1, %cst [1] : vector<16x32xf32> to vector<16xf32>
    %5 = vector.shape_cast %4 : vector<16xf32> to vector<16x1xf32>
    %cst_6 = arith.constant 3.200000e+01 : f32
    %6 = vector.broadcast %cst_6 : f32 to vector<16x1xf32>
    %7 = arith.divf %5, %6 : vector<16x1xf32>
    %8 = vector.broadcast %7 : vector<16x1xf32> to vector<16x32xf32>
    %9 = arith.subf %1, %8 : vector<16x32xf32>
    %10 = arith.mulf %9, %9 : vector<16x32xf32>
    %cst_7 = arith.constant dense<0.000000e+00> : vector<16xf32>
    %11 = vector.multi_reduction <add>, %10, %cst_7 [1] : vector<16x32xf32> to vector<16xf32>
    %12 = vector.shape_cast %11 : vector<16xf32> to vector<16x1xf32>
    %cst_8 = arith.constant 3.200000e+01 : f32
    %13 = vector.broadcast %cst_8 : f32 to vector<16x1xf32>
    %14 = arith.divf %12, %13 : vector<16x1xf32>
    %15 = vector.broadcast %7 : vector<16x1xf32> to vector<16x32xf32>
    %16 = arith.subf %1, %15 : vector<16x32xf32>
    %cst_9 = arith.constant 9.99999974E-6 : f32
    %17 = vector.broadcast %cst_9 : f32 to vector<16x1xf32>
    %18 = arith.addf %14, %17 : vector<16x1xf32>
    %19 = math.rsqrt %18 : vector<16x1xf32>
    %20 = vector.broadcast %19 : vector<16x1xf32> to vector<16x32xf32>
    %21 = arith.mulf %16, %20 : vector<16x32xf32>
    %22 = vector.broadcast %2 : vector<1x32xf32> to vector<16x32xf32>
    %23 = arith.mulf %21, %22 : vector<16x32xf32>
    %24 = vector.broadcast %3 : vector<1x32xf32> to vector<16x32xf32>
    %25 = arith.addf %23, %24 : vector<16x32xf32>
    %26 = arith.truncf %25 : vector<16x32xf32> to vector<16x32xbf16>
    %c0_10 = arith.constant 0 : index
    %c0_11 = arith.constant 0 : index
    %27 = vector.load %arg4[%c0_10, %c0_11] : memref<32x32xbf16, #tpu.memory_space<vmem>>, vector<32x32xbf16>
    %cst_12 = arith.constant dense<0.000000e+00> : vector<16x32xf32>
    %28 = tpu.matmul %26, %27, %cst_12 {dimension_numbers = #tpu.dot_dimension_numbers<[1], [0], [0], [1], [0, 0, 1, 1], [], []>} : vector<16x32xbf16>, vector<32x32xbf16>, vector<16x32xf32> -> vector<16x32xf32>
    %c0_13 = arith.constant 0 : index
    %c0_14 = arith.constant 0 : index
    %29 = vector.load %arg5[%c0_13, %c0_14] : memref<1x32xf32, #tpu.memory_space<vmem>>, vector<1x32xf32>
    %30 = vector.broadcast %29 : vector<1x32xf32> to vector<16x32xf32>
    %31 = arith.addf %28, %30 : vector<16x32xf32>
    %c0_15 = arith.constant 0 : index
    %c0_16 = arith.constant 0 : index
    %32 = vector.load %arg6[%c0_15, %c0_16] : memref<32x32xbf16, #tpu.memory_space<vmem>>, vector<32x32xbf16>
    %cst_17 = arith.constant dense<0.000000e+00> : vector<16x32xf32>
    %33 = tpu.matmul %26, %32, %cst_17 {dimension_numbers = #tpu.dot_dimension_numbers<[1], [0], [0], [1], [0, 0, 1, 1], [], []>} : vector<16x32xbf16>, vector<32x32xbf16>, vector<16x32xf32> -> vector<16x32xf32>
    %c0_18 = arith.constant 0 : index
    %c0_19 = arith.constant 0 : index
    %34 = vector.load %arg7[%c0_18, %c0_19] : memref<1x32xf32, #tpu.memory_space<vmem>>, vector<1x32xf32>
    %35 = vector.broadcast %34 : vector<1x32xf32> to vector<16x32xf32>
    %36 = arith.addf %33, %35 : vector<16x32xf32>
    %c0_20 = arith.constant 0 : index
    %c0_21 = arith.constant 0 : index
    %37 = vector.load %arg8[%c0_20, %c0_21] : memref<32x32xbf16, #tpu.memory_space<vmem>>, vector<32x32xbf16>
    %cst_22 = arith.constant dense<0.000000e+00> : vector<16x32xf32>
    %38 = tpu.matmul %26, %37, %cst_22 {dimension_numbers = #tpu.dot_dimension_numbers<[1], [0], [0], [1], [0, 0, 1, 1], [], []>} : vector<16x32xbf16>, vector<32x32xbf16>, vector<16x32xf32> -> vector<16x32xf32>
    %c0_23 = arith.constant 0 : index
    %c0_24 = arith.constant 0 : index
    %39 = vector.load %arg9[%c0_23, %c0_24] : memref<1x32xf32, #tpu.memory_space<vmem>>, vector<1x32xf32>
    %40 = vector.broadcast %39 : vector<1x32xf32> to vector<16x32xf32>
    %41 = arith.addf %38, %40 : vector<16x32xf32>
    %42 = vector.extract_strided_slice %31 {offsets = [0, 0], sizes = [16, 8], strides = [1, 1]} : vector<16x32xf32> to vector<16x8xf32>
    %43 = vector.shape_cast %42 : vector<16x8xf32> to vector<1x16x8xf32>
    %44 = vector.extract_strided_slice %31 {offsets = [0, 8], sizes = [16, 8], strides = [1, 1]} : vector<16x32xf32> to vector<16x8xf32>
    %45 = vector.shape_cast %44 : vector<16x8xf32> to vector<1x16x8xf32>
    %46 = vector.extract_strided_slice %31 {offsets = [0, 16], sizes = [16, 8], strides = [1, 1]} : vector<16x32xf32> to vector<16x8xf32>
    %47 = vector.shape_cast %46 : vector<16x8xf32> to vector<1x16x8xf32>
    %48 = vector.extract_strided_slice %31 {offsets = [0, 24], sizes = [16, 8], strides = [1, 1]} : vector<16x32xf32> to vector<16x8xf32>
    %49 = vector.shape_cast %48 : vector<16x8xf32> to vector<1x16x8xf32>
    %50 = vector.shape_cast %43 : vector<1x16x8xf32> to vector<1x1x16x8xf32>
    %51 = vector.shape_cast %45 : vector<1x16x8xf32> to vector<1x1x16x8xf32>
    %52 = vector.shape_cast %47 : vector<1x16x8xf32> to vector<1x1x16x8xf32>
    %53 = vector.shape_cast %49 : vector<1x16x8xf32> to vector<1x1x16x8xf32>
    %54 = tpu.concatenate %50, %51, %52, %53 in 0 : vector<1x1x16x8xf32>, vector<1x1x16x8xf32>, vector<1x1x16x8xf32>, vector<1x1x16x8xf32> -> vector<4x1x16x8xf32>
    %55 = vector.shape_cast %54 : vector<4x1x16x8xf32> to vector<4x16x8xf32>
    %56 = arith.truncf %55 : vector<4x16x8xf32> to vector<4x16x8xbf16>
    %57 = vector.extract_strided_slice %36 {offsets = [0, 0], sizes = [16, 8], strides = [1, 1]} : vector<16x32xf32> to vector<16x8xf32>
    %58 = vector.shape_cast %57 : vector<16x8xf32> to vector<1x16x8xf32>
    %59 = vector.extract_strided_slice %36 {offsets = [0, 8], sizes = [16, 8], strides = [1, 1]} : vector<16x32xf32> to vector<16x8xf32>
    %60 = vector.shape_cast %59 : vector<16x8xf32> to vector<1x16x8xf32>
    %61 = vector.extract_strided_slice %36 {offsets = [0, 16], sizes = [16, 8], strides = [1, 1]} : vector<16x32xf32> to vector<16x8xf32>
    %62 = vector.shape_cast %61 : vector<16x8xf32> to vector<1x16x8xf32>
    %63 = vector.extract_strided_slice %36 {offsets = [0, 24], sizes = [16, 8], strides = [1, 1]} : vector<16x32xf32> to vector<16x8xf32>
    %64 = vector.shape_cast %63 : vector<16x8xf32> to vector<1x16x8xf32>
    %65 = vector.shape_cast %58 : vector<1x16x8xf32> to vector<1x1x16x8xf32>
    %66 = vector.shape_cast %60 : vector<1x16x8xf32> to vector<1x1x16x8xf32>
    %67 = vector.shape_cast %62 : vector<1x16x8xf32> to vector<1x1x16x8xf32>
    %68 = vector.shape_cast %64 : vector<1x16x8xf32> to vector<1x1x16x8xf32>
    %69 = tpu.concatenate %65, %66, %67, %68 in 0 : vector<1x1x16x8xf32>, vector<1x1x16x8xf32>, vector<1x1x16x8xf32>, vector<1x1x16x8xf32> -> vector<4x1x16x8xf32>
    %70 = vector.shape_cast %69 : vector<4x1x16x8xf32> to vector<4x16x8xf32>
    %71 = arith.truncf %70 : vector<4x16x8xf32> to vector<4x16x8xbf16>
    %72 = vector.extract_strided_slice %41 {offsets = [0, 0], sizes = [16, 8], strides = [1, 1]} : vector<16x32xf32> to vector<16x8xf32>
    %73 = vector.shape_cast %72 : vector<16x8xf32> to vector<1x16x8xf32>
    %74 = vector.extract_strided_slice %41 {offsets = [0, 8], sizes = [16, 8], strides = [1, 1]} : vector<16x32xf32> to vector<16x8xf32>
    %75 = vector.shape_cast %74 : vector<16x8xf32> to vector<1x16x8xf32>
    %76 = vector.extract_strided_slice %41 {offsets = [0, 16], sizes = [16, 8], strides = [1, 1]} : vector<16x32xf32> to vector<16x8xf32>
    %77 = vector.shape_cast %76 : vector<16x8xf32> to vector<1x16x8xf32>
    %78 = vector.extract_strided_slice %41 {offsets = [0, 24], sizes = [16, 8], strides = [1, 1]} : vector<16x32xf32> to vector<16x8xf32>
    %79 = vector.shape_cast %78 : vector<16x8xf32> to vector<1x16x8xf32>
    %80 = vector.shape_cast %73 : vector<1x16x8xf32> to vector<1x1x16x8xf32>
    %81 = vector.shape_cast %75 : vector<1x16x8xf32> to vector<1x1x16x8xf32>
    %82 = vector.shape_cast %77 : vector<1x16x8xf32> to vector<1x1x16x8xf32>
    %83 = vector.shape_cast %79 : vector<1x16x8xf32> to vector<1x1x16x8xf32>
    %84 = tpu.concatenate %80, %81, %82, %83 in 0 : vector<1x1x16x8xf32>, vector<1x1x16x8xf32>, vector<1x1x16x8xf32>, vector<1x1x16x8xf32> -> vector<4x1x16x8xf32>
    %85 = vector.shape_cast %84 : vector<4x1x16x8xf32> to vector<4x16x8xf32>
    %86 = arith.truncf %85 : vector<4x16x8xf32> to vector<4x16x8xbf16>
    "tpu.trace_start"() <{level = 10 : i32, message = "bqd,bkd->bqk"}> : () -> ()
    %cst_25 = arith.constant dense<0.000000e+00> : vector<4x16x16xf32>
    %87 = tpu.matmul %56, %71, %cst_25 {dimension_numbers = #tpu.dot_dimension_numbers<[2], [2], [1], [1], [0, 0, 0, 1, 1, 1], [0], [0]>} : vector<4x16x8xbf16>, vector<4x16x8xbf16>, vector<4x16x16xf32> -> vector<4x16x16xf32>
    "tpu.trace_stop"() : () -> ()
    %88 = tpu.iota {dimensions = array<i32: 2>} : vector<1x1x16xi32>
    %c4_i32 = arith.constant 4 : i32
    %89 = vector.broadcast %c4_i32 : i32 to vector<1x1x16xi32>
    %90 = arith.cmpi slt, %88, %89 : vector<1x1x16xi32>
    %cst_26 = arith.constant -1.000000e+30 : f32
    %91 = vector.shape_cast %90 : vector<1x1x16xi1> to vector<1x1x16xi1>
    %92 = vector.broadcast %91 : vector<1x1x16xi1> to vector<4x16x16xi1>
    %93 = vector.broadcast %cst_26 : f32 to vector<4x16x16xf32>
    %94 = arith.select %92, %87, %93 : vector<4x16x16xi1>, vector<4x16x16xf32>
    %cst_27 = arith.constant dense<0xFF800000> : vector<4x16xf32>
    %95 = vector.multi_reduction <maximumf>, %94, %cst_27 [2] : vector<4x16x16xf32> to vector<4x16xf32>
    %96 = vector.shape_cast %95 : vector<4x16xf32> to vector<4x16x1xf32>
    %97 = vector.broadcast %96 : vector<4x16x1xf32> to vector<4x16x16xf32>
    %98 = arith.subf %94, %97 : vector<4x16x16xf32>
    %99 = math.exp %98 : vector<4x16x16xf32>
    %cst_28 = arith.constant dense<0.000000e+00> : vector<4x16xf32>
    %100 = vector.multi_reduction <add>, %99, %cst_28 [2] : vector<4x16x16xf32> to vector<4x16xf32>
    %101 = vector.shape_cast %100 : vector<4x16xf32> to vector<4x16x1xf32>
    %102 = tpu.reciprocal %101 {approx = true} : vector<4x16x1xf32> -> vector<4x16x1xf32>
    %103 = vector.broadcast %102 : vector<4x16x1xf32> to vector<4x16x16xf32>
    %104 = arith.mulf %99, %103 : vector<4x16x16xf32>
    %105 = arith.truncf %104 : vector<4x16x16xf32> to vector<4x16x16xbf16>
    "tpu.trace_start"() <{level = 10 : i32, message = "bqk,bkd->bqd"}> : () -> ()
    %cst_29 = arith.constant dense<0.000000e+00> : vector<4x16x8xf32>
    %106 = tpu.matmul %105, %86, %cst_29 {dimension_numbers = #tpu.dot_dimension_numbers<[2], [1], [1], [2], [0, 0, 0, 1, 1, 2], [0], [0]>} : vector<4x16x16xbf16>, vector<4x16x8xbf16>, vector<4x16x8xf32> -> vector<4x16x8xf32>
    "tpu.trace_stop"() : () -> ()
    %107 = vector.shape_cast %106 : vector<4x16x8xf32> to vector<4x1x16x8xf32>
    %108 = vector.extract_strided_slice %107 {offsets = [0, 0, 0, 0], sizes = [1, 1, 16, 8], strides = [1, 1, 1, 1]} : vector<4x1x16x8xf32> to vector<1x1x16x8xf32>
    %109 = vector.shape_cast %108 : vector<1x1x16x8xf32> to vector<1x16x8xf32>
    %110 = vector.shape_cast %109 : vector<1x16x8xf32> to vector<16x8xf32>
    %111 = vector.extract_strided_slice %107 {offsets = [1, 0, 0, 0], sizes = [1, 1, 16, 8], strides = [1, 1, 1, 1]} : vector<4x1x16x8xf32> to vector<1x1x16x8xf32>
    %112 = vector.shape_cast %111 : vector<1x1x16x8xf32> to vector<1x16x8xf32>
    %113 = vector.shape_cast %112 : vector<1x16x8xf32> to vector<16x8xf32>
    %114 = vector.extract_strided_slice %107 {offsets = [2, 0, 0, 0], sizes = [1, 1, 16, 8], strides = [1, 1, 1, 1]} : vector<4x1x16x8xf32> to vector<1x1x16x8xf32>
    %115 = vector.shape_cast %114 : vector<1x1x16x8xf32> to vector<1x16x8xf32>
    %116 = vector.shape_cast %115 : vector<1x16x8xf32> to vector<16x8xf32>
    %117 = vector.extract_strided_slice %107 {offsets = [3, 0, 0, 0], sizes = [1, 1, 16, 8], strides = [1, 1, 1, 1]} : vector<4x1x16x8xf32> to vector<1x1x16x8xf32>
    %118 = vector.shape_cast %117 : vector<1x1x16x8xf32> to vector<1x16x8xf32>
    %119 = vector.shape_cast %118 : vector<1x16x8xf32> to vector<16x8xf32>
    %120 = tpu.concatenate %110, %113, %116, %119 in 1 : vector<16x8xf32>, vector<16x8xf32>, vector<16x8xf32>, vector<16x8xf32> -> vector<16x32xf32>
    %121 = arith.truncf %120 : vector<16x32xf32> to vector<16x32xbf16>
    %c0_30 = arith.constant 0 : index
    %c0_31 = arith.constant 0 : index
    %122 = vector.load %arg10[%c0_30, %c0_31] : memref<32x32xbf16, #tpu.memory_space<vmem>>, vector<32x32xbf16>
    %cst_32 = arith.constant dense<0.000000e+00> : vector<16x32xf32>
    %123 = tpu.matmul %121, %122, %cst_32 {dimension_numbers = #tpu.dot_dimension_numbers<[1], [0], [0], [1], [0, 0, 1, 1], [], []>} : vector<16x32xbf16>, vector<32x32xbf16>, vector<16x32xf32> -> vector<16x32xf32>
    %c0_33 = arith.constant 0 : index
    %c0_34 = arith.constant 0 : index
    %124 = vector.load %arg11[%c0_33, %c0_34] : memref<1x32xf32, #tpu.memory_space<vmem>>, vector<1x32xf32>
    %125 = vector.broadcast %124 : vector<1x32xf32> to vector<16x32xf32>
    %126 = arith.addf %123, %125 : vector<16x32xf32>
    %127 = arith.addf %1, %126 : vector<16x32xf32>
    %c0_35 = arith.constant 0 : index
    %c0_36 = arith.constant 0 : index
    %128 = vector.load %arg12[%c0_35, %c0_36] : memref<1x32xf32, #tpu.memory_space<vmem>>, vector<1x32xf32>
    %c0_37 = arith.constant 0 : index
    %c0_38 = arith.constant 0 : index
    %129 = vector.load %arg13[%c0_37, %c0_38] : memref<1x32xf32, #tpu.memory_space<vmem>>, vector<1x32xf32>
    %cst_39 = arith.constant dense<0.000000e+00> : vector<16xf32>
    %130 = vector.multi_reduction <add>, %127, %cst_39 [1] : vector<16x32xf32> to vector<16xf32>
    %131 = vector.shape_cast %130 : vector<16xf32> to vector<16x1xf32>
    %cst_40 = arith.constant 3.200000e+01 : f32
    %132 = vector.broadcast %cst_40 : f32 to vector<16x1xf32>
    %133 = arith.divf %131, %132 : vector<16x1xf32>
    %134 = vector.broadcast %133 : vector<16x1xf32> to vector<16x32xf32>
    %135 = arith.subf %127, %134 : vector<16x32xf32>
    %136 = arith.mulf %135, %135 : vector<16x32xf32>
    %cst_41 = arith.constant dense<0.000000e+00> : vector<16xf32>
    %137 = vector.multi_reduction <add>, %136, %cst_41 [1] : vector<16x32xf32> to vector<16xf32>
    %138 = vector.shape_cast %137 : vector<16xf32> to vector<16x1xf32>
    %cst_42 = arith.constant 3.200000e+01 : f32
    %139 = vector.broadcast %cst_42 : f32 to vector<16x1xf32>
    %140 = arith.divf %138, %139 : vector<16x1xf32>
    %141 = vector.broadcast %133 : vector<16x1xf32> to vector<16x32xf32>
    %142 = arith.subf %127, %141 : vector<16x32xf32>
    %cst_43 = arith.constant 9.99999974E-6 : f32
    %143 = vector.broadcast %cst_43 : f32 to vector<16x1xf32>
    %144 = arith.addf %140, %143 : vector<16x1xf32>
    %145 = math.rsqrt %144 : vector<16x1xf32>
    %146 = vector.broadcast %145 : vector<16x1xf32> to vector<16x32xf32>
    %147 = arith.mulf %142, %146 : vector<16x32xf32>
    %148 = vector.broadcast %128 : vector<1x32xf32> to vector<16x32xf32>
    %149 = arith.mulf %147, %148 : vector<16x32xf32>
    %150 = vector.broadcast %129 : vector<1x32xf32> to vector<16x32xf32>
    %151 = arith.addf %149, %150 : vector<16x32xf32>
    %152 = arith.truncf %151 : vector<16x32xf32> to vector<16x32xbf16>
    %c0_44 = arith.constant 0 : index
    %c0_45 = arith.constant 0 : index
    %153 = vector.load %arg14[%c0_44, %c0_45] : memref<32x128xbf16, #tpu.memory_space<vmem>>, vector<32x128xbf16>
    %cst_46 = arith.constant dense<0.000000e+00> : vector<16x128xf32>
    %154 = tpu.matmul %152, %153, %cst_46 {dimension_numbers = #tpu.dot_dimension_numbers<[1], [0], [0], [1], [0, 0, 1, 1], [], []>} : vector<16x32xbf16>, vector<32x128xbf16>, vector<16x128xf32> -> vector<16x128xf32>
    %c0_47 = arith.constant 0 : index
    %c0_48 = arith.constant 0 : index
    %155 = vector.load %arg15[%c0_47, %c0_48] : memref<1x128xf32, #tpu.memory_space<vmem>>, vector<1x128xf32>
    %156 = vector.broadcast %155 : vector<1x128xf32> to vector<16x128xf32>
    %157 = arith.addf %154, %156 : vector<16x128xf32>
    %cst_49 = arith.constant 5.000000e-01 : f32
    %158 = vector.broadcast %cst_49 : f32 to vector<16x128xf32>
    %159 = arith.mulf %158, %157 : vector<16x128xf32>
    %cst_50 = arith.constant 0.707106769 : f32
    %160 = vector.broadcast %cst_50 : f32 to vector<16x128xf32>
    %161 = arith.mulf %157, %160 : vector<16x128xf32>
    %162 = math.absf %161 : vector<16x128xf32>
    %cst_51 = arith.constant 0.327591091 : f32
    %163 = vector.broadcast %cst_51 : f32 to vector<16x128xf32>
    %164 = arith.mulf %163, %162 : vector<16x128xf32>
    %cst_52 = arith.constant 1.000000e+00 : f32
    %165 = vector.broadcast %cst_52 : f32 to vector<16x128xf32>
    %166 = arith.addf %165, %164 : vector<16x128xf32>
    %cst_53 = arith.constant 1.000000e+00 : f32
    %167 = vector.broadcast %cst_53 : f32 to vector<16x128xf32>
    %168 = arith.divf %167, %166 : vector<16x128xf32>
    %cst_54 = arith.constant 1.06140542 : f32
    %169 = vector.broadcast %cst_54 : f32 to vector<16x128xf32>
    %170 = arith.mulf %169, %168 : vector<16x128xf32>
    %cst_55 = arith.constant -1.45315206 : f32
    %171 = vector.broadcast %cst_55 : f32 to vector<16x128xf32>
    %172 = arith.addf %170, %171 : vector<16x128xf32>
    %173 = arith.mulf %172, %168 : vector<16x128xf32>
    %cst_56 = arith.constant 1.42141378 : f32
    %174 = vector.broadcast %cst_56 : f32 to vector<16x128xf32>
    %175 = arith.addf %173, %174 : vector<16x128xf32>
    %176 = arith.mulf %175, %168 : vector<16x128xf32>
    %cst_57 = arith.constant -0.284496725 : f32
    %177 = vector.broadcast %cst_57 : f32 to vector<16x128xf32>
    %178 = arith.addf %176, %177 : vector<16x128xf32>
    %179 = arith.mulf %178, %168 : vector<16x128xf32>
    %cst_58 = arith.constant 0.254829586 : f32
    %180 = vector.broadcast %cst_58 : f32 to vector<16x128xf32>
    %181 = arith.addf %179, %180 : vector<16x128xf32>
    %182 = arith.mulf %181, %168 : vector<16x128xf32>
    %cst_59 = arith.constant 0.000000e+00 : f32
    %183 = vector.broadcast %cst_59 : f32 to vector<16x128xf32>
    %184 = arith.subf %183, %162 : vector<16x128xf32>
    %185 = arith.mulf %184, %162 : vector<16x128xf32>
    %186 = math.exp %185 : vector<16x128xf32>
    %187 = arith.mulf %182, %186 : vector<16x128xf32>
    %cst_60 = arith.constant 1.000000e+00 : f32
    %188 = vector.broadcast %cst_60 : f32 to vector<16x128xf32>
    %189 = arith.subf %188, %187 : vector<16x128xf32>
    %cst_61 = arith.constant 0.000000e+00 : f32
    %190 = vector.broadcast %cst_61 : f32 to vector<16x128xf32>
    %191 = arith.cmpf olt, %161, %190 : vector<16x128xf32>
    %cst_62 = arith.constant 0.000000e+00 : f32
    %192 = vector.broadcast %cst_62 : f32 to vector<16x128xf32>
    %193 = arith.subf %192, %189 : vector<16x128xf32>
    %194 = arith.select %191, %193, %189 : vector<16x128xi1>, vector<16x128xf32>
    %cst_63 = arith.constant 1.000000e+00 : f32
    %195 = vector.broadcast %cst_63 : f32 to vector<16x128xf32>
    %196 = arith.addf %195, %194 : vector<16x128xf32>
    %197 = arith.mulf %159, %196 : vector<16x128xf32>
    %198 = arith.truncf %197 : vector<16x128xf32> to vector<16x128xbf16>
    %c0_64 = arith.constant 0 : index
    %c0_65 = arith.constant 0 : index
    %199 = vector.load %arg16[%c0_64, %c0_65] : memref<128x32xbf16, #tpu.memory_space<vmem>>, vector<128x32xbf16>
    %cst_66 = arith.constant dense<0.000000e+00> : vector<16x32xf32>
    %200 = tpu.matmul %198, %199, %cst_66 {dimension_numbers = #tpu.dot_dimension_numbers<[1], [0], [0], [1], [0, 0, 1, 1], [], []>} : vector<16x128xbf16>, vector<128x32xbf16>, vector<16x32xf32> -> vector<16x32xf32>
    %c0_67 = arith.constant 0 : index
    %c0_68 = arith.constant 0 : index
    %201 = vector.load %arg17[%c0_67, %c0_68] : memref<1x32xf32, #tpu.memory_space<vmem>>, vector<1x32xf32>
    %202 = vector.broadcast %201 : vector<1x32xf32> to vector<16x32xf32>
    %203 = arith.addf %200, %202 : vector<16x32xf32>
    %204 = arith.addf %127, %203 : vector<16x32xf32>
    %205 = vector.shape_cast %204 : vector<16x32xf32> to vector<1x16x32xf32>
    %c0_69 = arith.constant 0 : index
    %c0_70 = arith.constant 0 : index
    %c0_71 = arith.constant 0 : index
    %206 = vector.load %arg18[%c0_69, %c0_70, %c0_71] : memref<1x16x32xf32, #tpu.memory_space<vmem>>, vector<1x16x32xf32>
    tpu.vector_store %arg18[%c0_69, %c0_70, %c0_71], %205 {strides = array<i32>} : memref<1x16x32xf32, #tpu.memory_space<vmem>>, vector<1x16x32xf32>,
    return
  }
  func.func @transform_0(%arg0: i32) -> (i32, i32, i32) {
    %c0_i32 = arith.constant 0 : i32
    %c0_i32_0 = arith.constant 0 : i32
    %c0_i32_1 = arith.constant 0 : i32
    return %arg0, %c0_i32, %c0_i32_0 : i32, i32, i32
  }
  func.func @transform_1(%arg0: i32) -> (i32, i32) {
    %c0_i32 = arith.constant 0 : i32
    %c0_i32_0 = arith.constant 0 : i32
    %c0_i32_1 = arith.constant 0 : i32
    return %c0_i32, %c0_i32_0 : i32, i32
  }
  func.func @transform_2(%arg0: i32) -> (i32, i32) {
    %c0_i32 = arith.constant 0 : i32
    %c0_i32_0 = arith.constant 0 : i32
    %c0_i32_1 = arith.constant 0 : i32
    return %c0_i32, %c0_i32_0 : i32, i32
  }
  func.func @transform_3(%arg0: i32) -> (i32, i32) {
    %c0_i32 = arith.constant 0 : i32
    %c0_i32_0 = arith.constant 0 : i32
    %c0_i32_1 = arith.constant 0 : i32
    return %c0_i32, %c0_i32_0 : i32, i32
  }
  func.func @transform_4(%arg0: i32) -> (i32, i32) {
    %c0_i32 = arith.constant 0 : i32
    %c0_i32_0 = arith.constant 0 : i32
    %c0_i32_1 = arith.constant 0 : i32
    return %c0_i32, %c0_i32_0 : i32, i32
  }
  func.func @transform_5(%arg0: i32) -> (i32, i32) {
    %c0_i32 = arith.constant 0 : i32
    %c0_i32_0 = arith.constant 0 : i32
    %c0_i32_1 = arith.constant 0 : i32
    return %c0_i32, %c0_i32_0 : i32, i32
  }
  func.func @transform_6(%arg0: i32) -> (i32, i32) {
    %c0_i32 = arith.constant 0 : i32
    %c0_i32_0 = arith.constant 0 : i32
    %c0_i32_1 = arith.constant 0 : i32
    return %c0_i32, %c0_i32_0 : i32, i32
  }
  func.func @transform_7(%arg0: i32) -> (i32, i32) {
    %c0_i32 = arith.constant 0 : i32
    %c0_i32_0 = arith.constant 0 : i32
    %c0_i32_1 = arith.constant 0 : i32
    return %c0_i32, %c0_i32_0 : i32, i32
  }
  func.func @transform_8(%arg0: i32) -> (i32, i32) {
    %c0_i32 = arith.constant 0 : i32
    %c0_i32_0 = arith.constant 0 : i32
    %c0_i32_1 = arith.constant 0 : i32
    return %c0_i32, %c0_i32_0 : i32, i32
  }
  func.func @transform_9(%arg0: i32) -> (i32, i32) {
    %c0_i32 = arith.constant 0 : i32
    %c0_i32_0 = arith.constant 0 : i32
    %c0_i32_1 = arith.constant 0 : i32
    return %c0_i32, %c0_i32_0 : i32, i32
  }
  func.func @transform_10(%arg0: i32) -> (i32, i32) {
    %c0_i32 = arith.constant 0 : i32
    %c0_i32_0 = arith.constant 0 : i32
    %c0_i32_1 = arith.constant 0 : i32
    return %c0_i32, %c0_i32_0 : i32, i32
  }
  func.func @transform_11(%arg0: i32) -> (i32, i32) {
    %c0_i32 = arith.constant 0 : i32
    %c0_i32_0 = arith.constant 0 : i32
    %c0_i32_1 = arith.constant 0 : i32
    return %c0_i32, %c0_i32_0 : i32, i32
  }
  func.func @transform_12(%arg0: i32) -> (i32, i32) {
    %c0_i32 = arith.constant 0 : i32
    %c0_i32_0 = arith.constant 0 : i32
    %c0_i32_1 = arith.constant 0 : i32
    return %c0_i32, %c0_i32_0 : i32, i32
  }
  func.func @transform_13(%arg0: i32) -> (i32, i32) {
    %c0_i32 = arith.constant 0 : i32
    %c0_i32_0 = arith.constant 0 : i32
    %c0_i32_1 = arith.constant 0 : i32
    return %c0_i32, %c0_i32_0 : i32, i32
  }
  func.func @transform_14(%arg0: i32) -> (i32, i32) {
    %c0_i32 = arith.constant 0 : i32
    %c0_i32_0 = arith.constant 0 : i32
    %c0_i32_1 = arith.constant 0 : i32
    return %c0_i32, %c0_i32_0 : i32, i32
  }
  func.func @transform_15(%arg0: i32) -> (i32, i32) {
    %c0_i32 = arith.constant 0 : i32
    %c0_i32_0 = arith.constant 0 : i32
    %c0_i32_1 = arith.constant 0 : i32
    return %c0_i32, %c0_i32_0 : i32, i32
  }
  func.func @transform_16(%arg0: i32) -> (i32, i32) {
    %c0_i32 = arith.constant 0 : i32
    %c0_i32_0 = arith.constant 0 : i32
    %c0_i32_1 = arith.constant 0 : i32
    return %c0_i32, %c0_i32_0 : i32, i32
  }
  func.func @transform_17(%arg0: i32) -> (i32, i32, i32) {
    %c0_i32 = arith.constant 0 : i32
    %c0_i32_0 = arith.constant 0 : i32
    %c0_i32_1 = arith.constant 0 : i32
    return %arg0, %c0_i32, %c0_i32_0 : i32, i32, i32
  }
}

</mosaic_0001>

<bundles_post_ra>
// kernel: encoder_layer_forward.3
= control target key start
LH: loop header
LB: loop body
LE: loop exit
PB: predicated region body
PF: predicated region fallthrough
CT: control target
= control target key end

     0   :  { %s2226_s24 = smov 0   ;;  %s2485_s0 = inlined_call_operand.vmem [shape: f32[2,16,32], index: 0, kind: input, shape index: {}]   ;;  %s2486_s1 = inlined_call_operand.vmem [shape: f32[1,32], index: 1, kind: input, shape index: {}]   ;;  %s2487_s2 = inlined_call_operand.vmem [shape: f32[1,32], index: 2, kind: input, shape index: {}]   ;;  %s2488_s3 = inlined_call_operand.vmem [shape: bf16[32,32], index: 3, kind: input, shape index: {}]   ;;  %s2489_s4 = inlined_call_operand.vmem [shape: f32[1,32], index: 4, kind: input, shape index: {}]   ;;  %s2490_s5 = inlined_call_operand.vmem [shape: bf16[32,32], index: 5, kind: input, shape index: {}]   ;;  %s2491_s6 = inlined_call_operand.vmem [shape: f32[1,32], index: 6, kind: input, shape index: {}]   ;;  %s2492_s7 = inlined_call_operand.vmem [shape: bf16[32,32], index: 7, kind: input, shape index: {}]   ;;  %s2493_s8 = inlined_call_operand.vmem [shape: f32[1,32], index: 8, kind: input, shape index: {}]   ;;  %s2494_s9 = inlined_call_operand.vmem [shape: bf16[32,32], index: 9, kind: input, shape index: {}]   ;;  %s2495_s10 = inlined_call_operand.vmem [shape: f32[1,32], index: 10, kind: input, shape index: {}]   ;;  %s2496_s11 = inlined_call_operand.vmem [shape: f32[1,32], index: 11, kind: input, shape index: {}]   ;;  %s2497_s12 = inlined_call_operand.vmem [shape: f32[1,32], index: 12, kind: input, shape index: {}]   ;;  %s2498_s13 = inlined_call_operand.vmem [shape: bf16[32,128], index: 13, kind: input, shape index: {}]   ;;  %s2499_s14 = inlined_call_operand.vmem [shape: f32[1,128], index: 14, kind: input, shape index: {}]   ;;  %s2500_s15 = inlined_call_operand.vmem [shape: bf16[128,32], index: 15, kind: input, shape index: {}]   ;;  %s2501_s16 = inlined_call_operand.vmem [shape: f32[1,32], index: 16, kind: input, shape index: {}]   ;;  %s2502_s17 = inlined_call_operand.vmem [shape: f32[2,16,32], index: 17, kind: output, shape index: {}]  }
   0x1   :  { %2503 = sst [smem:[#allocation2_spill]] %s2485_s0 }
   0x2   :  { %2504 = sst [smem:[#allocation3_spill]] %s2486_s1 }
   0x3 LB: > { %s1776_s25 = sadd.s32 4294967295, %s2126_s24   ;;  %p1780_p0 = scmp.ge.s32.totalorder %s2126_s24, 1  ;;  %s2126_s24 = sphi %s2226_s24, %s27_s24  }
   0x4   : > { %p487_p1 = scmp.lt.s32.totalorder %s2126_s24, 3 }
   0x6   : > { %p488_p2 = pnand %p1780_p0, %p487_p1 }
   0x7   : > { %p539_p3 = scmp.lt.s32.totalorder (!%p488_p2), %s1776_s25, 1  ;;  %vm554_vm0 = vcmask (!%p488_p2), 261120   ;;  %s2505_s29 = sld [smem:[#allocation2_spill]] (!%p488_p2)  ;;  %v2054_v14 = vld [vmem:[%s2488_s3] sm:$0xff] (!%p488_p2)   ;;  %v2128_v15 = vmov (!%p488_p2), 0.0   ;;  %v2055_v16 = vld [vmem:[%s2488_s3 + $0x8] sm:$0xff] (!%p488_p2)  }
   0x8   : > { %491 = sbr.rel (%p488_p2) target bundleno = 2637 (0xa4d), region = 88  ;;  %1870 = vmatprep.subr.bf16.mxu0 (!%p488_p2), %v2128_v15  ;;  %1894 = vmatprep.subr.bf16.mxu1 (!%p488_p2), %v2128_v15  ;;  %vm2129_vm1 = vmmov (!%p488_p2), 0   ;;  %s2506_s22 = sld [smem:[#allocation3_spill]] (!%p488_p2)  ;;  %v1786_v29 = vld [vmem:[%s2487_s2] ss:$0 sm:$0xff] (!%p488_p2)  ;;  %v2057_v35 = vld [vmem:[%s2490_s5 + $0x8] sm:$0xff] (!%p488_p2)  }
   0x9   : > { %1871 = vmatpush3.bf16.msra.mxu0 (!%p488_p2), %v2054_v14  ;;  %1874 = vmatprep.mubr.msk.bf16.mxu0 (!%p488_p2), %vm2129_vm1, %v2128_v15  ;;  %v2056_v33 = vld [vmem:[%s2490_s5] sm:$0xff] (!%p488_p2)   ;;  %v2059_v37 = vld [vmem:[%s2492_s7 + $0x8] sm:$0xff] (!%p488_p2)   ;;  %s2130_s23 = smov (!%p488_p2), 120   ;;  %vm866_vm2 = vcmask (!%p488_p2), 64512   ;;  %s2132_s18 = smov (!%p488_p2), 104   ;;  %vm1068_vm4 = vcmask (!%p488_p2), 130048  }
   0xa   : > { %1872 = vmatprep.subr.bf16.mxu0 (!%p488_p2), %v2128_v15  ;;  %1896 = vmatprep.mubr.msk.bf16.mxu1 (!%p488_p2), %vm2129_vm1, %v2128_v15  ;;  %v2058_v36 = vld [vmem:[%s2492_s7] sm:$0xff] (!%p488_p2)   ;;  %s2133_s20 = smov (!%p488_p2), 8   ;;  %s2134_s21 = smov (!%p488_p2), 16   ;;  %vm1365_vm5 = vcmask (!%p488_p2), 195584  }
   0xb   : > { %v1787_v38 = vld [vmem:[%s2489_s4] ss:$0 sm:$0xff] (!%p488_p2)  ;;  %s2135_s27 = smov (!%p488_p2), 24  }
   0xc   : > { %v1791_v47 = vld [vmem:[%s2491_s6] ss:$0 sm:$0xff] (!%p488_p2) }
   0xd   : > { %1873 = vmatpush3.bf16.msra.mxu0 (!%p488_p2), %v2055_v16  ;;  %v1795_v57 = vld [vmem:[%s2493_s8] ss:$0 sm:$0xff] (!%p488_p2) }
   0xe   : > { %1878 = vmatprep.subr.bf16.mxu0 (!%p488_p2), %v2128_v15  ;;  %v1785_v25 = vld [vmem:[%s2506_s22] ss:$0 sm:$0xff] (!%p488_p2) }
   0xf   : > { %s2508_s25 = smov (!%p539_p3, %s1776_s25), 1 }
  0x10   : > { %s1828_s26 = sshll.u32 %s2508_s25, 4 }
  0x11   : > { %s543_s0 = scalar_lea.vmem %s2505_s29, %s1828_s26  ;;  %s2131_s29 = smov 112  }
  0x12   : > { %v2242_v0 = vld [vmem:[%s543_s0] sm:$0xff]  ;;  %v2244_v1 = vld [vmem:[%s543_s0 + $0x8] sm:$0xff] }
  0x13   : > { %v555_v2 = vsel %vm554_vm0, %v2242_v0, 0.0  ;;  %v558_v3 = vsel %vm554_vm0, %v2244_v1, 0.0 }
  0x14   : > { %556 = vadd.xlane.f32.xlu0 %v555_v2 }
  0x18   : > { %559 = vadd.xlane.f32.xlu0 %v558_v3 }
  0xa1   : > { %v557_v4 = vpop.xlane.xlu0 %556 }
  0xa2   : > { %v562_v5 = vmul.f32 0.03125, %v557_v4 }
  0xa4   : > { %v564_v6 = vsub.f32 %v2242_v0, %v562_v5 }
  0xa5   : > { %v560_v7 = vpop.xlane.xlu0 %559 }
  0xa6   : > { %v563_v8 = vmul.f32 0.03125, %v560_v7  ;;  %v566_v9 = vmul.f32 %v564_v6, %v564_v6 }
  0xa8   : > { %v565_v10 = vsub.f32 %v2244_v1, %v563_v8  ;;  %v568_v11 = vsel %vm554_vm0, %v566_v9, 0.0 }
  0xa9   : > { %569 = vadd.xlane.f32.xlu1 %v568_v11 }
  0xaa   : > { %v567_v12 = vmul.f32 %v565_v10, %v565_v10 }
  0xac   : > { %v571_v13 = vsel %vm554_vm0, %v567_v12, 0.0 }
  0xad   : > { %572 = vadd.xlane.f32.xlu1 %v571_v13 }
 0x136   : > { %v570_v17 = vpop.xlane.xlu1 %569 }
 0x137   : > { %v574_v18 = vmul.f32 0.03125, %v570_v17 }
 0x139   : > { %v576_v19 = vadd.f32 1e-05, %v574_v18 }
 0x13a   : > { %v573_v20 = vpop.xlane.xlu1 %572 }
 0x13b   : > { %2072 = vrsqrt.f32 %v576_v19  ;;  %v575_v21 = vmul.f32 0.03125, %v573_v20 }
 0x13d   : > { %v577_v22 = vadd.f32 1e-05, %v575_v21 }
 0x13f   : > { %2074 = vrsqrt.f32 %v577_v22 }
 0x145   : > { %v2073_v23 = vpop.eup %2072 }
 0x146   : > { %v580_v24 = vmul.f32 %v2073_v23, %v564_v6 }
 0x148   : > { %v588_v28 = vmul.f32 %v1785_v25, %v580_v24 }
 0x149   : > { %v2075_v26 = vpop.eup %2074 }
 0x14a   : > { %v581_v27 = vmul.f32 %v2075_v26, %v565_v10  ;;  %v596_v31 = vadd.f32 %v1786_v29, %v588_v28 }
 0x14c   : > { %v589_v30 = vmul.f32 %v1785_v25, %v581_v27 }
 0x14e   : > { %v597_v32 = vadd.f32 %v1786_v29, %v589_v30 }
 0x150   : > { %v598_v34 = vpack.c.bf16 %v597_v32, %v596_v31  ;;  %v1055_v32 = vlaneseq }
 0x152   : > { %1875 = vmatmul.mubr.msk.bf16.vlgmr.msra.gmra.mrb[0].mxu0 %vm554_vm0, %v598_v34 }
 0x153   : > { %1879 = vmatpush3.bf16.msra.mxu0 %v2056_v33  ;;  %1882 = vmatprep.mubr.msk.bf16.mxu0 %vm2129_vm1, %v2128_v15  ;;  %v1056_v33 = vand.u32 127, %v1055_v32 }
 0x154   : > { %1880 = vmatprep.subr.bf16.mxu0 %v2128_v15 }
 0x155   : > { %vm1057_vm3 = vcmp.lt.s32.totalorder %v1056_v33, 4 }
 0x157   : > { %1881 = vmatpush3.bf16.msra.mxu0 %v2057_v35 }
 0x158   : > { %1886 = vmatprep.subr.bf16.mxu0 %v2128_v15 }
 0x15a   : > { %1883 = vmatmul.mubr.msk.bf16.vlgmr.msra.gmra.mrb[4].mxu0 %vm554_vm0, %v598_v34 }
 0x15b   : > { %1887 = vmatpush3.bf16.msra.mxu0 %v2058_v36  ;;  %1890 = vmatprep.mubr.msk.bf16.mxu0 %vm2129_vm1, %v2128_v15 }
 0x15c   : > { %1888 = vmatprep.subr.bf16.mxu0 %v2128_v15 }
 0x15f   : > { %1889 = vmatpush3.bf16.msra.mxu0 %v2059_v37 }
 0x160   : > { %1900 = vmatprep.subr.bf16.mxu0 %v2128_v15 }
 0x162   : > { %1891 = vmatmul.mubr.msk.bf16.vlgmr.msra.gmra.mrb[8].mxu0 %vm554_vm0, %v598_v34 }
 0x163   : > { %1902 = vmatprep.mubr.msk.bf16.mxu0 %vm2129_vm1, %v2128_v15 }
 0x225   : > { %v659_v39 = vpop.f32.mrb[0].mxu0 }
 0x226   : > { %v1876_v40 = vpop.f32.mrb[1].mxu0  ;;  %v660_v42 = vadd.f32 %v1787_v38, %v659_v39 }
 0x227   : > { %v662_v41 = vpop.f32.mrb[2].mxu0 }
 0x228   : > { %v663_v43 = vadd.f32 %v1787_v38, %v662_v41  ;;  %v1877_v44 = vpop.f32.mrb[3].mxu0 }
 0x22a   : > { %v1999_v45 = vpack.i.bf16 %v663_v43, %v660_v42  ;;  %v814_v46 = vpack.c.bf16 %v663_v43, %v660_v42 }
 0x22c   : > { %2000 = vrot.lane.b32.xlu1 %v1999_v45, %s2130_s23 }
 0x22d   : > { %v723_v48 = vpop.f32.mrb[4].mxu0 }
 0x22e   : > { %v1884_v49 = vpop.f32.mrb[5].mxu0  ;;  %v724_v51 = vadd.f32 %v1791_v47, %v723_v48 }
 0x22f   : > { %v726_v50 = vpop.f32.mrb[6].mxu0 }
 0x230   : > { %v727_v52 = vadd.f32 %v1791_v47, %v726_v50  ;;  %v1885_v53 = vpop.f32.mrb[7].mxu0 }
 0x232   : > { %v2004_v54 = vpack.i.bf16 %v727_v52, %v724_v51  ;;  %v838_v55 = vpack.c.bf16 %v727_v52, %v724_v51 }
 0x234   : > { %2005 = vrot.lane.b32.xlu1 %v2004_v54, %s2131_s29  ;;  %1995 = vrot.lane.b32.xlu0 %v2004_v54, %s2130_s23  ;;  %v871_v56 = vsel %vm866_vm2, %v838_v55, 0 }
 0x235   : > { %v787_v58 = vpop.f32.mrb[8].mxu0  ;;  %1895 = vmatpush3.bf16.xpose.msra.mxu1 %v871_v56 }
 0x236   : > { %v1892_v59 = vpop.f32.mrb[9].mxu0  ;;  %1906 = vmatprep.subr.bf16.mxu1 %v2128_v15  ;;  %v788_v61 = vadd.f32 %v1795_v57, %v787_v58 }
 0x237   : > { %v790_v60 = vpop.f32.mrb[10].mxu0 }
 0x238   : > { %v791_v62 = vadd.f32 %v1795_v57, %v790_v60  ;;  %2010 = vrot.lane.b32.xlu1 %v2004_v54, %s2132_s18  ;;  %2015 = vrot.lane.b32.xlu0 %v1999_v45, %s2131_s29  ;;  %v1893_v63 = vpop.f32.mrb[11].mxu0 }
 0x23a   : > { %v862_v2 = vpack.c.bf16 %v791_v62, %v788_v61  ;;  %v2315_v3 = vpack.i.bf16 %v791_v62, %v788_v61 }
 0x23c   : > { %2020 = vrot.lane.b32.xlu1 %v1999_v45, %s2132_s18  ;;  %1897 = vmatmul.mubr.msk.bf16.vlgmr.msra.gmra.mrb[0].mxu1 %vm866_vm2, %v814_v46 }
 0x23d   : > { %1908 = vmatprep.mubr.msk.bf16.mxu1 %vm2129_vm1, %v2128_v15 }
 0x29e   : > { %v2001_v4 = vpop.permute.xlu1 %2000 }
 0x29f   : > { %v2003_v20 = vunpack.i.h.bf16 %v2001_v4  ;;  %v2002_v21 = vunpack.i.l.bf16 %v2001_v4 }
 0x2a1   : > { %v815_v25 = vpack.c.bf16 %v2003_v20, %v2002_v21 }
 0x2a6   : > { %v2006_v5 = vpop.permute.xlu1 %2005  ;;  %v1996_v6 = vpop.permute.xlu0 %1995 }
 0x2a7   : > { %v2008_v7 = vunpack.i.h.bf16 %v2006_v5  ;;  %v2007_v8 = vunpack.i.l.bf16 %v2006_v5  ;;  %v1998_v9 = vunpack.i.h.bf16 %v1996_v6  ;;  %v1997_v10 = vunpack.i.l.bf16 %v1996_v6 }
 0x2a9   : > { %v840_v11 = vpack.c.bf16 %v2008_v7, %v2007_v8  ;;  %v839_v12 = vpack.c.bf16 %v1998_v9, %v1997_v10 }
 0x2aa   : > { %v2011_v13 = vpop.permute.xlu1 %2010  ;;  %v2016_v14 = vpop.permute.xlu0 %2015 }
 0x2ab   : > { %v2013_v16 = vunpack.i.h.bf16 %v2011_v13  ;;  %v2012_v17 = vunpack.i.l.bf16 %v2011_v13  ;;  %v918_v18 = vsel %vm866_vm2, %v839_v12, 0  ;;  %v965_v19 = vsel %vm866_vm2, %v840_v11, 0 }
 0x2ac   : > { %1901 = vmatpush3.bf16.xpose.msra.mxu0 %v918_v18  ;;  %1907 = vmatpush3.bf16.xpose.msra.mxu1 %v965_v19  ;;  %v2018_v22 = vunpack.i.h.bf16 %v2016_v14  ;;  %v2017_v23 = vunpack.i.l.bf16 %v2016_v14 }
 0x2ad   : > { %1912 = vmatprep.subr.bf16.mxu0 %v2128_v15  ;;  %1918 = vmatprep.subr.bf16.mxu1 %v2128_v15  ;;  %v841_v24 = vpack.c.bf16 %v2013_v16, %v2012_v17 }
 0x2ae   : > { %v816_v26 = vpack.c.bf16 %v2018_v22, %v2017_v23  ;;  %v2021_v27 = vpop.permute.xlu1 %2020 }
 0x2af   : > { %v1012_v28 = vsel %vm866_vm2, %v841_v24, 0  ;;  %v2023_v29 = vunpack.i.h.bf16 %v2021_v27  ;;  %v2022_v30 = vunpack.i.l.bf16 %v2021_v27 }
 0x2b1   : > { %v817_v31 = vpack.c.bf16 %v2023_v29, %v2022_v30 }
 0x2b3   : > { %1903 = vmatmul.mubr.msk.bf16.vlgmr.msra.gmra.mrb[12].mxu0 %vm866_vm2, %v815_v25  ;;  %1909 = vmatmul.mubr.msk.bf16.vlgmr.msra.gmra.mrb[4].mxu1 %vm866_vm2, %v816_v26 }
 0x2b4   : > { %1913 = vmatpush3.bf16.xpose.msra.mxu0 %v1012_v28  ;;  %1919 = vmatpush3.bf16.msra.mxu1 %v862_v2 }
 0x2b5   : > { %1914 = vmatprep.mubr.msk.bf16.mxu0 %vm2129_vm1, %v2128_v15  ;;  %1920 = vmatprep.mubr.msk.bf16.mxu1 %vm2129_vm1, %v2128_v15 }
 0x2b6   : > { %1930 = vmatprep.subr.bf16.mxu1 %v2128_v15  ;;  %1924 = vmatprep.subr.bf16.mxu0 %v2128_v15 }
 0x2bb   : > { %1915 = vmatmul.mubr.msk.bf16.vlgmr.msra.gmra.mrb[16].mxu0 %vm866_vm2, %v817_v31 }
 0x2bc   : > { %1926 = vmatprep.mubr.msk.bf16.mxu0 %vm2129_vm1, %v2128_v15 }
 0x30f   : > { %v907_v34 = vpop.f32.mrb[0].mxu1 }
 0x310   : > { %v1060_v35 = vsel %vm1057_vm3, %v907_v34, -1e+30  ;;  %v1898_v36 = vpop.f32.mrb[1].mxu1 }
 0x311   : > { %v910_v37 = vpop.f32.mrb[2].mxu1  ;;  %v1069_v38 = vsel %vm1068_vm4, %v1060_v35, -inf }
 0x312   : > { %v1061_v39 = vsel %vm1057_vm3, %v910_v37, -1e+30  ;;  %1070 = vmax.xlane.f32.xlu0 %v1069_v38  ;;  %v1899_v40 = vpop.f32.mrb[3].mxu1 }
 0x313   : > { %v1072_v41 = vsel %vm1068_vm4, %v1061_v39, -inf }
 0x314   : > { %1073 = vmax.xlane.f32.xlu1 %v1072_v41 }
 0x386   : > { %v954_v42 = vpop.f32.mrb[12].mxu0  ;;  %v1001_v43 = vpop.f32.mrb[4].mxu1 }
 0x387   : > { %v1062_v44 = vsel %vm1057_vm3, %v954_v42, -1e+30  ;;  %v1904_v45 = vpop.f32.mrb[13].mxu0  ;;  %v1910_v46 = vpop.f32.mrb[5].mxu1  ;;  %v1064_v56 = vsel %vm1057_vm3, %v1001_v43, -1e+30 }
 0x388   : > { %v957_v47 = vpop.f32.mrb[14].mxu0  ;;  %v1004_v48 = vpop.f32.mrb[6].mxu1  ;;  %v1075_v49 = vsel %vm1068_vm4, %v1062_v44, -inf  ;;  %v1081_v60 = vsel %vm1068_vm4, %v1064_v56, -inf }
 0x389   : > { %v1063_v50 = vsel %vm1057_vm3, %v957_v47, -1e+30  ;;  %v1065_v51 = vsel %vm1057_vm3, %v1004_v48, -1e+30  ;;  %v1911_v52 = vpop.f32.mrb[7].mxu1  ;;  %1076 = vmax.xlane.f32.xlu0 %v1075_v49  ;;  %v1905_v53 = vpop.f32.mrb[15].mxu0 }
 0x38a   : > { %v1084_v54 = vsel %vm1068_vm4, %v1065_v51, -inf  ;;  %v1078_v55 = vsel %vm1068_vm4, %v1063_v50, -inf }
 0x38b   : > { %1085 = vmax.xlane.f32.xlu1 %v1084_v54 }
 0x38d   : > { %1079 = vmax.xlane.f32.xlu0 %v1078_v55 }
 0x38e   : > { %v1048_v57 = vpop.f32.mrb[16].mxu0 }
 0x38f   : > { %v1916_v58 = vpop.f32.mrb[17].mxu0  ;;  %v1066_v61 = vsel %vm1057_vm3, %v1048_v57, -1e+30 }
 0x390   : > { %v1051_v59 = vpop.f32.mrb[18].mxu0  ;;  %v1087_v4 = vsel %vm1068_vm4, %v1066_v61, -inf }
 0x391   : > { %v2351_v62 = vsel %vm1057_vm3, %v1051_v59, -1e+30  ;;  %1082 = vmax.xlane.f32.xlu0 %v1081_v60  ;;  %v1917_v63 = vpop.f32.mrb[19].mxu0 }
 0x392   : > { %v1090_v2 = vsel %vm1068_vm4, %v2351_v62, -inf }
 0x393   : > { %1091 = vmax.xlane.f32.xlu1 %v1090_v2 }
 0x395   : > { %1088 = vmax.xlane.f32.xlu0 %v1087_v4 }
 0x39f   : > { %v1071_v5 = vpop.xlane.xlu0 %1070 }
 0x3a0   : > { %v1093_v6 = vsub.f32 %v1060_v35, %v1071_v5 }
 0x3a1   : > { %v1074_v7 = vpop.xlane.xlu1 %1073 }
 0x3a2   : > { %v1101_v8 = vmul.f32 1.442695, %v1093_v6  ;;  %v1094_v9 = vsub.f32 %v1061_v39, %v1074_v7 }
 0x3a4   : > { %2076 = vpow2.f32 %v1101_v8  ;;  %v1103_v10 = vmul.f32 1.442695, %v1094_v9 }
 0x3a6   : > { %2078 = vpow2.f32 %v1103_v10 }
 0x3ae   : > { %v2077_v11 = vpop.eup %2076 }
 0x3af   : > { %v1117_v12 = vsel %vm1068_vm4, %v2077_v11, 0.0 }
 0x3b0   : > { %v2079_v13 = vpop.eup %2078  ;;  %1118 = vadd.xlane.f32.xlu0 %v1117_v12 }
 0x3b1   : > { %v1120_v14 = vsel %vm1068_vm4, %v2079_v13, 0.0 }
 0x3b2   : > { %1121 = vadd.xlane.f32.xlu1 %v1120_v14 }
 0x416   : > { %v1077_v16 = vpop.xlane.xlu0 %1076 }
 0x417   : > { %v1095_v17 = vsub.f32 %v1062_v44, %v1077_v16 }
 0x418   : > { %v1086_v18 = vpop.xlane.xlu1 %1085 }
 0x419   : > { %v1105_v19 = vmul.f32 1.442695, %v1095_v17  ;;  %v1098_v20 = vsub.f32 %v1065_v51, %v1086_v18 }
 0x41a   : > { %v1080_v21 = vpop.xlane.xlu0 %1079 }
 0x41b   : > { %2080 = vpow2.f32 %v1105_v19  ;;  %v1096_v22 = vsub.f32 %v1063_v50, %v1080_v21  ;;  %v1111_v23 = vmul.f32 1.442695, %v1098_v20 }
 0x41d   : > { %v1107_v24 = vmul.f32 1.442695, %v1096_v22 }
 0x41e   : > { %v1083_v25 = vpop.xlane.xlu0 %1082 }
 0x41f   : > { %2082 = vpow2.f32 %v1107_v24  ;;  %v1097_v26 = vsub.f32 %v1064_v56, %v1083_v25 }
 0x420   : > { %2084 = vpow2.f32 %v1111_v23  ;;  %v1092_v41 = vpop.xlane.xlu1 %1091 }
 0x421   : > { %v1109_v27 = vmul.f32 1.442695, %v1097_v26  ;;  %v1100_v49 = vsub.f32 %v2351_v62, %v1092_v41 }
 0x422   : > { %v1089_v28 = vpop.xlane.xlu0 %1088 }
 0x423   : > { %2086 = vpow2.f32 %v1109_v27  ;;  %v1099_v29 = vsub.f32 %v1066_v61, %v1089_v28  ;;  %v1115_v50 = vmul.f32 1.442695, %v1100_v49 }
 0x425   : > { %v2081_v30 = vpop.eup %2080  ;;  %v1113_v31 = vmul.f32 1.442695, %v1099_v29  ;;  %v2060_v29 = vld [vmem:[%s2494_s9] sm:$0xff]  }
 0x426   : > { %v1123_v32 = vsel %vm1068_vm4, %v2081_v30, 0.0 }
 0x427   : > { %2088 = vpow2.f32 %v1113_v31  ;;  %1124 = vadd.xlane.f32.xlu0 %v1123_v32 }
 0x429   : > { %v2083_v33 = vpop.eup %2082 }
 0x42a   : > { %v1126_v34 = vsel %vm1068_vm4, %v2083_v33, 0.0  ;;  %v2085_v35 = vpop.eup %2084 }
 0x42b   : > { %1127 = vadd.xlane.f32.xlu1 %v1126_v34  ;;  %v1132_v38 = vsel %vm1068_vm4, %v2085_v35, 0.0 }
 0x42d   : > { %v2087_v36 = vpop.eup %2086 }
 0x42e   : > { %v1129_v37 = vsel %vm1068_vm4, %v2087_v36, 0.0 }
 0x42f   : > { %1130 = vadd.xlane.f32.xlu0 %v1129_v37  ;;  %1133 = vadd.xlane.f32.xlu1 %v1132_v38 }
 0x431   : > { %v2362_v39 = vpop.eup %2088 }
 0x432   : > { %v1135_v40 = vsel %vm1068_vm4, %v2362_v39, 0.0 }
 0x433   : > { %1136 = vadd.xlane.f32.xlu0 %v1135_v40  ;;  %v2061_v40 = vld [vmem:[%s2494_s9 + $0x8] sm:$0xff]  }
 0x43d   : > { %v1119_v42 = vpop.xlane.xlu0 %1118 }
 0x43e   : > { %2090 = vrcp.f32 %v1119_v42 }
 0x43f   : > { %v1122_v43 = vpop.xlane.xlu1 %1121 }
 0x440   : > { %2092 = vrcp.f32 %v1122_v43  ;;  %2030 = vrot.lane.b32.xlu1 %v2315_v3, %s2131_s29 }
 0x441   : > { %2094 = vpow2.f32 %v1115_v50 }
 0x448   : > { %v2091_v44 = vpop.eup %2090 }
 0x449   : > { %2025 = vrot.lane.b32.xlu0 %v2315_v3, %s2130_s23  ;;  %v1149_v46 = vmul.f32 %v2091_v44, %v2077_v11 }
 0x44a   : > { %v2093_v45 = vpop.eup %2092 }
 0x44b   : > { %v1150_v47 = vmul.f32 %v2093_v45, %v2079_v13  ;;  %v2095_v51 = vpop.eup %2094 }
 0x44c   : > { %v1138_v52 = vsel %vm1068_vm4, %v2095_v51, 0.0 }
 0x44d   : > { %v1157_v48 = vpack.c.bf16 %v1150_v47, %v1149_v46 }
 0x44f   : > { %1921 = vmatmul.mubr.msk.bf16.vlgmr.msra.gmra.mrb[8].mxu1 %vm1068_vm4, %v1157_v48 }
 0x450   : > { %1932 = vmatprep.mubr.msk.bf16.mxu1 %vm2129_vm1, %v2128_v15 }
 0x464   : > { %1139 = vadd.xlane.f32.xlu1 %v1138_v52 }
 0x475   : > { %2035 = vrot.lane.b32.xlu1 %v2315_v3, %s2132_s18 }
 0x4b4   : > { %v1125_v53 = vpop.xlane.xlu0 %1124 }
 0x4b8   : > { %v1128_v54 = vpop.xlane.xlu1 %1127 }
 0x4b9   : > { %2096 = vrcp.f32 %v1128_v54 }
 0x4ba   : > { %2098 = vrcp.f32 %v1125_v53 }
 0x4bc   : > { %v1131_v55 = vpop.xlane.xlu0 %1130  ;;  %v1134_v56 = vpop.xlane.xlu1 %1133 }
 0x4bd   : > { %2100 = vrcp.f32 %v1131_v55 }
 0x4be   : > { %2102 = vrcp.f32 %v1134_v56 }
 0x4c0   : > { %v1137_v57 = vpop.xlane.xlu0 %1136  ;;  %v2031_v58 = vpop.permute.xlu1 %2030 }
 0x4c1   : > { %v2033_v59 = vunpack.i.h.bf16 %v2031_v58  ;;  %v2032_v60 = vunpack.i.l.bf16 %v2031_v58  ;;  %2104 = vrcp.f32 %v1137_v57 }
 0x4c3   : > { %v2097_v61 = vpop.eup %2096  ;;  %v864_v62 = vpack.c.bf16 %v2033_v59, %v2032_v60 }
 0x4c4   : > { %v2026_v63 = vpop.permute.xlu0 %2025  ;;  %v2099_v2 = vpop.eup %2098  ;;  %v1152_v3 = vmul.f32 %v2097_v61, %v2083_v33 }
 0x4c5   : > { %v2028_v4 = vunpack.i.h.bf16 %v2026_v63  ;;  %v2027_v5 = vunpack.i.l.bf16 %v2026_v63  ;;  %1931 = vmatpush3.bf16.msra.mxu1 %v864_v62  ;;  %v1151_v9 = vmul.f32 %v2099_v2, %v2081_v30  ;;  %v1807_v62 = vld [vmem:[%s2495_s10] ss:$0 sm:$0xff] }
 0x4c6   : > { %1942 = vmatprep.subr.bf16.mxu1 %v2128_v15 }
 0x4c7   : > { %v2101_v6 = vpop.eup %2100  ;;  %v863_v7 = vpack.c.bf16 %v2028_v4, %v2027_v5  ;;  %v1158_v12 = vpack.c.bf16 %v1152_v3, %v1151_v9 }
 0x4c8   : > { %v2103_v8 = vpop.eup %2102  ;;  %v1153_v10 = vmul.f32 %v2101_v6, %v2087_v36 }
 0x4c9   : > { %v1154_v11 = vmul.f32 %v2103_v8, %v2085_v35  ;;  %1925 = vmatpush3.bf16.msra.mxu0 %v863_v7 }
 0x4ca   : > { %1936 = vmatprep.subr.bf16.mxu0 %v2128_v15 }
 0x4cb   : > { %v1159_v13 = vpack.c.bf16 %v1154_v11, %v1153_v10  ;;  %v2105_v20 = vpop.eup %2104 }
 0x4cc   : > { %1927 = vmatmul.mubr.msk.bf16.vlgmr.msra.gmra.mrb[20].mxu0 %vm1068_vm4, %v1158_v12  ;;  %v1155_v22 = vmul.f32 %v2105_v20, %v2362_v39  ;;  %v2062_v20 = vld [vmem:[%s2498_s13] sm:$0xff]  }
 0x4cd   : > { %1933 = vmatmul.mubr.msk.bf16.vlgmr.msra.gmra.mrb[12].mxu1 %vm1068_vm4, %v1159_v13  ;;  %1938 = vmatprep.mubr.msk.bf16.mxu0 %vm2129_vm1, %v2128_v15 }
 0x4ce   : > { %1946 = vmatprep.mubr.msk.bf16.mxu1 %vm2129_vm1, %v2128_v15  ;;  %1943 = vmatpush3.bf16.msra.mxu1 %v2060_v29 }
 0x4cf   : > { %1944 = vmatprep.subr.bf16.mxu1 %v2128_v15 }
 0x4d2   : > { %1945 = vmatpush3.bf16.msra.mxu1 %v2061_v40  ;;  %v2065_v40 = vld [vmem:[%s2500_s15 + $0x8] sm:$0xff]  }
 0x4d3   : > { %1958 = vmatprep.subr.bf16.mxu1 %v2128_v15 }
 0x4f1   : > { %v1140_v14 = vpop.xlane.xlu1 %1139 }
 0x4f2   : > { %2106 = vrcp.f32 %v1140_v14 }
 0x4f5   : > { %v2036_v16 = vpop.permute.xlu1 %2035 }
 0x4f6   : > { %v2038_v17 = vunpack.i.h.bf16 %v2036_v16  ;;  %v2037_v18 = vunpack.i.l.bf16 %v2036_v16 }
 0x4f8   : > { %v865_v19 = vpack.c.bf16 %v2038_v17, %v2037_v18 }
 0x4fa   : > { %1937 = vmatpush3.bf16.msra.mxu0 %v865_v19 }
 0x4fb   : > { %1950 = vmatprep.subr.bf16.mxu0 %v2128_v15 }
 0x4fc   : > { %v2107_v21 = vpop.eup %2106 }
 0x4fd   : > { %v1156_v23 = vmul.f32 %v2107_v21, %v2095_v51  ;;  %v2063_v21 = vld [vmem:[%s2498_s13 + $0x8] sm:$0xff]  }
 0x4ff   : > { %v1160_v24 = vpack.c.bf16 %v1156_v23, %v1155_v22 }
 0x501   : > { %1939 = vmatmul.mubr.msk.bf16.vlgmr.msra.gmra.mrb[24].mxu0 %vm1068_vm4, %v1160_v24 }
 0x502   : > { %1954 = vmatprep.mubr.msk.bf16.mxu0 %vm2129_vm1, %v2128_v15  ;;  %1951 = vmatpush3.bf16.msra.mxu0 %v2062_v20 }
 0x503   : > { %1952 = vmatprep.subr.bf16.mxu0 %v2128_v15 }
 0x506   : > { %1953 = vmatpush3.bf16.msra.mxu0 %v2063_v21 }
 0x522   : > { %v1198_v25 = vpop.f32.mrb[8].mxu1 }
 0x523   : > { %v1922_v26 = vpop.f32.mrb[9].mxu1 }
 0x524   : > { %v1201_v27 = vpop.f32.mrb[10].mxu1 }
 0x525   : > { %v1923_v28 = vpop.f32.mrb[11].mxu1 }
 0x59f   : > { %v1242_v30 = vpop.f32.mrb[20].mxu0 }
 0x5a0   : > { %v1286_v31 = vpop.f32.mrb[12].mxu1  ;;  %v1928_v32 = vpop.f32.mrb[21].mxu0 }
 0x5a1   : > { %v1934_v33 = vpop.f32.mrb[13].mxu1  ;;  %v1245_v34 = vpop.f32.mrb[22].mxu0 }
 0x5a2   : > { %v2039_v35 = vpack.i.bf16 %v1245_v34, %v1242_v30  ;;  %v1289_v36 = vpop.f32.mrb[14].mxu1  ;;  %v1929_v37 = vpop.f32.mrb[23].mxu0  ;;  %v1811_v30 = vld [vmem:[%s2496_s11] ss:$0 sm:$0xff] }
 0x5a3   : > { %v2044_v38 = vpack.i.bf16 %v1289_v36, %v1286_v31  ;;  %v1935_v39 = vpop.f32.mrb[15].mxu1  ;;  %v1812_v34 = vld [vmem:[%s2497_s12] ss:$0 sm:$0xff] }
 0x5a4   : > { %2040 = vrot.lane.b32.xlu1 %v2039_v35, %s2133_s20  ;;  %v2064_v39 = vld [vmem:[%s2500_s15] sm:$0xff]  }
 0x5a5   : > { %2045 = vrot.lane.b32.xlu0 %v2044_v38, %s2134_s21  ;;  %s548_s21 = scalar_lea.vmem %s2502_s17, %s1828_s26 }
 0x5d4   : > { %v1330_v41 = vpop.f32.mrb[24].mxu0 }
 0x5d5   : > { %v1940_v42 = vpop.f32.mrb[25].mxu0 }
 0x5d6   : > { %v1333_v43 = vpop.f32.mrb[26].mxu0  ;;  %v2067_v42 = vld [vmem:[%s2500_s15 + $0x18] sm:$0xff]  }
 0x5d7   : > { %v2049_v44 = vpack.i.bf16 %v1333_v43, %v1330_v41  ;;  %v1941_v45 = vpop.f32.mrb[27].mxu0  ;;  %v2066_v41 = vld [vmem:[%s2500_s15 + $0x10] sm:$0xff]   ;;  %v2068_v43 = vld [vmem:[%s2500_s15 + $0x20] sm:$0xff]  }
 0x5d8   : > { %v2070_v45 = vld [vmem:[%s2500_s15 + $0x30] sm:$0xff]  }
 0x5d9   : > { %2050 = vrot.lane.b32.xlu1 %v2049_v44, %s2135_s27  ;;  %v2069_v44 = vld [vmem:[%s2500_s15 + $0x28] sm:$0xff]  }
 0x616   : > { %v2041_v46 = vpop.permute.xlu1 %2040 }
 0x617   : > { %v2046_v47 = vpop.permute.xlu0 %2045  ;;  %v2043_v48 = vunpack.i.h.bf16 %v2041_v46  ;;  %v2042_v49 = vunpack.i.l.bf16 %v2041_v46  ;;  %v2071_v46 = vld [vmem:[%s2500_s15 + $0x38] sm:$0xff]  }
 0x618   : > { %v2048_v50 = vunpack.i.h.bf16 %v2046_v47  ;;  %v2047_v51 = vunpack.i.l.bf16 %v2046_v47  ;;  %v1813_v47 = vld [vmem:[%s2499_s14] ss:$0 sm:$0xff] }
 0x619   : > { %v1362_v52 = vsel %vm866_vm2, %v1201_v27, %v2043_v48  ;;  %v1361_v53 = vsel %vm866_vm2, %v1198_v25, %v2042_v49 }
 0x61a   : > { %v1363_v57 = vsel %vm1068_vm4, %v1361_v53, %v2047_v51  ;;  %v1364_v58 = vsel %vm1068_vm4, %v1362_v52, %v2048_v50 }
 0x64b   : > { %v2051_v54 = vpop.permute.xlu1 %2050 }
 0x64c   : > { %v2053_v55 = vunpack.i.h.bf16 %v2051_v54  ;;  %v2052_v56 = vunpack.i.l.bf16 %v2051_v54 }
 0x64e   : > { %v1367_v59 = vsel %vm1365_vm5, %v1364_v58, %v2053_v55  ;;  %v1366_v60 = vsel %vm1365_vm5, %v1363_v57, %v2052_v56 }
 0x64f   : > { %v1368_v61 = vpack.c.bf16 %v1367_v59, %v1366_v60 }
 0x651   : > { %1947 = vmatmul.mubr.msk.bf16.vlgmr.msra.gmra.mrb[16].mxu1 %vm554_vm0, %v1368_v61 }
 0x652   : > { %1974 = vmatprep.mubr.msk.bf16.mxu1 %vm2129_vm1, %v2128_v15  ;;  %1959 = vmatpush3.bf16.msra.mxu1 %v2064_v39 }
 0x653   : > { %1960 = vmatprep.subr.bf16.mxu1 %v2128_v15 }
 0x656   : > { %1961 = vmatpush3.bf16.msra.mxu1 %v2065_v40 }
 0x657   : > { %1962 = vmatprep.subr.bf16.mxu1 %v2128_v15 }
 0x65a   : > { %1963 = vmatpush3.bf16.msra.mxu1 %v2066_v41 }
 0x65b   : > { %1964 = vmatprep.subr.bf16.mxu1 %v2128_v15 }
 0x65e   : > { %1965 = vmatpush3.bf16.msra.mxu1 %v2067_v42 }
 0x65f   : > { %1966 = vmatprep.subr.bf16.mxu1 %v2128_v15 }
 0x662   : > { %1967 = vmatpush3.bf16.msra.mxu1 %v2068_v43  ;;  %v1817_v43 = vld [vmem:[%s2501_s16] ss:$0 sm:$0xff] }
 0x663   : > { %1968 = vmatprep.subr.bf16.mxu1 %v2128_v15 }
 0x666   : > { %1969 = vmatpush3.bf16.msra.mxu1 %v2069_v44 }
 0x667   : > { %1970 = vmatprep.subr.bf16.mxu1 %v2128_v15 }
 0x66a   : > { %1971 = vmatpush3.bf16.msra.mxu1 %v2070_v45 }
 0x66b   : > { %1972 = vmatprep.subr.bf16.mxu1 %v2128_v15 }
 0x66e   : > { %1973 = vmatpush3.bf16.msra.mxu1 %v2071_v46 }
 0x724   : > { %v1429_v63 = vpop.f32.mrb[16].mxu1 }
 0x725   : > { %v1430_v2 = vadd.f32 %v1807_v62, %v1429_v63  ;;  %v1948_v4 = vpop.f32.mrb[17].mxu1 }
 0x726   : > { %v1432_v5 = vpop.f32.mrb[18].mxu1 }
 0x727   : > { %v2409_v3 = vadd.f32 %v1430_v2, %v2242_v0  ;;  %v1433_v6 = vadd.f32 %v1807_v62, %v1432_v5  ;;  %v1949_v7 = vpop.f32.mrb[19].mxu1 }
 0x729   : > { %v2412_v8 = vadd.f32 %v1433_v6, %v2244_v1  ;;  %v1440_v9 = vsel %vm554_vm0, %v2409_v3, 0.0 }
 0x72a   : > { %1441 = vadd.xlane.f32.xlu0 %v1440_v9 }
 0x72b   : > { %v1443_v10 = vsel %vm554_vm0, %v2412_v8, 0.0 }
 0x72c   : > { %1444 = vadd.xlane.f32.xlu1 %v1443_v10 }
 0x7b7   : > { %v1442_v11 = vpop.xlane.xlu0 %1441 }
 0x7b8   : > { %v1446_v12 = vmul.f32 0.03125, %v1442_v11 }
 0x7b9   : > { %v1445_v13 = vpop.xlane.xlu1 %1444 }
 0x7ba   : > { %v1448_v14 = vsub.f32 %v2409_v3, %v1446_v12  ;;  %v1447_v0 = vmul.f32 0.03125, %v1445_v13 }
 0x7bc   : > { %v1449_v16 = vsub.f32 %v2412_v8, %v1447_v0  ;;  %v1450_v17 = vmul.f32 %v1448_v14, %v1448_v14 }
 0x7be   : > { %v1452_v1 = vsel %vm554_vm0, %v1450_v17, 0.0  ;;  %v1451_v18 = vmul.f32 %v1449_v16, %v1449_v16 }
 0x7bf   : > { %1453 = vadd.xlane.f32.xlu0 %v1452_v1 }
 0x7c0   : > { %v1455_v19 = vsel %vm554_vm0, %v1451_v18, 0.0 }
 0x7c3   : > { %1456 = vadd.xlane.f32.xlu0 %v1455_v19 }
 0x84c   : > { %v1454_v22 = vpop.xlane.xlu0 %1453 }
 0x84d   : > { %v1458_v23 = vmul.f32 0.03125, %v1454_v22 }
 0x84f   : > { %v1460_v24 = vadd.f32 1e-05, %v1458_v23 }
 0x850   : > { %v1457_v25 = vpop.xlane.xlu0 %1456 }
 0x851   : > { %2108 = vrsqrt.f32 %v1460_v24  ;;  %v1459_v26 = vmul.f32 0.03125, %v1457_v25 }
 0x853   : > { %v1461_v27 = vadd.f32 1e-05, %v1459_v26 }
 0x855   : > { %2110 = vrsqrt.f32 %v1461_v27 }
 0x85b   : > { %v2109_v28 = vpop.eup %2108 }
 0x85c   : > { %v1464_v29 = vmul.f32 %v2109_v28, %v1448_v14 }
 0x85e   : > { %v1472_v32 = vmul.f32 %v1811_v30, %v1464_v29 }
 0x85f   : > { %v2111_v31 = vpop.eup %2110 }
 0x860   : > { %v1465_v33 = vmul.f32 %v2111_v31, %v1449_v16  ;;  %v1480_v36 = vadd.f32 %v1812_v34, %v1472_v32 }
 0x862   : > { %v1473_v35 = vmul.f32 %v1811_v30, %v1465_v33 }
 0x864   : > { %v1481_v37 = vadd.f32 %v1812_v34, %v1473_v35 }
 0x866   : > { %v1482_v38 = vpack.c.bf16 %v1481_v37, %v1480_v36 }
 0x868   : > { %1955 = vmatmul.mubr.msk.bf16.vlgmr.msra.gmra.mrb[28].mxu0 %vm554_vm0, %v1482_v38 }
 0x93b   : > { %v1543_v48 = vpop.f32.mrb[28].mxu0 }
 0x93c   : > { %v1544_v49 = vadd.f32 %v1813_v47, %v1543_v48  ;;  %v1956_v50 = vpop.f32.mrb[29].mxu0 }
 0x93d   : > { %v1546_v51 = vpop.f32.mrb[30].mxu0 }
 0x93e   : > { %v1552_v52 = vmul.f32 0.70710677, %v1544_v49  ;;  %v1547_v53 = vadd.f32 %v1813_v47, %v1546_v51  ;;  %v1957_v54 = vpop.f32.mrb[31].mxu0  ;;  %v1550_v37 = vmul.f32 0.5, %v1544_v49 }
 0x940   : > { %v1554_v55 = vand.u32 2147483647, %v1552_v52  ;;  %v1553_v56 = vmul.f32 0.70710677, %v1547_v53  ;;  %vm1594_vm6 = vcmp.lt.f32.partialorder %v1552_v52, 0.0  ;;  %v1551_v38 = vmul.f32 0.5, %v1547_v53 }
 0x942   : > { %v1556_v57 = vmul.f32 0.3275911, %v1554_v55  ;;  %v1555_v15 = vand.u32 2147483647, %v1553_v56  ;;  %v1582_v61 = vsub.f32 0.0, %v1554_v55  ;;  %vm1595_vm7 = vcmp.lt.f32.partialorder %v1553_v56, 0.0 }
 0x944   : > { %v1558_v58 = vadd.f32 1.0, %v1556_v57  ;;  %v1557_v59 = vmul.f32 0.3275911, %v1555_v15  ;;  %v1583_v62 = vsub.f32 0.0, %v1555_v15  ;;  %v1584_v2 = vmul.f32 %v1582_v61, %v1554_v55 }
 0x946   : > { %2112 = vrcp.f32 %v1558_v58  ;;  %v1559_v60 = vadd.f32 1.0, %v1557_v59  ;;  %v1585_v7 = vmul.f32 %v1583_v62, %v1555_v15  ;;  %v1586_v9 = vmul.f32 1.442695, %v1584_v2 }
 0x948   : > { %2114 = vrcp.f32 %v1559_v60  ;;  %v1588_v14 = vmul.f32 1.442695, %v1585_v7 }
 0x949   : > { %2116 = vpow2.f32 %v1586_v9 }
 0x94a   : > { %2118 = vpow2.f32 %v1588_v14 }
 0x950   : > { %v2113_v63 = vpop.eup %2112 }
 0x951   : > { %v1564_v4 = vmul.f32 1.0614054, %v2113_v63 }
 0x952   : > { %v2115_v5 = vpop.eup %2114 }
 0x953   : > { %v1566_v6 = vadd.f32 -1.4531521, %v1564_v4  ;;  %v1565_v10 = vmul.f32 1.0614054, %v2115_v5  ;;  %v2117_v24 = vpop.eup %2116 }
 0x954   : > { %v2119_v28 = vpop.eup %2118 }
 0x955   : > { %v1568_v11 = vmul.f32 %v2113_v63, %v1566_v6  ;;  %v1567_v12 = vadd.f32 -1.4531521, %v1565_v10 }
 0x957   : > { %v1570_v13 = vadd.f32 1.4214138, %v1568_v11  ;;  %v1569_v0 = vmul.f32 %v2115_v5, %v1567_v12 }
 0x959   : > { %v1572_v16 = vmul.f32 %v2113_v63, %v1570_v13  ;;  %v1571_v17 = vadd.f32 1.4214138, %v1569_v0 }
 0x95b   : > { %v1574_v1 = vadd.f32 -0.28449672, %v1572_v16  ;;  %v1573_v18 = vmul.f32 %v2115_v5, %v1571_v17 }
 0x95d   : > { %v1576_v19 = vmul.f32 %v2113_v63, %v1574_v1  ;;  %v1575_v20 = vadd.f32 -0.28449672, %v1573_v18 }
 0x95f   : > { %v1578_v21 = vadd.f32 0.2548296, %v1576_v19  ;;  %v1577_v22 = vmul.f32 %v2115_v5, %v1575_v20 }
 0x961   : > { %v1580_v23 = vmul.f32 %v2113_v63, %v1578_v21  ;;  %v1579_v25 = vadd.f32 0.2548296, %v1577_v22 }
 0x963   : > { %v1590_v26 = vmul.f32 %v2117_v24, %v1580_v23  ;;  %v1581_v27 = vmul.f32 %v2115_v5, %v1579_v25 }
 0x965   : > { %v1592_v29 = vsub.f32 1.0, %v1590_v26  ;;  %v1591_v30 = vmul.f32 %v2119_v28, %v1581_v27 }
 0x967   : > { %v1596_v31 = vsub.f32 0.0, %v1592_v29  ;;  %v1593_v32 = vsub.f32 1.0, %v1591_v30 }
 0x969   : > { %v1598_v33 = vsel %vm1594_vm6, %v1596_v31, %v1592_v29  ;;  %v1597_v34 = vsub.f32 0.0, %v1593_v32 }
 0x96a   : > { %v1600_v35 = vadd.f32 1.0, %v1598_v33 }
 0x96b   : > { %v1599_v36 = vsel %vm1595_vm7, %v1597_v34, %v1593_v32 }
 0x96c   : > { %v1601_v39 = vadd.f32 1.0, %v1599_v36  ;;  %v1602_v40 = vmul.f32 %v1600_v35, %v1550_v37 }
 0x96e   : > { %v1603_v41 = vmul.f32 %v1601_v39, %v1551_v38 }
 0x970   : > { %v1604_v42 = vpack.c.bf16 %v1603_v41, %v1602_v40 }
 0x972   : > { %1975 = vmatmul.mubr.bf16.vlgmr.msra.gmra.mrb[20].mxu1 %v1604_v42 }
 0xa45   : > { %v1710_v44 = vpop.f32.mrb[20].mxu1 }
 0xa46   : > { %v1711_v45 = vadd.f32 %v1817_v43, %v1710_v44  ;;  %v1976_v46 = vpop.f32.mrb[21].mxu1 }
 0xa47   : > { %v1713_v47 = vpop.f32.mrb[22].mxu1 }
 0xa48   : > { %v1717_v48 = vadd.f32 %v1711_v45, %v2409_v3  ;;  %v1714_v49 = vadd.f32 %v1817_v43, %v1713_v47  ;;  %v1977_v50 = vpop.f32.mrb[23].mxu1 }
 0xa4a   : > { %1719 = vst.msk [vmem:[%s548_s21] sm:$0xff] %vm554_vm0, %v1717_v48  ;;  %v1718_v51 = vadd.f32 %v1714_v49, %v2412_v8 }
 0xa4c   : > { %1720 = vst.msk [vmem:[%s548_s21 + $0x8] sm:$0xff] %vm554_vm0, %v1718_v51 }
 0xa4d PF: > { %s27_s24 = sadd.s32 1, %s2126_s24  }
 0xa4e   : > { %p24_p4 = scmp.ge.s32.totalorder %s27_s24, 4  }
 0xa50   :  { %26 = sbr.rel (!%p24_p4) target bundleno = 3 (0x3), region = 118 }

// kernel: encoder_layer_forward.2
= control target key start
LH: loop header
LB: loop body
LE: loop exit
PB: predicated region body
PF: predicated region fallthrough
CT: control target
= control target key end

     0   :  { %s5091_s24 = smov 0   ;;  %s6349_s0 = inlined_call_operand.vmem [shape: f32[8,16,32], index: 0, kind: input, shape index: {}]   ;;  %s6350_s1 = inlined_call_operand.vmem [shape: f32[1,32], index: 1, kind: input, shape index: {}]   ;;  %s6351_s2 = inlined_call_operand.vmem [shape: f32[1,32], index: 2, kind: input, shape index: {}]   ;;  %s6352_s3 = inlined_call_operand.vmem [shape: bf16[32,32], index: 3, kind: input, shape index: {}]   ;;  %s6353_s4 = inlined_call_operand.vmem [shape: f32[1,32], index: 4, kind: input, shape index: {}]   ;;  %s6354_s5 = inlined_call_operand.vmem [shape: bf16[32,32], index: 5, kind: input, shape index: {}]   ;;  %s6355_s6 = inlined_call_operand.vmem [shape: f32[1,32], index: 6, kind: input, shape index: {}]   ;;  %s6356_s7 = inlined_call_operand.vmem [shape: bf16[32,32], index: 7, kind: input, shape index: {}]   ;;  %s6357_s8 = inlined_call_operand.vmem [shape: f32[1,32], index: 8, kind: input, shape index: {}]   ;;  %s6358_s9 = inlined_call_operand.vmem [shape: bf16[32,32], index: 9, kind: input, shape index: {}]   ;;  %s6359_s10 = inlined_call_operand.vmem [shape: f32[1,32], index: 10, kind: input, shape index: {}]   ;;  %s6360_s11 = inlined_call_operand.vmem [shape: f32[1,32], index: 11, kind: input, shape index: {}]   ;;  %s6361_s12 = inlined_call_operand.vmem [shape: f32[1,32], index: 12, kind: input, shape index: {}]   ;;  %s6362_s13 = inlined_call_operand.vmem [shape: bf16[32,128], index: 13, kind: input, shape index: {}]   ;;  %s6363_s14 = inlined_call_operand.vmem [shape: f32[1,128], index: 14, kind: input, shape index: {}]   ;;  %s6364_s15 = inlined_call_operand.vmem [shape: bf16[128,32], index: 15, kind: input, shape index: {}]   ;;  %s6365_s16 = inlined_call_operand.vmem [shape: f32[1,32], index: 16, kind: input, shape index: {}]   ;;  %s6366_s17 = inlined_call_operand.vmem [shape: f32[8,16,32], index: 17, kind: output, shape index: {}]  }
   0x1   :  { %6375 = sst [smem:[#allocation8_spill]] %s6349_s0 }
   0x2   :  { %6376 = sst [smem:[#allocation9_spill]] %s6350_s1 }
   0x3 LB: > { %s4034_s25 = sadd.s32 4294967295, %s4991_s24   ;;  %p4038_p0 = scmp.ge.s32.totalorder %s4991_s24, 1  ;;  %s4991_s24 = sphi %s5091_s24, %s27_s24  }
   0x4   : > { %p489_p1 = scmp.lt.s32.totalorder %s4991_s24, 3 }
   0x6   : > { %p490_p2 = pnand %p4038_p0, %p489_p1 }
   0x8   : > { %493 = sbr.rel (%p490_p2) target bundleno = 2732 (0xaac), region = 88 }
   0xf   : > { %s4039_s26 = sshll.u32 %s4034_s25, 2  ;;  %vm568_vm0 = vcmask 261120   ;;  %s6377_s0 = sld [smem:[#allocation8_spill]]  ;;  %v4767_v56 = vld [vmem:[%s6352_s3] sm:$0xff]   ;;  %v4769_v58 = vld [vmem:[%s6352_s3 + $0x8] sm:$0xff]   ;;  %vm4994_vm1 = vmmov 0  }
  0x10   : > { %p544_p3 = scmp.lt.s32.totalorder %s4039_s26, 7  ;;  %v4768_v57 = vld [vmem:[%s6356_s7] sm:$0xff]   ;;  %4235 = vmatprep.subr.bf16.mxu1 %v4767_v56  ;;  %v4770_v59 = vld [vmem:[%s6356_s7 + $0x8] sm:$0xff]   ;;  %s6378_s19 = sld [smem:[#allocation9_spill]]  ;;  %vm1270_vm2 = vcmask 64512   ;;  %vm2060_vm4 = vcmask 130048  }
  0x11   : > { %4259 = vmatprep.subr.bf16.mxu0 %v4768_v57  ;;  %4236 = vmatpush3.bf16.msra.mxu1 %v4767_v56  ;;  %v5180_v60 = vld [vmem:[%s6354_s5] sm:$0xff]   ;;  %s4996_s1 = smov 112   ;;  %s4997_s20 = smov 104   ;;  %vm3245_vm5 = vcmask 195584  }
  0x12   : > { %s6395_s26 = smov (!%p544_p3, %s4039_s26), 7  ;;  %4260 = vmatpush3.bf16.msra.mxu0 %v4768_v57  ;;  %4237 = vmatprep.subr.bf16.mxu1 %v4769_v58  ;;  %s4998_s21 = smov 8  }
  0x13   : > { %s4127_s27 = sshll.u32 %s6395_s26, 4  ;;  %4261 = vmatprep.subr.bf16.mxu0 %v4770_v59  ;;  %s4999_s22 = smov 16  }
  0x14   : > { %s555_s25 = scalar_lea.vmem %s6366_s17, %s4127_s27 }
  0x15   : > { %s5107_s30 = scalar_lea.vmem %s6377_s0, %s4127_s27  ;;  %4238 = vmatpush3.bf16.msra.mxu1 %v4769_v58  ;;  %s5000_s0 = smov 24  }
  0x16   : > { %v558_v0 = vld [vmem:[%s5107_s30] sm:$0xff]  ;;  %v560_v1 = vld [vmem:[%s5107_s30 + $0x10] sm:$0xff]  ;;  %v559_v2 = vld [vmem:[%s5107_s30 + $0x8] sm:$0xff]  ;;  %4262 = vmatpush3.bf16.msra.mxu0 %v4770_v59  ;;  %4247 = vmatprep.subr.bf16.mxu1 %v5180_v60 }
  0x17   : > { %v569_v3 = vsel %vm568_vm0, %v558_v0, 0.0  ;;  %v575_v4 = vsel %vm568_vm0, %v560_v1, 0.0  ;;  %v561_v5 = vld [vmem:[%s5107_s30 + $0x18] sm:$0xff]  ;;  %v562_v6 = vld [vmem:[%s5107_s30 + $0x20] sm:$0xff]  ;;  %v563_v7 = vld [vmem:[%s5107_s30 + $0x28] sm:$0xff]  ;;  %v572_v8 = vsel %vm568_vm0, %v559_v2, 0.0 }
  0x18   : > { %570 = vadd.xlane.f32.xlu0 %v569_v3  ;;  %576 = vadd.xlane.f32.xlu1 %v575_v4  ;;  %v578_v9 = vsel %vm568_vm0, %v561_v5, 0.0  ;;  %v581_v10 = vsel %vm568_vm0, %v562_v6, 0.0  ;;  %v584_v11 = vsel %vm568_vm0, %v563_v7, 0.0  ;;  %v564_v12 = vld [vmem:[%s5107_s30 + $0x30] sm:$0xff]  ;;  %v565_v13 = vld [vmem:[%s5107_s30 + $0x38] sm:$0xff] }
  0x19   : > { %v587_v14 = vsel %vm568_vm0, %v564_v12, 0.0  ;;  %v590_v15 = vsel %vm568_vm0, %v565_v13, 0.0 }
  0x1c   : > { %573 = vadd.xlane.f32.xlu0 %v572_v8  ;;  %579 = vadd.xlane.f32.xlu1 %v578_v9 }
  0x20   : > { %582 = vadd.xlane.f32.xlu0 %v581_v10  ;;  %585 = vadd.xlane.f32.xlu1 %v584_v11 }
  0x24   : > { %588 = vadd.xlane.f32.xlu0 %v587_v14  ;;  %591 = vadd.xlane.f32.xlu1 %v590_v15 }
  0xa5   : > { %v571_v16 = vpop.xlane.xlu0 %570  ;;  %v577_v17 = vpop.xlane.xlu1 %576 }
  0xa6   : > { %v594_v18 = vmul.f32 0.03125, %v571_v16  ;;  %v596_v19 = vmul.f32 0.03125, %v577_v17 }
  0xa8   : > { %v5125_v20 = vsub.f32 %v558_v0, %v594_v18  ;;  %v5127_v21 = vsub.f32 %v560_v1, %v596_v19 }
  0xa9   : > { %v574_v22 = vpop.xlane.xlu0 %573  ;;  %v580_v23 = vpop.xlane.xlu1 %579 }
  0xaa   : > { %v595_v24 = vmul.f32 0.03125, %v574_v22  ;;  %v597_v25 = vmul.f32 0.03125, %v580_v23  ;;  %v610_v26 = vmul.f32 %v5125_v20, %v5125_v20  ;;  %v612_v27 = vmul.f32 %v5127_v21, %v5127_v21 }
  0xac   : > { %v5133_v28 = vsub.f32 %v559_v2, %v595_v24  ;;  %v5135_v29 = vsub.f32 %v561_v5, %v597_v25  ;;  %v618_v30 = vsel %vm568_vm0, %v610_v26, 0.0  ;;  %v624_v33 = vsel %vm568_vm0, %v612_v27, 0.0  ;;  %v4045_v24 = vld [vmem:[%s6378_s19] ss:$0 sm:$0xff]  ;;  %s4995_s19 = smov 120  }
  0xad   : > { %619 = vadd.xlane.f32.xlu0 %v618_v30  ;;  %v583_v31 = vpop.xlane.xlu0 %582  ;;  %v586_v32 = vpop.xlane.xlu1 %585 }
  0xae   : > { %v598_v34 = vmul.f32 0.03125, %v583_v31  ;;  %v599_v35 = vmul.f32 0.03125, %v586_v32  ;;  %v611_v36 = vmul.f32 %v5133_v28, %v5133_v28  ;;  %v613_v37 = vmul.f32 %v5135_v29, %v5135_v29  ;;  %v4046_v32 = vld [vmem:[%s6351_s2] ss:$0 sm:$0xff] }
  0xb0   : > { %v5143_v38 = vsub.f32 %v562_v6, %v598_v34  ;;  %v5145_v39 = vsub.f32 %v563_v7, %v599_v35  ;;  %v621_v40 = vsel %vm568_vm0, %v611_v36, 0.0  ;;  %v627_v43 = vsel %vm568_vm0, %v613_v37, 0.0 }
  0xb1   : > { %625 = vadd.xlane.f32.xlu0 %v624_v33  ;;  %622 = vadd.xlane.f32.xlu1 %v621_v40  ;;  %v589_v41 = vpop.xlane.xlu0 %588  ;;  %v592_v42 = vpop.xlane.xlu1 %591 }
  0xb2   : > { %v600_v44 = vmul.f32 0.03125, %v589_v41  ;;  %v601_v45 = vmul.f32 0.03125, %v592_v42  ;;  %v614_v46 = vmul.f32 %v5143_v38, %v5143_v38  ;;  %v615_v47 = vmul.f32 %v5145_v39, %v5145_v39 }
  0xb4   : > { %v5153_v48 = vsub.f32 %v564_v12, %v600_v44  ;;  %v5155_v49 = vsub.f32 %v565_v13, %v601_v45  ;;  %v630_v50 = vsel %vm568_vm0, %v614_v46, 0.0  ;;  %v633_v51 = vsel %vm568_vm0, %v615_v47, 0.0 }
  0xb5   : > { %628 = vadd.xlane.f32.xlu1 %v627_v43  ;;  %631 = vadd.xlane.f32.xlu0 %v630_v50 }
  0xb6   : > { %v616_v52 = vmul.f32 %v5153_v48, %v5153_v48  ;;  %v617_v53 = vmul.f32 %v5155_v49, %v5155_v49 }
  0xb8   : > { %v636_v54 = vsel %vm568_vm0, %v616_v52, 0.0  ;;  %v639_v55 = vsel %vm568_vm0, %v617_v53, 0.0 }
  0xb9   : > { %634 = vadd.xlane.f32.xlu1 %v633_v51  ;;  %637 = vadd.xlane.f32.xlu0 %v636_v54 }
  0xbd   : > { %640 = vadd.xlane.f32.xlu1 %v639_v55 }
 0x13a   : > { %v620_v61 = vpop.xlane.xlu0 %619 }
 0x13b   : > { %v642_v62 = vmul.f32 0.03125, %v620_v61 }
 0x13d   : > { %v650_v63 = vadd.f32 1e-05, %v642_v62  ;;  %v4047_v62 = vld [vmem:[%s6353_s4] ss:$0 sm:$0xff] }
 0x13e   : > { %v623_v0 = vpop.xlane.xlu1 %622  ;;  %v626_v1 = vpop.xlane.xlu0 %625 }
 0x13f   : > { %4785 = vrsqrt.f32 %v650_v63  ;;  %v643_v2 = vmul.f32 0.03125, %v623_v0  ;;  %v644_v3 = vmul.f32 0.03125, %v626_v1  ;;  %v4061_v0 = vld [vmem:[%s6357_s8] ss:$0 sm:$0xff] }
 0x141   : > { %v651_v4 = vadd.f32 1e-05, %v643_v2  ;;  %v652_v5 = vadd.f32 1e-05, %v644_v3 }
 0x142   : > { %v629_v6 = vpop.xlane.xlu1 %628  ;;  %v632_v7 = vpop.xlane.xlu0 %631 }
 0x143   : > { %4787 = vrsqrt.f32 %v651_v4  ;;  %v645_v8 = vmul.f32 0.03125, %v629_v6  ;;  %v646_v9 = vmul.f32 0.03125, %v632_v7 }
 0x144   : > { %4789 = vrsqrt.f32 %v652_v5 }
 0x145   : > { %v653_v10 = vadd.f32 1e-05, %v645_v8  ;;  %v654_v11 = vadd.f32 1e-05, %v646_v9 }
 0x146   : > { %v635_v12 = vpop.xlane.xlu1 %634  ;;  %v638_v13 = vpop.xlane.xlu0 %637 }
 0x147   : > { %4791 = vrsqrt.f32 %v653_v10  ;;  %v647_v14 = vmul.f32 0.03125, %v635_v12  ;;  %v648_v15 = vmul.f32 0.03125, %v638_v13 }
 0x148   : > { %4793 = vrsqrt.f32 %v654_v11 }
 0x149   : > { %v4786_v16 = vpop.eup %4785  ;;  %v655_v17 = vadd.f32 1e-05, %v647_v14  ;;  %v656_v18 = vadd.f32 1e-05, %v648_v15 }
 0x14a   : > { %v641_v19 = vpop.xlane.xlu1 %640  ;;  %v666_v22 = vmul.f32 %v4786_v16, %v5125_v20 }
 0x14b   : > { %4795 = vrsqrt.f32 %v655_v17  ;;  %v649_v23 = vmul.f32 0.03125, %v641_v19 }
 0x14c   : > { %4797 = vrsqrt.f32 %v656_v18  ;;  %v680_v31 = vmul.f32 %v4045_v24, %v666_v22 }
 0x14d   : > { %v4788_v25 = vpop.eup %4787  ;;  %v657_v26 = vadd.f32 1e-05, %v649_v23 }
 0x14e   : > { %v4790_v27 = vpop.eup %4789  ;;  %v667_v30 = vmul.f32 %v4788_v25, %v5133_v28  ;;  %v694_v36 = vadd.f32 %v4046_v32, %v680_v31 }
 0x14f   : > { %4799 = vrsqrt.f32 %v657_v26  ;;  %v668_v20 = vmul.f32 %v4790_v27, %v5127_v21 }
 0x150   : > { %v681_v33 = vmul.f32 %v4045_v24, %v667_v30 }
 0x151   : > { %v4792_v34 = vpop.eup %4791  ;;  %v682_v41 = vmul.f32 %v4045_v24, %v668_v20 }
 0x152   : > { %v4794_v35 = vpop.eup %4793  ;;  %v695_v37 = vadd.f32 %v4046_v32, %v681_v33  ;;  %v669_v40 = vmul.f32 %v4792_v34, %v5135_v29 }
 0x153   : > { %v670_v42 = vmul.f32 %v4794_v35, %v5143_v38  ;;  %v696_v21 = vadd.f32 %v4046_v32, %v682_v41  ;;  %v4772_v38 = vld [vmem:[%s6354_s5 + $0x8] sm:$0xff]  }
 0x154   : > { %v702_v43 = vpack.c.bf16 %v695_v37, %v694_v36  ;;  %v683_v28 = vmul.f32 %v4045_v24, %v669_v40 }
 0x155   : > { %v4796_v44 = vpop.eup %4795  ;;  %v684_v45 = vmul.f32 %v4045_v24, %v670_v42 }
 0x156   : > { %v4798_v46 = vpop.eup %4797  ;;  %4239 = vmatprep.mubr.msk.bf16.mxu1 %vm568_vm0, %v702_v43  ;;  %4263 = vmatprep.mubr.msk.bf16.mxu0 %vm568_vm0, %v702_v43  ;;  %v697_v47 = vadd.f32 %v4046_v32, %v683_v28  ;;  %v671_v50 = vmul.f32 %v4796_v44, %v5145_v39 }
 0x157   : > { %v672_v51 = vmul.f32 %v4798_v46, %v5153_v48  ;;  %v698_v54 = vadd.f32 %v4046_v32, %v684_v45 }
 0x158   : > { %v703_v52 = vpack.c.bf16 %v697_v47, %v696_v21  ;;  %v685_v29 = vmul.f32 %v4045_v24, %v671_v50 }
 0x159   : > { %v4800_v53 = vpop.eup %4799  ;;  %v686_v57 = vmul.f32 %v4045_v24, %v672_v51  ;;  %v4054_v51 = vld [vmem:[%s6355_s6] ss:$0 sm:$0xff] }
 0x15a   : > { %4240 = vmatmul.mubr.msk.bf16.vlgmr.msra.gmra.mrb[0].mxu1 %vm568_vm0, %v703_v52  ;;  %4264 = vmatmul.mubr.msk.bf16.vlgmr.msra.gmra.mrb[0].mxu0 %vm568_vm0, %v703_v52  ;;  %v699_v55 = vadd.f32 %v4046_v32, %v685_v29  ;;  %v673_v56 = vmul.f32 %v4800_v53, %v5155_v49  ;;  %v6367_v49 = vmov 0.0  }
 0x15b   : > { %4248 = vmatpush3.bf16.msra.mxu1 %v5180_v60  ;;  %v700_v58 = vadd.f32 %v4046_v32, %v686_v57  ;;  %4283 = vmatprep.subr.bf16.mxu0 %v6367_v49 }
 0x15c   : > { %v704_v39 = vpack.c.bf16 %v699_v55, %v698_v54  ;;  %v687_v48 = vmul.f32 %v4045_v24, %v673_v56  ;;  %4249 = vmatprep.subr.bf16.mxu1 %v4772_v38 }
 0x15e   : > { %4243 = vmatprep.mubr.msk.bf16.mxu1 %vm568_vm0, %v704_v39  ;;  %4267 = vmatprep.mubr.msk.bf16.mxu0 %vm568_vm0, %v704_v39  ;;  %v701_v59 = vadd.f32 %v4046_v32, %v687_v48 }
 0x15f   : > { %4250 = vmatpush3.bf16.msra.mxu1 %v4772_v38 }
 0x160   : > { %v705_v61 = vpack.c.bf16 %v701_v59, %v700_v58  ;;  %4271 = vmatprep.subr.bf16.mxu1 %v6367_v49 }
 0x162   : > { %4244 = vmatmul.mubr.msk.bf16.gmra.mrb[4].mxu1 %vm568_vm0, %v705_v61  ;;  %4268 = vmatmul.mubr.msk.bf16.gmra.mrb[4].mxu0 %vm568_vm0, %v705_v61 }
 0x163   : > { %4251 = vmatprep.mubr.msk.bf16.mxu1 %vm568_vm0, %v702_v43  ;;  %4285 = vmatprep.mubr.msk.bf16.mxu0 %vm4994_vm1, %v6367_v49 }
 0x16a   : > { %4252 = vmatmul.mubr.msk.bf16.vlgmr.msra.gmra.mrb[8].mxu1 %vm568_vm0, %v703_v52 }
 0x16b   : > { %4255 = vmatprep.mubr.msk.bf16.mxu1 %vm568_vm0, %v704_v39 }
 0x172   : > { %4256 = vmatmul.mubr.msk.bf16.gmra.mrb[12].mxu1 %vm568_vm0, %v705_v61 }
 0x173   : > { %4273 = vmatprep.mubr.msk.bf16.mxu1 %vm4994_vm1, %v6367_v49 }
 0x22d   : > { %v4241_v60 = vpop.f32.mrb[0].mxu1  ;;  %v4265_v63 = vpop.f32.mrb[0].mxu0 }
 0x22e   : > { %v775_v1 = vpop.f32.mrb[1].mxu1  ;;  %v951_v2 = vpop.f32.mrb[1].mxu0  ;;  %v5225_v5 = vadd.f32 %v4241_v60, %v4047_v62  ;;  %v5227_v6 = vadd.f32 %v4265_v63, %v4061_v0 }
 0x22f   : > { %v4242_v3 = vpop.f32.mrb[2].mxu1  ;;  %v4266_v4 = vpop.f32.mrb[2].mxu0  ;;  %v5233_v11 = vadd.f32 %v4047_v62, %v775_v1  ;;  %v5235_v12 = vadd.f32 %v4061_v0, %v951_v2 }
 0x230   : > { %v5229_v7 = vadd.f32 %v4242_v3, %v4047_v62  ;;  %v5231_v8 = vadd.f32 %v4266_v4, %v4061_v0  ;;  %v778_v9 = vpop.f32.mrb[3].mxu1  ;;  %v954_v10 = vpop.f32.mrb[3].mxu0 }
 0x231   : > { %v5237_v13 = vadd.f32 %v4047_v62, %v778_v9  ;;  %v5239_v14 = vadd.f32 %v4061_v0, %v954_v10 }
 0x232   : > { %v1063_v15 = vpack.c.bf16 %v5229_v7, %v5225_v5  ;;  %v5245_v16 = vpack.i.bf16 %v5229_v7, %v5225_v5  ;;  %v5259_v22 = vpack.i.bf16 %v5231_v8, %v5227_v6  ;;  %v1255_v26 = vpack.c.bf16 %v5231_v8, %v5227_v6 }
 0x233   : > { %v1062_v17 = vpack.c.bf16 %v5237_v13, %v5233_v11  ;;  %v5251_v18 = vpack.i.bf16 %v5237_v13, %v5233_v11  ;;  %v5255_v19 = vpack.i.bf16 %v5239_v14, %v5235_v12  ;;  %v1254_v23 = vpack.c.bf16 %v5239_v14, %v5235_v12 }
 0x235   : > { %v4245_v24 = vpop.f32.mrb[4].mxu1  ;;  %v4269_v25 = vpop.f32.mrb[4].mxu0 }
 0x236   : > { %v791_v27 = vpop.f32.mrb[5].mxu1  ;;  %v967_v30 = vpop.f32.mrb[5].mxu0  ;;  %v5265_v20 = vadd.f32 %v4245_v24, %v4047_v62  ;;  %v5267_v33 = vadd.f32 %v4269_v25, %v4061_v0 }
 0x237   : > { %v4246_v31 = vpop.f32.mrb[6].mxu1  ;;  %v4270_v32 = vpop.f32.mrb[6].mxu0  ;;  %v5273_v40 = vadd.f32 %v4047_v62, %v791_v27  ;;  %v5275_v41 = vadd.f32 %v4061_v0, %v967_v30 }
 0x238   : > { %v5269_v34 = vadd.f32 %v4246_v31, %v4047_v62  ;;  %v5271_v35 = vadd.f32 %v4270_v32, %v4061_v0  ;;  %v794_v36 = vpop.f32.mrb[7].mxu1  ;;  %v970_v37 = vpop.f32.mrb[7].mxu0 }
 0x239   : > { %v795_v42 = vadd.f32 %v4047_v62, %v794_v36  ;;  %v5277_v43 = vadd.f32 %v4061_v0, %v970_v37 }
 0x23a   : > { %v1065_v28 = vpack.c.bf16 %v5269_v34, %v5265_v20  ;;  %v5283_v44 = vpack.i.bf16 %v5269_v34, %v5265_v20  ;;  %v5295_v47 = vpack.i.bf16 %v5271_v35, %v5267_v33 }
 0x23b   : > { %v1064_v45 = vpack.c.bf16 %v795_v42, %v5273_v40  ;;  %v5287_v46 = vpack.i.bf16 %v795_v42, %v5273_v40  ;;  %v5291_v21 = vpack.i.bf16 %v5277_v43, %v5275_v41 }
 0x23d   : > { %v4253_v50 = vpop.f32.mrb[8].mxu1 }
 0x23e   : > { %v863_v38 = vpop.f32.mrb[9].mxu1  ;;  %v872_v54 = vadd.f32 %v4253_v50, %v4054_v51 }
 0x23f   : > { %v4254_v53 = vpop.f32.mrb[10].mxu1  ;;  %v864_v57 = vadd.f32 %v4054_v51, %v863_v38 }
 0x240   : > { %v875_v55 = vadd.f32 %v4254_v53, %v4054_v51  ;;  %v866_v56 = vpop.f32.mrb[11].mxu1 }
 0x241   : > { %v867_v39 = vadd.f32 %v4054_v51, %v866_v56 }
 0x242   : > { %v4532_v48 = vpack.i.bf16 %v875_v55, %v872_v54  ;;  %v1159_v58 = vpack.c.bf16 %v875_v55, %v872_v54 }
 0x243   : > { %v4527_v59 = vpack.i.bf16 %v867_v39, %v864_v57  ;;  %v1158_v61 = vpack.c.bf16 %v867_v39, %v864_v57 }
 0x244   : > { %4533 = vrot.lane.b32.xlu1 %v4532_v48, %s4995_s19  ;;  %v1322_v30 = vsel %vm1270_vm2, %v1159_v58, 0 }
 0x245   : > { %v4257_v60 = vpop.f32.mrb[12].mxu1  ;;  %4528 = vrot.lane.b32.xlu0 %v4527_v59, %s4995_s19  ;;  %v1275_v62 = vsel %vm1270_vm2, %v1158_v61, 0 }
 0x246   : > { %v879_v63 = vpop.f32.mrb[13].mxu1  ;;  %4272 = vmatpush3.bf16.xpose.msra.mxu1 %v1275_v62  ;;  %v888_v1 = vadd.f32 %v4257_v60, %v4054_v51 }
 0x247   : > { %v4258_v0 = vpop.f32.mrb[14].mxu1  ;;  %4277 = vmatprep.subr.bf16.mxu1 %v6367_v49  ;;  %v880_v4 = vadd.f32 %v4054_v51, %v879_v63 }
 0x248   : > { %v891_v2 = vadd.f32 %v4258_v0, %v4054_v51  ;;  %4538 = vrot.lane.b32.xlu1 %v5251_v18, %s4995_s19  ;;  %v882_v3 = vpop.f32.mrb[15].mxu1 }
 0x249   : > { %v883_v9 = vadd.f32 %v4054_v51, %v882_v3  ;;  %4543 = vrot.lane.b32.xlu0 %v5245_v16, %s4995_s19 }
 0x24a   : > { %v4552_v10 = vpack.i.bf16 %v891_v2, %v888_v1  ;;  %v1161_v24 = vpack.c.bf16 %v891_v2, %v888_v1 }
 0x24b   : > { %v4547_v25 = vpack.i.bf16 %v883_v9, %v880_v4  ;;  %v1160_v27 = vpack.c.bf16 %v883_v9, %v880_v4 }
 0x24c   : > { %v1416_v11 = vsel %vm1270_vm2, %v1161_v24, 0 }
 0x24d   : > { %4548 = vrot.lane.b32.xlu1 %v4547_v25, %s4995_s19  ;;  %4274 = vmatmul.mubr.msk.bf16.vlgmr.msra.gmra.mrb[16].mxu1 %vm1270_vm2, %v1062_v17  ;;  %v1369_v31 = vsel %vm1270_vm2, %v1160_v27, 0 }
 0x24e   : > { %4558 = vrot.lane.b32.xlu0 %v5287_v46, %s4995_s19  ;;  %4278 = vmatpush3.bf16.xpose.msra.mxu1 %v1322_v30 }
 0x24f   : > { %4284 = vmatpush3.bf16.xpose.msra.mxu0 %v1369_v31  ;;  %4279 = vmatprep.mubr.msk.bf16.mxu1 %vm4994_vm1, %v6367_v49 }
 0x250   : > { %4289 = vmatprep.subr.bf16.mxu1 %v6367_v49  ;;  %4295 = vmatprep.subr.bf16.mxu0 %v6367_v49 }
 0x251   : > { %4553 = vrot.lane.b32.xlu1 %v4552_v10, %s4995_s19 }
 0x252   : > { %4568 = vrot.lane.b32.xlu0 %v5283_v44, %s4995_s19 }
 0x255   : > { %4563 = vrot.lane.b32.xlu1 %v4527_v59, %s4996_s1  ;;  %4280 = vmatmul.mubr.msk.bf16.vlgmr.msra.gmra.mrb[20].mxu1 %vm1270_vm2, %v1063_v15 }
 0x256   : > { %4578 = vrot.lane.b32.xlu0 %v5251_v18, %s4996_s1  ;;  %4286 = vmatmul.mubr.msk.bf16.vlgmr.msra.gmra.mrb[8].mxu0 %vm1270_vm2, %v1064_v45 }
 0x257   : > { %4290 = vmatpush3.bf16.xpose.msra.mxu1 %v1416_v11  ;;  %4291 = vmatprep.mubr.msk.bf16.mxu1 %vm4994_vm1, %v6367_v49 }
 0x258   : > { %4301 = vmatprep.subr.bf16.mxu1 %v6367_v49  ;;  %4297 = vmatprep.mubr.msk.bf16.mxu0 %vm4994_vm1, %v6367_v49 }
 0x259   : > { %4573 = vrot.lane.b32.xlu1 %v4532_v48, %s4996_s1 }
 0x25a   : > { %4583 = vrot.lane.b32.xlu0 %v5245_v16, %s4996_s1 }
 0x25d   : > { %4588 = vrot.lane.b32.xlu1 %v4547_v25, %s4996_s1 }
 0x25e   : > { %4292 = vmatmul.mubr.msk.bf16.vlgmr.msra.gmra.mrb[24].mxu1 %vm1270_vm2, %v1065_v28  ;;  %4598 = vrot.lane.b32.xlu0 %v5287_v46, %s4996_s1 }
 0x25f   : > { %4303 = vmatprep.mubr.msk.bf16.mxu1 %vm4994_vm1, %v6367_v49 }
 0x261   : > { %4593 = vrot.lane.b32.xlu1 %v4552_v10, %s4996_s1 }
 0x262   : > { %4608 = vrot.lane.b32.xlu0 %v5283_v44, %s4996_s1 }
 0x265   : > { %4603 = vrot.lane.b32.xlu1 %v4527_v59, %s4997_s20 }
 0x266   : > { %4618 = vrot.lane.b32.xlu0 %v5251_v18, %s4997_s20 }
 0x269   : > { %4613 = vrot.lane.b32.xlu1 %v4532_v48, %s4997_s20 }
 0x26a   : > { %4623 = vrot.lane.b32.xlu0 %v5245_v16, %s4997_s20 }
 0x26d   : > { %4628 = vrot.lane.b32.xlu1 %v4547_v25, %s4997_s20 }
 0x26e   : > { %4638 = vrot.lane.b32.xlu0 %v5287_v46, %s4997_s20 }
 0x271   : > { %4633 = vrot.lane.b32.xlu1 %v4552_v10, %s4997_s20 }
 0x272   : > { %4648 = vrot.lane.b32.xlu0 %v5255_v19, %s4995_s19 }
 0x275   : > { %4643 = vrot.lane.b32.xlu1 %v5283_v44, %s4997_s20 }
 0x276   : > { %4658 = vrot.lane.b32.xlu0 %v5291_v21, %s4995_s19 }
 0x279   : > { %4653 = vrot.lane.b32.xlu1 %v5259_v22, %s4995_s19 }
 0x27a   : > { %4668 = vrot.lane.b32.xlu0 %v5255_v19, %s4996_s1 }
 0x27d   : > { %4663 = vrot.lane.b32.xlu1 %v5295_v47, %s4995_s19 }
 0x2b6   : > { %v4534_v5 = vpop.permute.xlu1 %4533 }
 0x2b7   : > { %v4536_v7 = vunpack.i.h.bf16 %v4534_v5  ;;  %v4535_v13 = vunpack.i.l.bf16 %v4534_v5  ;;  %v4529_v15 = vpop.permute.xlu0 %4528 }
 0x2b8   : > { %v4531_v16 = vunpack.i.h.bf16 %v4529_v15  ;;  %v4530_v17 = vunpack.i.l.bf16 %v4529_v15 }
 0x2b9   : > { %v1163_v18 = vpack.c.bf16 %v4536_v7, %v4535_v13 }
 0x2ba   : > { %v4539_v32 = vpop.permute.xlu1 %4538  ;;  %v1162_v20 = vpack.c.bf16 %v4531_v16, %v4530_v17 }
 0x2bb   : > { %v4544_v34 = vpop.permute.xlu0 %4543  ;;  %v1510_v36 = vsel %vm1270_vm2, %v1163_v18, 0  ;;  %v4541_v28 = vunpack.i.h.bf16 %v4539_v32  ;;  %v4540_v44 = vunpack.i.l.bf16 %v4539_v32 }
 0x2bc   : > { %4302 = vmatpush3.bf16.xpose.msra.mxu1 %v1510_v36  ;;  %v1463_v37 = vsel %vm1270_vm2, %v1162_v20, 0  ;;  %v4546_v40 = vunpack.i.h.bf16 %v4544_v34  ;;  %v4545_v42 = vunpack.i.l.bf16 %v4544_v34 }
 0x2bd   : > { %4296 = vmatpush3.bf16.xpose.msra.mxu0 %v1463_v37  ;;  %4313 = vmatprep.subr.bf16.mxu1 %v6367_v49  ;;  %v1066_v53 = vpack.c.bf16 %v4541_v28, %v4540_v44 }
 0x2be   : > { %4307 = vmatprep.subr.bf16.mxu0 %v6367_v49  ;;  %v1067_v38 = vpack.c.bf16 %v4546_v40, %v4545_v42 }
 0x2bf   : > { %v4549_v45 = vpop.permute.xlu1 %4548 }
 0x2c0   : > { %v4551_v46 = vunpack.i.h.bf16 %v4549_v45  ;;  %v4550_v50 = vunpack.i.l.bf16 %v4549_v45  ;;  %v4559_v51 = vpop.permute.xlu0 %4558 }
 0x2c1   : > { %v4561_v58 = vunpack.i.h.bf16 %v4559_v51  ;;  %v4560_v59 = vunpack.i.l.bf16 %v4559_v51 }
 0x2c2   : > { %v1164_v54 = vpack.c.bf16 %v4551_v46, %v4550_v50 }
 0x2c3   : > { %v4554_v55 = vpop.permute.xlu1 %4553  ;;  %4304 = vmatmul.mubr.msk.bf16.vlgmr.msra.gmra.mrb[28].mxu1 %vm1270_vm2, %v1067_v38  ;;  %v1068_v2 = vpack.c.bf16 %v4561_v58, %v4560_v59 }
 0x2c4   : > { %v4556_v56 = vunpack.i.h.bf16 %v4554_v55  ;;  %v4555_v57 = vunpack.i.l.bf16 %v4554_v55  ;;  %v4569_v39 = vpop.permute.xlu0 %4568  ;;  %4298 = vmatmul.mubr.msk.bf16.vlgmr.msra.gmra.mrb[12].mxu0 %vm1270_vm2, %v1066_v53  ;;  %v1557_v48 = vsel %vm1270_vm2, %v1164_v54, 0  ;;  %4315 = vmatprep.mubr.msk.bf16.mxu1 %vm4994_vm1, %v6367_v49 }
 0x2c5   : > { %4308 = vmatpush3.bf16.xpose.msra.mxu0 %v1557_v48  ;;  %4309 = vmatprep.mubr.msk.bf16.mxu0 %vm4994_vm1, %v6367_v49  ;;  %v4571_v3 = vunpack.i.h.bf16 %v4569_v39  ;;  %v4570_v4 = vunpack.i.l.bf16 %v4569_v39 }
 0x2c6   : > { %v1165_v61 = vpack.c.bf16 %v4556_v56, %v4555_v57  ;;  %4319 = vmatprep.subr.bf16.mxu0 %v6367_v49 }
 0x2c7   : > { %v4564_v60 = vpop.permute.xlu1 %4563  ;;  %v1069_v31 = vpack.c.bf16 %v4571_v3, %v4570_v4 }
 0x2c8   : > { %v4566_v62 = vunpack.i.h.bf16 %v4564_v60  ;;  %v4565_v63 = vunpack.i.l.bf16 %v4564_v60  ;;  %v4579_v0 = vpop.permute.xlu0 %4578  ;;  %v1604_v1 = vsel %vm1270_vm2, %v1165_v61, 0 }
 0x2c9   : > { %4314 = vmatpush3.bf16.xpose.msra.mxu1 %v1604_v1  ;;  %v4581_v11 = vunpack.i.h.bf16 %v4579_v0  ;;  %v4580_v5 = vunpack.i.l.bf16 %v4579_v0 }
 0x2ca   : > { %v1166_v9 = vpack.c.bf16 %v4566_v62, %v4565_v63  ;;  %4325 = vmatprep.subr.bf16.mxu1 %v6367_v49 }
 0x2cb   : > { %v4574_v10 = vpop.permute.xlu1 %4573  ;;  %v1070_v32 = vpack.c.bf16 %v4581_v11, %v4580_v5 }
 0x2cc   : > { %v4576_v24 = vunpack.i.h.bf16 %v4574_v10  ;;  %v4575_v25 = vunpack.i.l.bf16 %v4574_v10  ;;  %v4584_v27 = vpop.permute.xlu0 %4583  ;;  %4310 = vmatmul.mubr.msk.bf16.vlgmr.msra.gmra.mrb[16].mxu0 %vm1270_vm2, %v1068_v2  ;;  %v1651_v30 = vsel %vm1270_vm2, %v1166_v9, 0 }
 0x2cd   : > { %4320 = vmatpush3.bf16.xpose.msra.mxu0 %v1651_v30  ;;  %4321 = vmatprep.mubr.msk.bf16.mxu0 %vm4994_vm1, %v6367_v49  ;;  %v4586_v20 = vunpack.i.h.bf16 %v4584_v27  ;;  %v4585_v34 = vunpack.i.l.bf16 %v4584_v27 }
 0x2ce   : > { %v1167_v7 = vpack.c.bf16 %v4576_v24, %v4575_v25  ;;  %4331 = vmatprep.subr.bf16.mxu0 %v6367_v49 }
 0x2cf   : > { %v4589_v13 = vpop.permute.xlu1 %4588  ;;  %v1071_v45 = vpack.c.bf16 %v4586_v20, %v4585_v34 }
 0x2d0   : > { %v4591_v15 = vunpack.i.h.bf16 %v4589_v13  ;;  %v4590_v16 = vunpack.i.l.bf16 %v4589_v13  ;;  %v4599_v17 = vpop.permute.xlu0 %4598  ;;  %4316 = vmatmul.mubr.msk.bf16.vlgmr.msra.gmra.mrb[32].mxu1 %vm1270_vm2, %v1069_v31  ;;  %v1698_v18 = vsel %vm1270_vm2, %v1167_v7, 0 }
 0x2d1   : > { %4326 = vmatpush3.bf16.xpose.msra.mxu1 %v1698_v18  ;;  %4327 = vmatprep.mubr.msk.bf16.mxu1 %vm4994_vm1, %v6367_v49  ;;  %v4601_v46 = vunpack.i.h.bf16 %v4599_v17  ;;  %v4600_v50 = vunpack.i.l.bf16 %v4599_v17 }
 0x2d2   : > { %v1168_v36 = vpack.c.bf16 %v4591_v15, %v4590_v16  ;;  %4337 = vmatprep.subr.bf16.mxu1 %v6367_v49 }
 0x2d3   : > { %v4594_v37 = vpop.permute.xlu1 %4593  ;;  %v1072_v57 = vpack.c.bf16 %v4601_v46, %v4600_v50 }
 0x2d4   : > { %v4596_v40 = vunpack.i.h.bf16 %v4594_v37  ;;  %v4595_v42 = vunpack.i.l.bf16 %v4594_v37  ;;  %v4609_v28 = vpop.permute.xlu0 %4608  ;;  %4322 = vmatmul.mubr.msk.bf16.vlgmr.msra.gmra.mrb[20].mxu0 %vm1270_vm2, %v1070_v32  ;;  %v1745_v44 = vsel %vm1270_vm2, %v1168_v36, 0 }
 0x2d5   : > { %4332 = vmatpush3.bf16.xpose.msra.mxu0 %v1745_v44  ;;  %4333 = vmatprep.mubr.msk.bf16.mxu0 %vm4994_vm1, %v6367_v49  ;;  %v4611_v39 = vunpack.i.h.bf16 %v4609_v28  ;;  %v4610_v48 = vunpack.i.l.bf16 %v4609_v28  ;;  %v2023_v28 = vlaneseq }
 0x2d6   : > { %v1169_v51 = vpack.c.bf16 %v4596_v40, %v4595_v42  ;;  %4343 = vmatprep.subr.bf16.mxu0 %v6367_v49 }
 0x2d7   : > { %v4604_v38 = vpop.permute.xlu1 %4603  ;;  %v1073_v0 = vpack.c.bf16 %v4611_v39, %v4610_v48  ;;  %v5447_v12 = vand.u32 127, %v2023_v28 }
 0x2d8   : > { %v4606_v53 = vunpack.i.h.bf16 %v4604_v38  ;;  %v4605_v54 = vunpack.i.l.bf16 %v4604_v38  ;;  %v4619_v55 = vpop.permute.xlu0 %4618  ;;  %4328 = vmatmul.mubr.msk.bf16.vlgmr.msra.gmra.mrb[36].mxu1 %vm1270_vm2, %v1071_v45  ;;  %v1792_v56 = vsel %vm1270_vm2, %v1169_v51, 0 }
 0x2d9   : > { %4338 = vmatpush3.bf16.xpose.msra.mxu1 %v1792_v56  ;;  %4339 = vmatprep.mubr.msk.bf16.mxu1 %vm4994_vm1, %v6367_v49  ;;  %v4621_v1 = vunpack.i.h.bf16 %v4619_v55  ;;  %v4620_v2 = vunpack.i.l.bf16 %v4619_v55  ;;  %vm2025_vm3 = vcmp.lt.s32.totalorder %v5447_v12, 9 }
 0x2da   : > { %v1170_v58 = vpack.c.bf16 %v4606_v53, %v4605_v54  ;;  %4349 = vmatprep.subr.bf16.mxu1 %v6367_v49 }
 0x2db   : > { %v4614_v59 = vpop.permute.xlu1 %4613  ;;  %v1074_v25 = vpack.c.bf16 %v4621_v1, %v4620_v2 }
 0x2dc   : > { %v4616_v61 = vunpack.i.h.bf16 %v4614_v59  ;;  %v4615_v60 = vunpack.i.l.bf16 %v4614_v59  ;;  %4334 = vmatmul.mubr.msk.bf16.vlgmr.msra.gmra.mrb[24].mxu0 %vm1270_vm2, %v1072_v57  ;;  %v1839_v62 = vsel %vm1270_vm2, %v1170_v58, 0  ;;  %v4624_v63 = vpop.permute.xlu0 %4623 }
 0x2dd   : > { %4344 = vmatpush3.bf16.xpose.msra.mxu0 %v1839_v62  ;;  %4345 = vmatprep.mubr.msk.bf16.mxu0 %vm4994_vm1, %v6367_v49  ;;  %v4626_v27 = vunpack.i.h.bf16 %v4624_v63  ;;  %v4625_v30 = vunpack.i.l.bf16 %v4624_v63 }
 0x2de   : > { %v1171_v3 = vpack.c.bf16 %v4616_v61, %v4615_v60  ;;  %4355 = vmatprep.subr.bf16.mxu0 %v6367_v49 }
 0x2df   : > { %v4629_v4 = vpop.permute.xlu1 %4628  ;;  %v1075_v16 = vpack.c.bf16 %v4626_v27, %v4625_v30 }
 0x2e0   : > { %v4631_v9 = vunpack.i.h.bf16 %v4629_v4  ;;  %v4630_v10 = vunpack.i.l.bf16 %v4629_v4  ;;  %4340 = vmatmul.mubr.msk.bf16.vlgmr.msra.gmra.mrb[40].mxu1 %vm1270_vm2, %v1073_v0  ;;  %v1886_v24 = vsel %vm1270_vm2, %v1171_v3, 0  ;;  %v4639_v11 = vpop.permute.xlu0 %4638 }
 0x2e1   : > { %4350 = vmatpush3.bf16.xpose.msra.mxu1 %v1886_v24  ;;  %4351 = vmatprep.mubr.msk.bf16.mxu1 %vm4994_vm1, %v6367_v49  ;;  %v4641_v17 = vunpack.i.h.bf16 %v4639_v11  ;;  %v4640_v18 = vunpack.i.l.bf16 %v4639_v11 }
 0x2e2   : > { %v1172_v31 = vpack.c.bf16 %v4631_v9, %v4630_v10  ;;  %4361 = vmatprep.subr.bf16.mxu1 %v6367_v49 }
 0x2e3   : > { %v4634_v5 = vpop.permute.xlu1 %4633  ;;  %v1076_v36 = vpack.c.bf16 %v4641_v17, %v4640_v18 }
 0x2e4   : > { %v4636_v7 = vunpack.i.h.bf16 %v4634_v5  ;;  %v4635_v13 = vunpack.i.l.bf16 %v4634_v5  ;;  %4346 = vmatmul.mubr.msk.bf16.vlgmr.msra.gmra.mrb[28].mxu0 %vm1270_vm2, %v1074_v25  ;;  %v1933_v15 = vsel %vm1270_vm2, %v1172_v31, 0 }
 0x2e5   : > { %4356 = vmatpush3.bf16.xpose.msra.mxu0 %v1933_v15  ;;  %4357 = vmatprep.mubr.msk.bf16.mxu0 %vm4994_vm1, %v6367_v49 }
 0x2e6   : > { %v1173_v32 = vpack.c.bf16 %v4636_v7, %v4635_v13  ;;  %4367 = vmatprep.subr.bf16.mxu0 %v6367_v49 }
 0x2e7   : > { %v4644_v20 = vpop.permute.xlu1 %4643 }
 0x2e8   : > { %4352 = vmatmul.mubr.msk.bf16.vlgmr.msra.gmra.mrb[44].mxu1 %vm1270_vm2, %v1075_v16  ;;  %v1980_v34 = vsel %vm1270_vm2, %v1173_v32, 0  ;;  %v4646_v37 = vunpack.i.h.bf16 %v4644_v20  ;;  %v4645_v40 = vunpack.i.l.bf16 %v4644_v20 }
 0x2e9   : > { %4362 = vmatpush3.bf16.xpose.msra.mxu1 %v1980_v34  ;;  %4363 = vmatprep.mubr.msk.bf16.mxu1 %vm4994_vm1, %v6367_v49 }
 0x2ea   : > { %4373 = vmatprep.subr.bf16.mxu1 %v6367_v49  ;;  %v1077_v42 = vpack.c.bf16 %v4646_v37, %v4645_v40 }
 0x2ec   : > { %4358 = vmatmul.mubr.msk.bf16.vlgmr.msra.gmra.mrb[32].mxu0 %vm1270_vm2, %v1076_v36 }
 0x2ed   : > { %4368 = vmatpush3.bf16.msra.mxu0 %v1254_v23  ;;  %4369 = vmatprep.mubr.msk.bf16.mxu0 %vm4994_vm1, %v6367_v49 }
 0x2ee   : > { %4379 = vmatprep.subr.bf16.mxu0 %v6367_v49 }
 0x2f0   : > { %4364 = vmatmul.mubr.msk.bf16.vlgmr.msra.gmra.mrb[48].mxu1 %vm1270_vm2, %v1077_v42 }
 0x2f1   : > { %4374 = vmatpush3.bf16.msra.mxu1 %v1255_v26  ;;  %4375 = vmatprep.mubr.msk.bf16.mxu1 %vm4994_vm1, %v6367_v49 }
 0x2f2   : > { %4385 = vmatprep.subr.bf16.mxu1 %v6367_v49 }
 0x320   : > { %v1311_v14 = vpop.f32.mrb[16].mxu1 }
 0x321   : > { %v5452_v23 = vsel %vm2025_vm3, %v1311_v14, -1e+30  ;;  %v4275_v44 = vpop.f32.mrb[17].mxu1 }
 0x322   : > { %v1314_v45 = vpop.f32.mrb[18].mxu1  ;;  %v2061_v6 = vsel %vm2060_vm4, %v5452_v23, -inf  ;;  %v5522_v44 = vpop.permute.xlu0 %4648 }
 0x323   : > { %v5458_v8 = vsel %vm2025_vm3, %v1314_v45, -1e+30  ;;  %v4276_v26 = vpop.f32.mrb[19].mxu1  ;;  %2062 = vmax.xlane.f32.xlu0 %v2061_v6 }
 0x324   : > { %v2064_v46 = vsel %vm2060_vm4, %v5458_v8, -inf }
 0x325   : > { %2065 = vmax.xlane.f32.xlu1 %v2064_v46 }
 0x328   : > { %v1358_v50 = vpop.f32.mrb[20].mxu1 }
 0x329   : > { %v5464_v51 = vsel %vm2025_vm3, %v1358_v50, -1e+30  ;;  %v1405_v38 = vpop.f32.mrb[8].mxu0  ;;  %v4281_v53 = vpop.f32.mrb[21].mxu1 }
 0x32a   : > { %v4287_v54 = vpop.f32.mrb[9].mxu0  ;;  %v1361_v55 = vpop.f32.mrb[22].mxu1  ;;  %v2067_v56 = vsel %vm2060_vm4, %v5464_v51, -inf  ;;  %v5470_v57 = vsel %vm2025_vm3, %v1405_v38, -1e+30 }
 0x32b   : > { %v1408_v39 = vpop.f32.mrb[10].mxu0  ;;  %v4282_v48 = vpop.f32.mrb[23].mxu1  ;;  %2068 = vmax.xlane.f32.xlu0 %v2067_v56  ;;  %v2073_v60 = vsel %vm2060_vm4, %v5470_v57, -inf  ;;  %v5482_v62 = vsel %vm2025_vm3, %v1361_v55, -1e+30 }
 0x32c   : > { %v5474_v58 = vsel %vm2025_vm3, %v1408_v39, -1e+30  ;;  %v4288_v59 = vpop.f32.mrb[11].mxu0  ;;  %v2070_v1 = vsel %vm2060_vm4, %v5482_v62, -inf }
 0x32d   : > { %v2076_v61 = vsel %vm2060_vm4, %v5474_v58, -inf }
 0x32e   : > { %2077 = vmax.xlane.f32.xlu1 %v2076_v61  ;;  %v5546_v61 = vpop.permute.xlu0 %4658 }
 0x32f   : > { %2074 = vmax.xlane.f32.xlu0 %v2073_v60 }
 0x331   : > { %v1452_v63 = vpop.f32.mrb[24].mxu1 }
 0x332   : > { %v4293_v0 = vpop.f32.mrb[25].mxu1  ;;  %v5488_v2 = vsel %vm2025_vm3, %v1452_v63, -1e+30 }
 0x333   : > { %v1455_v3 = vpop.f32.mrb[26].mxu1  ;;  %2071 = vmax.xlane.f32.xlu0 %v2070_v1  ;;  %v2079_v24 = vsel %vm2060_vm4, %v5488_v2, -inf  ;;  %v5550_v1 = vpop.permute.xlu1 %4653 }
 0x334   : > { %v5492_v4 = vsel %vm2025_vm3, %v1455_v3, -1e+30  ;;  %v4294_v9 = vpop.f32.mrb[27].mxu1 }
 0x335   : > { %v2082_v10 = vsel %vm2060_vm4, %v5492_v4, -inf }
 0x336   : > { %2083 = vmax.xlane.f32.xlu1 %v2082_v10 }
 0x337   : > { %2080 = vmax.xlane.f32.xlu0 %v2079_v24 }
 0x396   : > { %v1546_v25 = vpop.f32.mrb[28].mxu1 }
 0x397   : > { %v5500_v27 = vsel %vm2025_vm3, %v1546_v25, -1e+30  ;;  %v1499_v30 = vpop.f32.mrb[12].mxu0  ;;  %v4305_v31 = vpop.f32.mrb[29].mxu1 }
 0x398   : > { %v4299_v11 = vpop.f32.mrb[13].mxu0  ;;  %v1549_v5 = vpop.f32.mrb[30].mxu1  ;;  %v2091_v7 = vsel %vm2060_vm4, %v5500_v27, -inf  ;;  %v5506_v13 = vsel %vm2025_vm3, %v1499_v30, -1e+30 }
 0x399   : > { %v5510_v15 = vsel %vm2025_vm3, %v1549_v5, -1e+30  ;;  %v4306_v16 = vpop.f32.mrb[31].mxu1  ;;  %2092 = vmax.xlane.f32.xlu0 %v2091_v7  ;;  %v1502_v17 = vpop.f32.mrb[14].mxu0  ;;  %v2085_v34 = vsel %vm2060_vm4, %v5506_v13, -inf }
 0x39a   : > { %v4300_v18 = vpop.f32.mrb[15].mxu0  ;;  %v2094_v32 = vsel %vm2060_vm4, %v5510_v15, -inf  ;;  %v5516_v20 = vsel %vm2025_vm3, %v1502_v17, -1e+30  ;;  %v5568_v7 = vpop.permute.xlu0 %4668 }
 0x39b   : > { %2095 = vmax.xlane.f32.xlu1 %v2094_v32  ;;  %v2088_v36 = vsel %vm2060_vm4, %v5516_v20, -inf  ;;  %6379 = vst [vmem:[#allocation2_spill] sm:$0xff] %v5568_v7 }
 0x39d   : > { %2086 = vmax.xlane.f32.xlu0 %v2085_v34  ;;  %v5576_v34 = vpop.permute.xlu1 %4663 }
 0x39f   : > { %2089 = vmax.xlane.f32.xlu1 %v2088_v36  ;;  %v1593_v37 = vpop.f32.mrb[16].mxu0 }
 0x3a0   : > { %v4311_v40 = vpop.f32.mrb[17].mxu0  ;;  %v5532_v50 = vsel %vm2025_vm3, %v1593_v37, -1e+30 }
 0x3a1   : > { %v1596_v42 = vpop.f32.mrb[18].mxu0  ;;  %v2097_v59 = vsel %vm2060_vm4, %v5532_v50, -inf }
 0x3a2   : > { %v4312_v28 = vpop.f32.mrb[19].mxu0  ;;  %v5542_v56 = vsel %vm2025_vm3, %v1596_v42, -1e+30 }
 0x3a3   : > { %v1640_v14 = vpop.f32.mrb[32].mxu1  ;;  %v2100_v0 = vsel %vm2060_vm4, %v5542_v56, -inf }
 0x3a4   : > { %v5526_v45 = vsel %vm2025_vm3, %v1640_v14, -1e+30  ;;  %v4317_v6 = vpop.f32.mrb[33].mxu1 }
 0x3a5   : > { %v1643_v26 = vpop.f32.mrb[34].mxu1  ;;  %v2103_v46 = vsel %vm2060_vm4, %v5526_v45, -inf }
 0x3a6   : > { %v5536_v38 = vsel %vm2025_vm3, %v1643_v26, -1e+30  ;;  %v4318_v53 = vpop.f32.mrb[35].mxu1  ;;  %2104 = vmax.xlane.f32.xlu0 %v2103_v46 }
 0x3a7   : > { %v1687_v54 = vpop.f32.mrb[20].mxu0  ;;  %v2106_v55 = vsel %vm2060_vm4, %v5536_v38, -inf }
 0x3a8   : > { %2107 = vmax.xlane.f32.xlu1 %v2106_v55  ;;  %v4323_v39 = vpop.f32.mrb[21].mxu0  ;;  %v5560_v25 = vsel %vm2025_vm3, %v1687_v54, -1e+30 }
 0x3a9   : > { %v1690_v48 = vpop.f32.mrb[22].mxu0  ;;  %v2109_v32 = vsel %vm2060_vm4, %v5560_v25, -inf }
 0x3aa   : > { %2098 = vmax.xlane.f32.xlu0 %v2097_v59  ;;  %v4324_v60 = vpop.f32.mrb[23].mxu0  ;;  %v5572_v16 = vsel %vm2025_vm3, %v1690_v48, -1e+30 }
 0x3ab   : > { %v1734_v63 = vpop.f32.mrb[36].mxu1  ;;  %v2112_v40 = vsel %vm2060_vm4, %v5572_v16, -inf }
 0x3ac   : > { %v5554_v3 = vsel %vm2025_vm3, %v1734_v63, -1e+30  ;;  %v4329_v9 = vpop.f32.mrb[37].mxu1  ;;  %2101 = vmax.xlane.f32.xlu1 %v2100_v0 }
 0x3ad   : > { %v1737_v10 = vpop.f32.mrb[38].mxu1  ;;  %v2115_v24 = vsel %vm2060_vm4, %v5554_v3, -inf }
 0x3ae   : > { %v5564_v30 = vsel %vm2025_vm3, %v1737_v10, -1e+30  ;;  %v4330_v31 = vpop.f32.mrb[39].mxu1  ;;  %2116 = vmax.xlane.f32.xlu0 %v2115_v24 }
 0x3af   : > { %v1781_v11 = vpop.f32.mrb[24].mxu0  ;;  %v2118_v5 = vsel %vm2060_vm4, %v5564_v30, -inf }
 0x3b0   : > { %2119 = vmax.xlane.f32.xlu1 %v2118_v5  ;;  %v4335_v17 = vpop.f32.mrb[25].mxu0  ;;  %v2063_v42 = vpop.xlane.xlu0 %2062  ;;  %v5588_v46 = vsel %vm2025_vm3, %v1781_v11, -1e+30 }
 0x3b1   : > { %v1784_v18 = vpop.f32.mrb[26].mxu0  ;;  %v2157_v59 = vsub.f32 %v5452_v23, %v2063_v42  ;;  %v2121_v24 = vsel %vm2060_vm4, %v5588_v46, -inf }
 0x3b2   : > { %2110 = vmax.xlane.f32.xlu0 %v2109_v32  ;;  %v4336_v36 = vpop.f32.mrb[27].mxu0  ;;  %v2066_v53 = vpop.xlane.xlu1 %2065  ;;  %v5599_v60 = vsel %vm2025_vm3, %v1784_v18, -1e+30 }
 0x3b3   : > { %v1828_v37 = vpop.f32.mrb[40].mxu1  ;;  %v2158_v9 = vsub.f32 %v5458_v8, %v2066_v53  ;;  %v2124_v5 = vsel %vm2060_vm4, %v5599_v60, -inf  ;;  %v2189_v23 = vmul.f32 1.442695, %v2157_v59 }
 0x3b4   : > { %v5582_v28 = vsel %vm2025_vm3, %v1828_v37, -1e+30  ;;  %v4341_v14 = vpop.f32.mrb[41].mxu1  ;;  %2113 = vmax.xlane.f32.xlu1 %v2112_v40 }
 0x3b5   : > { %v1831_v6 = vpop.f32.mrb[42].mxu1  ;;  %v2127_v26 = vsel %vm2060_vm4, %v5582_v28, -inf  ;;  %v2191_v8 = vmul.f32 1.442695, %v2158_v9  ;;  %4801 = vpow2.f32 %v2189_v23 }
 0x3b6   : > { %v5592_v54 = vsel %vm2025_vm3, %v1831_v6, -1e+30  ;;  %v4342_v55 = vpop.f32.mrb[43].mxu1  ;;  %2128 = vmax.xlane.f32.xlu0 %v2127_v26 }
 0x3b7   : > { %v1875_v39 = vpop.f32.mrb[28].mxu0  ;;  %v2130_v48 = vsel %vm2060_vm4, %v5592_v54, -inf  ;;  %4803 = vpow2.f32 %v2191_v8 }
 0x3b8   : > { %v2069_v63 = vpop.xlane.xlu0 %2068  ;;  %2131 = vmax.xlane.f32.xlu1 %v2130_v48  ;;  %v4347_v0 = vpop.f32.mrb[29].mxu0  ;;  %v5615_v42 = vsel %vm2025_vm3, %v1875_v39, -1e+30 }
 0x3b9   : > { %v1878_v10 = vpop.f32.mrb[30].mxu0  ;;  %v2159_v17 = vsub.f32 %v5464_v51, %v2069_v63 }
 0x3ba   : > { %2122 = vmax.xlane.f32.xlu0 %v2121_v24  ;;  %v4348_v31 = vpop.f32.mrb[31].mxu0  ;;  %v5625_v48 = vsel %vm2025_vm3, %v1878_v10, -1e+30 }
 0x3bb   : > { %v1922_v11 = vpop.f32.mrb[44].mxu1  ;;  %v2078_v14 = vpop.xlane.xlu1 %2077  ;;  %v2193_v55 = vmul.f32 1.442695, %v2159_v17  ;;  %v2133_v31 = vsel %vm2060_vm4, %v5615_v42, -inf }
 0x3bc   : > { %v5609_v18 = vsel %vm2025_vm3, %v1922_v11, -1e+30  ;;  %v4353_v32 = vpop.f32.mrb[45].mxu1  ;;  %v2075_v36 = vpop.xlane.xlu0 %2074  ;;  %2125 = vmax.xlane.f32.xlu1 %v2124_v5  ;;  %v2162_v0 = vsub.f32 %v5474_v58, %v2078_v14 }
 0x3bd   : > { %v1925_v37 = vpop.f32.mrb[46].mxu1  ;;  %v2139_v40 = vsel %vm2060_vm4, %v5609_v18, -inf  ;;  %v2161_v39 = vsub.f32 %v5470_v57, %v2075_v36  ;;  %v2136_v57 = vsel %vm2060_vm4, %v5625_v48, -inf  ;;  %4805 = vpow2.f32 %v2193_v55 }
 0x3be   : > { %v5619_v51 = vsel %vm2025_vm3, %v1925_v37, -1e+30  ;;  %v4354_v6 = vpop.f32.mrb[47].mxu1  ;;  %2140 = vmax.xlane.f32.xlu0 %v2139_v40  ;;  %v2199_v36 = vmul.f32 1.442695, %v2162_v0 }
 0x3bf   : > { %v1969_v26 = vpop.f32.mrb[32].mxu0  ;;  %v2142_v53 = vsel %vm2060_vm4, %v5619_v51, -inf  ;;  %v2197_v17 = vmul.f32 1.442695, %v2161_v39 }
 0x3c0   : > { %v2072_v59 = vpop.xlane.xlu0 %2071  ;;  %2143 = vmax.xlane.f32.xlu1 %v2142_v53  ;;  %v4359_v63 = vpop.f32.mrb[33].mxu0  ;;  %v5643_v14 = vsel %vm2025_vm3, %v1969_v26, -1e+30 }
 0x3c1   : > { %v2160_v9 = vsub.f32 %v5482_v62, %v2072_v59  ;;  %v1972_v24 = vpop.f32.mrb[34].mxu0  ;;  %v2145_v26 = vsel %vm2060_vm4, %v5643_v14, -inf }
 0x3c2   : > { %2134 = vmax.xlane.f32.xlu0 %v2133_v31  ;;  %v4360_v11 = vpop.f32.mrb[35].mxu0  ;;  %v5654_v39 = vsel %vm2025_vm3, %v1972_v24, -1e+30 }
 0x3c3   : > { %v2195_v5 = vmul.f32 1.442695, %v2160_v9  ;;  %v2084_v23 = vpop.xlane.xlu1 %2083  ;;  %v2016_v10 = vpop.f32.mrb[48].mxu1  ;;  %v2148_v0 = vsel %vm2060_vm4, %v5654_v39, -inf }
 0x3c4   : > { %v5636_v58 = vsel %vm2025_vm3, %v2016_v10, -1e+30  ;;  %v4365_v62 = vpop.f32.mrb[49].mxu1  ;;  %v2081_v32 = vpop.xlane.xlu0 %2080  ;;  %2137 = vmax.xlane.f32.xlu1 %v2136_v57  ;;  %v2164_v6 = vsub.f32 %v5492_v4, %v2084_v23 }
 0x3c5   : > { %v2163_v8 = vsub.f32 %v5488_v2, %v2081_v32  ;;  %v2019_v37 = vpop.f32.mrb[50].mxu1  ;;  %v2151_v40 = vsel %vm2060_vm4, %v5636_v58, -inf  ;;  %4807 = vpow2.f32 %v2195_v5  ;;  %v5658_v4 = vpop.eup %4801 }
 0x3c6   : > { %v5648_v53 = vsel %vm2025_vm3, %v2019_v37, -1e+30  ;;  %v4366_v55 = vpop.f32.mrb[51].mxu1  ;;  %2152 = vmax.xlane.f32.xlu0 %v2151_v40  ;;  %4809 = vpow2.f32 %v2197_v17  ;;  %v2203_v63 = vmul.f32 1.442695, %v2164_v6  ;;  %v5662_v9 = vpop.eup %4803  ;;  %v2253_v12 = vsel %vm2060_vm4, %v5658_v4, 0.0 }
 0x3c7   : > { %v2154_v2 = vsel %vm2060_vm4, %v5648_v53, -inf  ;;  %v2201_v59 = vmul.f32 1.442695, %v2163_v8  ;;  %4811 = vpow2.f32 %v2199_v36  ;;  %v5666_v24 = vpop.eup %4805  ;;  %v2256_v31 = vsel %vm2060_vm4, %v5662_v9, 0.0 }
 0x3c8   : > { %2155 = vmax.xlane.f32.xlu1 %v2154_v2  ;;  %v2259_v5 = vsel %vm2060_vm4, %v5666_v24, 0.0 }
 0x3c9   : > { %4813 = vpow2.f32 %v2201_v59 }
 0x3ca   : > { %2146 = vmax.xlane.f32.xlu0 %v2145_v26  ;;  %4815 = vpow2.f32 %v2203_v63 }
 0x3cc   : > { %2149 = vmax.xlane.f32.xlu1 %v2148_v0 }
 0x3ce   : > { %2254 = vadd.xlane.f32.xlu0 %v2253_v12 }
 0x3cf   : > { %v5670_v11 = vpop.eup %4807 }
 0x3d0   : > { %2257 = vadd.xlane.f32.xlu1 %v2256_v31  ;;  %v5674_v23 = vpop.eup %4809  ;;  %v2262_v10 = vsel %vm2060_vm4, %v5670_v11, 0.0 }
 0x3d1   : > { %v5678_v57 = vpop.eup %4811  ;;  %v2265_v17 = vsel %vm2060_vm4, %v5674_v23, 0.0 }
 0x3d2   : > { %2260 = vadd.xlane.f32.xlu0 %v2259_v5  ;;  %v2268_v32 = vsel %vm2060_vm4, %v5678_v57, 0.0 }
 0x3d3   : > { %v5682_v62 = vpop.eup %4813 }
 0x3d4   : > { %2263 = vadd.xlane.f32.xlu1 %v2262_v10  ;;  %v5686_v36 = vpop.eup %4815  ;;  %v2271_v8 = vsel %vm2060_vm4, %v5682_v62, 0.0 }
 0x3d5   : > { %v2274_v37 = vsel %vm2060_vm4, %v5686_v36, 0.0 }
 0x3d6   : > { %2266 = vadd.xlane.f32.xlu0 %v2265_v17 }
 0x3d8   : > { %2269 = vadd.xlane.f32.xlu1 %v2268_v32 }
 0x3da   : > { %2272 = vadd.xlane.f32.xlu0 %v2271_v8 }
 0x3dc   : > { %2275 = vadd.xlane.f32.xlu1 %v2274_v37 }
 0x426   : > { %v2093_v40 = vpop.xlane.xlu0 %2092 }
 0x427   : > { %v2167_v6 = vsub.f32 %v5500_v27, %v2093_v40 }
 0x428   : > { %v2096_v55 = vpop.xlane.xlu1 %2095 }
 0x429   : > { %v2209_v2 = vmul.f32 1.442695, %v2167_v6  ;;  %v2168_v59 = vsub.f32 %v5510_v15, %v2096_v55 }
 0x42a   : > { %v2087_v26 = vpop.xlane.xlu0 %2086 }
 0x42b   : > { %4817 = vpow2.f32 %v2209_v2  ;;  %v2211_v63 = vmul.f32 1.442695, %v2168_v59  ;;  %v2165_v0 = vsub.f32 %v5506_v13, %v2087_v26 }
 0x42c   : > { %v2090_v12 = vpop.xlane.xlu1 %2089 }
 0x42d   : > { %4819 = vpow2.f32 %v2211_v63  ;;  %v2205_v31 = vmul.f32 1.442695, %v2165_v0  ;;  %v2166_v5 = vsub.f32 %v5516_v20, %v2090_v12 }
 0x42f   : > { %4821 = vpow2.f32 %v2205_v31  ;;  %v2207_v10 = vmul.f32 1.442695, %v2166_v5 }
 0x431   : > { %4823 = vpow2.f32 %v2207_v10 }
 0x433   : > { %v2105_v17 = vpop.xlane.xlu0 %2104 }
 0x434   : > { %v2171_v27 = vsub.f32 %v5526_v45, %v2105_v17 }
 0x435   : > { %v5697_v32 = vpop.eup %4817  ;;  %v2108_v8 = vpop.xlane.xlu1 %2107 }
 0x436   : > { %v2217_v15 = vmul.f32 1.442695, %v2171_v27  ;;  %v2172_v37 = vsub.f32 %v5536_v38, %v2108_v8  ;;  %v2283_v13 = vsel %vm2060_vm4, %v5697_v32, 0.0 }
 0x437   : > { %v5702_v40 = vpop.eup %4819  ;;  %v2099_v6 = vpop.xlane.xlu0 %2098  ;;  %2284 = vadd.xlane.f32.xlu0 %v2283_v13 }
 0x438   : > { %4825 = vpow2.f32 %v2217_v15  ;;  %v2219_v20 = vmul.f32 1.442695, %v2172_v37  ;;  %v2169_v55 = vsub.f32 %v5532_v50, %v2099_v6  ;;  %v2286_v45 = vsel %vm2060_vm4, %v5702_v40, 0.0 }
 0x439   : > { %v5707_v2 = vpop.eup %4821  ;;  %v2102_v59 = vpop.xlane.xlu1 %2101  ;;  %2287 = vadd.xlane.f32.xlu1 %v2286_v45 }
 0x43a   : > { %4827 = vpow2.f32 %v2219_v20  ;;  %v2213_v38 = vmul.f32 1.442695, %v2169_v55  ;;  %v2170_v26 = vsub.f32 %v5542_v56, %v2102_v59  ;;  %v2277_v63 = vsel %vm2060_vm4, %v5707_v2, 0.0 }
 0x43b   : > { %v5712_v0 = vpop.eup %4823  ;;  %v2117_v12 = vpop.xlane.xlu0 %2116  ;;  %2278 = vadd.xlane.f32.xlu0 %v2277_v63 }
 0x43c   : > { %4829 = vpow2.f32 %v2213_v38  ;;  %v2215_v50 = vmul.f32 1.442695, %v2170_v26  ;;  %v2175_v31 = vsub.f32 %v5554_v3, %v2117_v12  ;;  %v2280_v5 = vsel %vm2060_vm4, %v5712_v0, 0.0 }
 0x43d   : > { %v5717_v10 = vpop.xlane.xlu1 %2119  ;;  %2281 = vadd.xlane.f32.xlu1 %v2280_v5 }
 0x43e   : > { %4831 = vpow2.f32 %v2215_v50  ;;  %v2225_v17 = vmul.f32 1.442695, %v2175_v31 }
 0x43f   : > { %v2111_v56 = vpop.xlane.xlu0 %2110 }
 0x440   : > { %4833 = vpow2.f32 %v2225_v17  ;;  %v2173_v27 = vsub.f32 %v5560_v25, %v2111_v56 }
 0x441   : > { %v5720_v8 = vpop.xlane.xlu1 %2113 }
 0x442   : > { %v5722_v15 = vpop.eup %4825  ;;  %v2221_v37 = vmul.f32 1.442695, %v2173_v27 }
 0x443   : > { %v5724_v13 = vpop.xlane.xlu0 %2128  ;;  %v2295_v3 = vsel %vm2060_vm4, %v5722_v15, 0.0 }
 0x444   : > { %v5728_v6 = vpop.eup %4827  ;;  %4835 = vpow2.f32 %v2221_v37  ;;  %2296 = vadd.xlane.f32.xlu0 %v2295_v3 }
 0x445   : > { %6380 = vst [vmem:[#allocation3_spill] sm:$0xff] %v5728_v6  ;;  %v5730_v20 = vpop.xlane.xlu1 %2131  ;;  %v2298_v55 = vsel %vm2060_vm4, %v5728_v6, 0.0 }
 0x446   : > { %v5734_v25 = vpop.eup %4829  ;;  %2299 = vadd.xlane.f32.xlu1 %v2298_v55 }
 0x447   : > { %6381 = vst [vmem:[#allocation4_spill] sm:$0xff] %v5734_v25  ;;  %v5736_v45 = vpop.xlane.xlu0 %2122  ;;  %v2289_v59 = vsel %vm2060_vm4, %v5734_v25, 0.0 }
 0x448   : > { %v5740_v38 = vpop.eup %4831  ;;  %2290 = vadd.xlane.f32.xlu0 %v2289_v59 }
 0x449   : > { %6382 = vst [vmem:[#allocation5_spill] sm:$0xff] %v5740_v38  ;;  %v5742_v26 = vpop.xlane.xlu1 %2125  ;;  %v2292_v63 = vsel %vm2060_vm4, %v5740_v38, 0.0 }
 0x44a   : > { %v5746_v12 = vpop.eup %4833  ;;  %2293 = vadd.xlane.f32.xlu1 %v2292_v63 }
 0x44b   : > { %6383 = vst [vmem:[#allocation6_spill] sm:$0xff] %v5746_v12  ;;  %v5748_v50 = vpop.xlane.xlu0 %2140  ;;  %v2307_v31 = vsel %vm2060_vm4, %v5746_v12, 0.0 }
 0x44c   : > { %2308 = vadd.xlane.f32.xlu0 %v2307_v31 }
 0x44d   : > { %v5752_v5 = vpop.xlane.xlu1 %2143 }
 0x44e   : > { %v5754_v17 = vpop.eup %4835 }
 0x44f   : > { %6384 = vst [vmem:[#allocation7_spill] sm:$0xff] %v5754_v17  ;;  %v5756_v56 = vpop.xlane.xlu0 %2134  ;;  %v2301_v27 = vsel %vm2060_vm4, %v5754_v17, 0.0 }
 0x450   : > { %2302 = vadd.xlane.f32.xlu0 %v2301_v27 }
 0x451   : > { %v5760_v37 = vpop.xlane.xlu1 %2137 }
 0x453   : > { %v5762_v3 = vpop.xlane.xlu0 %2152 }
 0x455   : > { %v5764_v55 = vpop.xlane.xlu1 %2155 }
 0x457   : > { %v5766_v59 = vpop.xlane.xlu0 %2146 }
 0x459   : > { %v5768_v63 = vpop.xlane.xlu1 %2149 }
 0x45b   : > { %v2255_v31 = vpop.xlane.xlu0 %2254  ;;  %4678 = vrot.lane.b32.xlu1 %v5291_v21, %s4996_s1 }
 0x45c   : > { %4837 = vrcp.f32 %v2255_v31 }
 0x45d   : > { %v2258_v29 = vpop.xlane.xlu1 %2257 }
 0x45e   : > { %4839 = vrcp.f32 %v2258_v29 }
 0x45f   : > { %v2261_v49 = vpop.xlane.xlu0 %2260  ;;  %4683 = vrot.lane.b32.xlu1 %v5295_v47, %s4996_s1 }
 0x460   : > { %4841 = vrcp.f32 %v2261_v49 }
 0x461   : > { %v2264_v27 = vpop.xlane.xlu1 %2263 }
 0x462   : > { %4843 = vrcp.f32 %v2264_v27 }
 0x463   : > { %v2267_v52 = vpop.xlane.xlu0 %2266  ;;  %4688 = vrot.lane.b32.xlu1 %v5255_v19, %s4997_s20 }
 0x464   : > { %4845 = vrcp.f32 %v2267_v52 }
 0x465   : > { %v2270_v17 = vpop.xlane.xlu1 %2269 }
 0x466   : > { %4847 = vrcp.f32 %v2270_v17  ;;  %4673 = vrot.lane.b32.xlu0 %v5259_v22, %s4996_s1  ;;  %v4838_v31 = vpop.eup %4837 }
 0x467   : > { %v2273_v12 = vpop.xlane.xlu0 %2272  ;;  %4693 = vrot.lane.b32.xlu1 %v5259_v22, %s4997_s20  ;;  %v2381_v27 = vmul.f32 %v4838_v31, %v5658_v4  ;;  %v2179_v22 = vsub.f32 %v5582_v28, %v5724_v13  ;;  %v6386_v31 = vmov 0.0  }
 0x468   : > { %4849 = vrcp.f32 %v2273_v12  ;;  %v4840_v29 = vpop.eup %4839  ;;  %v6385_v12 = vpack.c.bf16 %v5277_v43, %v5275_v41  ;;  %v6387_v41 = vpack.c.bf16 %v5271_v35, %v5267_v33  ;;  %v2176_v33 = vsub.f32 %v5564_v30, %v5717_v10 }
 0x469   : > { %v2276_v49 = vpop.xlane.xlu1 %2275  ;;  %v2382_v25 = vmul.f32 %v4840_v29, %v5662_v9  ;;  %v2233_v43 = vmul.f32 1.442695, %v2179_v22  ;;  %v2177_v10 = vsub.f32 %v5588_v46, %v5736_v45 }
 0x46a   : > { %v4842_v38 = vpop.eup %4841  ;;  %4851 = vrcp.f32 %v2276_v49  ;;  %v2227_v30 = vmul.f32 1.442695, %v2176_v33 }
 0x46b   : > { %v2413_v52 = vpack.c.bf16 %v2382_v25, %v2381_v27  ;;  %v2383_v17 = vmul.f32 %v4842_v38, %v5666_v24  ;;  %v4651_v24 = vunpack.i.h.bf16 %v5522_v44  ;;  %4853 = vpow2.f32 %v2233_v43 }
 0x46c   : > { %v4844_v19 = vpop.eup %4843 }
 0x46d   : > { %v2384_v7 = vmul.f32 %v4844_v19, %v5670_v11  ;;  %4370 = vmatmul.mubr.msk.bf16.vlgmr.msra.gmra.mrb[36].mxu0 %vm2060_vm4, %v2413_v52  ;;  %v4650_v11 = vunpack.i.l.bf16 %v5522_v44 }
 0x46e   : > { %v4846_v6 = vpop.eup %4845  ;;  %4380 = vmatpush3.bf16.msra.mxu0 %v6385_v12  ;;  %4381 = vmatprep.mubr.msk.bf16.mxu0 %vm4994_vm1, %v6386_v31 }
 0x46f   : > { %v2414_v4 = vpack.c.bf16 %v2384_v7, %v2383_v17  ;;  %4391 = vmatprep.subr.bf16.mxu0 %v6386_v31  ;;  %v2385_v25 = vmul.f32 %v4846_v6, %v5674_v23  ;;  %v2183_v7 = vsub.f32 %v5609_v18, %v5748_v50  ;;  %v4656_v23 = vunpack.i.h.bf16 %v5550_v1 }
 0x470   : > { %v4848_v9 = vpop.eup %4847  ;;  %v1258_v6 = vpack.c.bf16 %v4651_v24, %v4650_v11  ;;  %v2188_v50 = vsub.f32 %v5648_v53, %v5764_v55  ;;  %v2178_v17 = vsub.f32 %v5599_v60, %v5742_v26  ;;  %v2184_v26 = vsub.f32 %v5619_v51, %v5752_v5 }
 0x471   : > { %v2386_v38 = vmul.f32 %v4848_v9, %v5678_v57  ;;  %4376 = vmatmul.mubr.msk.bf16.vlgmr.msra.gmra.mrb[52].mxu1 %vm2060_vm4, %v2414_v4  ;;  %v4655_v57 = vunpack.i.l.bf16 %v5550_v1  ;;  %v2241_v18 = vmul.f32 1.442695, %v2183_v7  ;;  %v2182_v11 = vsub.f32 %v5625_v48, %v5760_v37 }
 0x472   : > { %v4850_v28 = vpop.eup %4849  ;;  %4386 = vmatpush3.bf16.msra.mxu1 %v6387_v41  ;;  %4387 = vmatprep.mubr.msk.bf16.mxu1 %vm4994_vm1, %v6386_v31  ;;  %v2251_v53 = vmul.f32 1.442695, %v2188_v50  ;;  %v2187_v5 = vsub.f32 %v5636_v58, %v5762_v3  ;;  %v2185_v48 = vsub.f32 %v5643_v14, %v5766_v59  ;;  %v2186_v58 = vsub.f32 %v5654_v39, %v5768_v63 }
 0x473   : > { %v2415_v13 = vpack.c.bf16 %v2386_v38, %v2385_v25  ;;  %4397 = vmatprep.subr.bf16.mxu1 %v6386_v31  ;;  %v2387_v35 = vmul.f32 %v4850_v28, %v5682_v62  ;;  %v1259_v1 = vpack.c.bf16 %v4656_v23, %v4655_v57  ;;  %v2174_v62 = vsub.f32 %v5572_v16, %v5720_v8 }
 0x474   : > { %v4852_v44 = vpop.eup %4851  ;;  %4855 = vpow2.f32 %v2241_v18  ;;  %v2180_v16 = vsub.f32 %v5592_v54, %v5730_v20  ;;  %v2229_v8 = vmul.f32 1.442695, %v2177_v10  ;;  %v2231_v54 = vmul.f32 1.442695, %v2178_v17 }
 0x475   : > { %v2388_v29 = vmul.f32 %v4852_v44, %v5686_v36  ;;  %4382 = vmatmul.mubr.msk.bf16.vlgmr.msra.gmra.mrb[40].mxu0 %vm2060_vm4, %v2415_v13  ;;  %4857 = vpow2.f32 %v2227_v30  ;;  %v2223_v36 = vmul.f32 1.442695, %v2174_v62  ;;  %v5826_v55 = vpop.eup %4853  ;;  %v2181_v20 = vsub.f32 %v5615_v42, %v5756_v56 }
 0x476   : > { %4392 = vmatpush3.bf16.msra.mxu0 %v1258_v6  ;;  %4393 = vmatprep.mubr.msk.bf16.mxu0 %vm4994_vm1, %v6386_v31  ;;  %4859 = vpow2.f32 %v2251_v53  ;;  %v2319_v27 = vsel %vm2060_vm4, %v5826_v55, 0.0  ;;  %v2235_v52 = vmul.f32 1.442695, %v2180_v16  ;;  %v2243_v56 = vmul.f32 1.442695, %v2184_v26 }
 0x477   : > { %v2416_v49 = vpack.c.bf16 %v2388_v29, %v2387_v35  ;;  %4403 = vmatprep.subr.bf16.mxu0 %v6386_v31  ;;  %4861 = vpow2.f32 %v2223_v36  ;;  %v2237_v9 = vmul.f32 1.442695, %v2181_v20  ;;  %v2239_v51 = vmul.f32 1.442695, %v2182_v11 }
 0x478   : > { %4863 = vpow2.f32 %v2229_v8  ;;  %v2249_v43 = vmul.f32 1.442695, %v2187_v5  ;;  %v2245_v13 = vmul.f32 1.442695, %v2185_v48  ;;  %v2247_v23 = vmul.f32 1.442695, %v2186_v58 }
 0x479   : > { %4388 = vmatmul.mubr.msk.bf16.vlgmr.msra.gmra.mrb[56].mxu1 %vm2060_vm4, %v2416_v49  ;;  %4865 = vpow2.f32 %v2235_v52  ;;  %v4666_v62 = vunpack.i.h.bf16 %v5576_v34  ;;  %v4665_v53 = vunpack.i.l.bf16 %v5576_v34  ;;  %v4661_v17 = vunpack.i.h.bf16 %v5546_v61  ;;  %v6390_v58 = vld [vmem:[#allocation4_spill] sm:$0xff] }
 0x47a   : > { %4398 = vmatpush3.bf16.msra.mxu1 %v1259_v1  ;;  %4399 = vmatprep.mubr.msk.bf16.mxu1 %vm4994_vm1, %v6386_v31  ;;  %4867 = vpow2.f32 %v2231_v54 }
 0x47b   : > { %4409 = vmatprep.subr.bf16.mxu1 %v6386_v31  ;;  %4869 = vpow2.f32 %v2237_v9  ;;  %v1261_v54 = vpack.c.bf16 %v4666_v62, %v4665_v53 }
 0x47c   : > { %4871 = vpow2.f32 %v2243_v56 }
 0x47d   : > { %4873 = vpow2.f32 %v2239_v51 }
 0x47e   : > { %v5832_v19 = vpop.eup %4855  ;;  %4875 = vpow2.f32 %v2249_v43 }
 0x47f   : > { %v5836_v46 = vpop.eup %4857  ;;  %v2331_v45 = vsel %vm2060_vm4, %v5832_v19, 0.0  ;;  %4877 = vpow2.f32 %v2245_v13 }
 0x480   : > { %v5840_v22 = vpop.eup %4859  ;;  %v2310_v12 = vsel %vm2060_vm4, %v5836_v46, 0.0  ;;  %4879 = vpow2.f32 %v2247_v23  ;;  %v6391_v23 = vld [vmem:[#allocation5_spill] sm:$0xff] }
 0x481   : > { %v5846_v4 = vpop.eup %4861  ;;  %v2346_v60 = vsel %vm2060_vm4, %v5840_v22, 0.0 }
 0x482   : > { %v2304_v24 = vsel %vm2060_vm4, %v5846_v4, 0.0  ;;  %v5854_v42 = vpop.eup %4863 }
 0x483   : > { %v2313_v25 = vsel %vm2060_vm4, %v5854_v42, 0.0  ;;  %v5860_v38 = vpop.eup %4865 }
 0x484   : > { %v2322_v28 = vsel %vm2060_vm4, %v5860_v38, 0.0  ;;  %v5866_v41 = vpop.eup %4867 }
 0x485   : > { %2320 = vadd.xlane.f32.xlu0 %v2319_v27  ;;  %v2316_v37 = vsel %vm2060_vm4, %v5866_v41, 0.0  ;;  %v5872_v7 = vpop.eup %4869 }
 0x486   : > { %v2325_v3 = vsel %vm2060_vm4, %v5872_v7, 0.0  ;;  %v5878_v44 = vpop.eup %4871 }
 0x487   : > { %v2334_v14 = vsel %vm2060_vm4, %v5878_v44, 0.0  ;;  %v5882_v59 = vpop.eup %4873 }
 0x488   : > { %v2328_v39 = vsel %vm2060_vm4, %v5882_v59, 0.0  ;;  %v5888_v63 = vpop.eup %4875 }
 0x489   : > { %2332 = vadd.xlane.f32.xlu0 %v2331_v45  ;;  %v2343_v57 = vsel %vm2060_vm4, %v5888_v63, 0.0  ;;  %v5892_v6 = vpop.eup %4877  ;;  %v4660_v45 = vunpack.i.l.bf16 %v5546_v61 }
 0x48a   : > { %v2337_v33 = vsel %vm2060_vm4, %v5892_v6, 0.0  ;;  %v5896_v35 = vpop.eup %4879 }
 0x48b   : > { %2311 = vadd.xlane.f32.xlu1 %v2310_v12 }
 0x48d   : > { %2347 = vadd.xlane.f32.xlu0 %v2346_v60  ;;  %v1260_v60 = vpack.c.bf16 %v4661_v17, %v4660_v45 }
 0x48f   : > { %2305 = vadd.xlane.f32.xlu1 %v2304_v24  ;;  %v6388_v24 = vld [vmem:[#allocation3_spill] sm:$0xff] }
 0x493   : > { %2314 = vadd.xlane.f32.xlu1 %v2313_v25 }
 0x497   : > { %2323 = vadd.xlane.f32.xlu1 %v2322_v28  ;;  %v6389_v28 = vld [vmem:[#allocation2_spill] sm:$0xff] }
 0x498   : > { %v4671_v43 = vunpack.i.h.bf16 %v6389_v28  ;;  %v4670_v48 = vunpack.i.l.bf16 %v6389_v28 }
 0x49b   : > { %2317 = vadd.xlane.f32.xlu1 %v2316_v37 }
 0x49f   : > { %2326 = vadd.xlane.f32.xlu1 %v2325_v3 }
 0x4a3   : > { %4698 = vrot.lane.b32.xlu0 %v5291_v21, %s4997_s20  ;;  %2335 = vadd.xlane.f32.xlu1 %v2334_v14  ;;  %v2340_v21 = vsel %vm2060_vm4, %v5896_v35, 0.0 }
 0x4a7   : > { %2329 = vadd.xlane.f32.xlu1 %v2328_v39 }
 0x4ab   : > { %2344 = vadd.xlane.f32.xlu1 %v2343_v57  ;;  %v1262_v57 = vpack.c.bf16 %v4671_v43, %v4670_v48 }
 0x4af   : > { %2338 = vadd.xlane.f32.xlu1 %v2337_v33 }
 0x4b3   : > { %2341 = vadd.xlane.f32.xlu1 %v2340_v21 }
 0x4c4   : > { %v2285_v29 = vpop.xlane.xlu0 %2284  ;;  %4703 = vrot.lane.b32.xlu1 %v5295_v47, %s4997_s20 }
 0x4c5   : > { %4881 = vrcp.f32 %v2285_v29 }
 0x4c6   : > { %v2288_v18 = vpop.xlane.xlu1 %2287 }
 0x4c7   : > { %4883 = vrcp.f32 %v2288_v18 }
 0x4c8   : > { %v2279_v50 = vpop.xlane.xlu0 %2278 }
 0x4c9   : > { %4885 = vrcp.f32 %v2279_v50 }
 0x4ca   : > { %v2282_v49 = vpop.xlane.xlu1 %2281 }
 0x4cb   : > { %4887 = vrcp.f32 %v2282_v49 }
 0x4cf   : > { %v4882_v1 = vpop.eup %4881 }
 0x4d0   : > { %v2391_v10 = vmul.f32 %v4882_v1, %v5697_v32 }
 0x4d1   : > { %v4884_v30 = vpop.eup %4883  ;;  %v2297_v36 = vpop.xlane.xlu0 %2296 }
 0x4d2   : > { %v2392_v16 = vmul.f32 %v4884_v30, %v5702_v40  ;;  %4889 = vrcp.f32 %v2297_v36 }
 0x4d3   : > { %v4886_v47 = vpop.eup %4885  ;;  %v2300_v8 = vpop.xlane.xlu1 %2299 }
 0x4d4   : > { %4891 = vrcp.f32 %v2300_v8  ;;  %v2418_v27 = vpack.c.bf16 %v2392_v16, %v2391_v10  ;;  %v2389_v12 = vmul.f32 %v4886_v47, %v5707_v2  ;;  %v6392_v16 = vld [vmem:[#allocation6_spill] sm:$0xff] }
 0x4d5   : > { %v4888_v52 = vpop.eup %4887  ;;  %v2291_v20 = vpop.xlane.xlu0 %2290 }
 0x4d6   : > { %v2390_v34 = vmul.f32 %v4888_v52, %v5712_v0  ;;  %4893 = vrcp.f32 %v2291_v20  ;;  %4400 = vmatmul.mubr.msk.bf16.vlgmr.msra.gmra.mrb[60].mxu1 %vm2060_vm4, %v2418_v27 }
 0x4d7   : > { %4410 = vmatpush3.bf16.msra.mxu1 %v1261_v54  ;;  %v2294_v32 = vpop.xlane.xlu1 %2293  ;;  %4411 = vmatprep.mubr.msk.bf16.mxu1 %vm4994_vm1, %v6386_v31 }
 0x4d8   : > { %4895 = vrcp.f32 %v2294_v32  ;;  %v2417_v40 = vpack.c.bf16 %v2390_v34, %v2389_v12  ;;  %4421 = vmatprep.subr.bf16.mxu1 %v6386_v31  ;;  %v6393_v34 = vld [vmem:[#allocation7_spill] sm:$0xff] }
 0x4d9   : > { %v2309_v61 = vpop.xlane.xlu0 %2308 }
 0x4da   : > { %4394 = vmatmul.mubr.msk.bf16.vlgmr.msra.gmra.mrb[44].mxu0 %vm2060_vm4, %v2417_v40  ;;  %4897 = vrcp.f32 %v2309_v61 }
 0x4db   : > { %4404 = vmatpush3.bf16.msra.mxu0 %v1260_v60  ;;  %4405 = vmatprep.mubr.msk.bf16.mxu0 %vm4994_vm1, %v6386_v31  ;;  %v4679_v33 = vpop.permute.xlu1 %4678 }
 0x4dc   : > { %v4890_v2 = vpop.eup %4889  ;;  %4415 = vmatprep.subr.bf16.mxu0 %v6386_v31  ;;  %v4681_v54 = vunpack.i.h.bf16 %v4679_v33  ;;  %v4680_v20 = vunpack.i.l.bf16 %v4679_v33 }
 0x4dd   : > { %v2303_v0 = vpop.xlane.xlu0 %2302  ;;  %v2395_v9 = vmul.f32 %v4890_v2, %v5722_v15 }
 0x4de   : > { %v4892_v26 = vpop.eup %4891  ;;  %v1264_v61 = vpack.c.bf16 %v4681_v54, %v4680_v20 }
 0x4df   : > { %v2396_v56 = vmul.f32 %v4892_v26, %v6388_v24  ;;  %v4684_v21 = vpop.permute.xlu1 %4683 }
 0x4e0   : > { %v4894_v11 = vpop.eup %4893  ;;  %v4686_v36 = vunpack.i.h.bf16 %v4684_v21  ;;  %v4685_v10 = vunpack.i.l.bf16 %v4684_v21 }
 0x4e1   : > { %v4674_v25 = vpop.permute.xlu0 %4673  ;;  %v2420_v51 = vpack.c.bf16 %v2396_v56, %v2395_v9  ;;  %v2393_v3 = vmul.f32 %v4894_v11, %v6390_v58 }
 0x4e2   : > { %v4896_v5 = vpop.eup %4895  ;;  %v4676_v37 = vunpack.i.h.bf16 %v4674_v25  ;;  %v4675_v13 = vunpack.i.l.bf16 %v4674_v25  ;;  %v1265_v12 = vpack.c.bf16 %v4686_v36, %v4685_v10 }
 0x4e3   : > { %v2394_v14 = vmul.f32 %v4896_v5, %v6391_v23  ;;  %4412 = vmatmul.mubr.msk.bf16.vlgmr.msra.gmra.mrb[64].mxu1 %vm2060_vm4, %v2420_v51  ;;  %v5932_v29 = vpop.permute.xlu1 %4688 }
 0x4e4   : > { %v1263_v39 = vpack.c.bf16 %v4676_v37, %v4675_v13  ;;  %4423 = vmatprep.mubr.msk.bf16.mxu1 %vm4994_vm1, %v6386_v31  ;;  %v4898_v62 = vpop.eup %4897  ;;  %v4691_v43 = vunpack.i.h.bf16 %v5932_v29  ;;  %v4690_v48 = vunpack.i.l.bf16 %v5932_v29 }
 0x4e5   : > { %v2419_v15 = vpack.c.bf16 %v2394_v14, %v2393_v3  ;;  %v2399_v47 = vmul.f32 %v4898_v62, %v6392_v16 }
 0x4e6   : > { %4422 = vmatpush3.bf16.msra.mxu1 %v1263_v39  ;;  %v1266_v23 = vpack.c.bf16 %v4691_v43, %v4690_v48 }
 0x4e7   : > { %4406 = vmatmul.mubr.msk.bf16.vlgmr.msra.gmra.mrb[48].mxu0 %vm2060_vm4, %v2419_v15  ;;  %4433 = vmatprep.subr.bf16.mxu1 %v6386_v31  ;;  %v4694_v18 = vpop.permute.xlu1 %4693 }
 0x4e8   : > { %4416 = vmatpush3.bf16.msra.mxu0 %v1262_v57  ;;  %4417 = vmatprep.mubr.msk.bf16.mxu0 %vm4994_vm1, %v6386_v31  ;;  %v4696_v9 = vunpack.i.h.bf16 %v4694_v18  ;;  %v4695_v24 = vunpack.i.l.bf16 %v4694_v18 }
 0x4e9   : > { %4427 = vmatprep.subr.bf16.mxu0 %v6386_v31 }
 0x4ea   : > { %v1267_v37 = vpack.c.bf16 %v4696_v9, %v4695_v24 }
 0x512   : > { %v2321_v1 = vpop.xlane.xlu0 %2320 }
 0x516   : > { %v2333_v2 = vpop.xlane.xlu0 %2332 }
 0x518   : > { %v2312_v50 = vpop.xlane.xlu1 %2311 }
 0x519   : > { %4899 = vrcp.f32 %v2312_v50 }
 0x51a   : > { %4901 = vrcp.f32 %v2303_v0 }
 0x51c   : > { %v2306_v49 = vpop.xlane.xlu1 %2305 }
 0x51d   : > { %4903 = vrcp.f32 %v2306_v49 }
 0x51e   : > { %4905 = vrcp.f32 %v2321_v1 }
 0x520   : > { %v2315_v30 = vpop.xlane.xlu1 %2314 }
 0x523   : > { %v4900_v53 = vpop.eup %4899 }
 0x524   : > { %v2400_v8 = vmul.f32 %v4900_v53, %v5836_v46  ;;  %v2324_v27 = vpop.xlane.xlu1 %2323  ;;  %v4902_v52 = vpop.eup %4901 }
 0x525   : > { %4907 = vrcp.f32 %v2324_v27  ;;  %v2397_v32 = vmul.f32 %v4902_v52, %v6393_v34 }
 0x526   : > { %v2422_v17 = vpack.c.bf16 %v2400_v8, %v2399_v47  ;;  %4909 = vrcp.f32 %v2315_v30 }
 0x527   : > { %v4904_v45 = vpop.eup %4903 }
 0x528   : > { %v2398_v40 = vmul.f32 %v4904_v45, %v5846_v4  ;;  %4424 = vmatmul.mubr.msk.bf16.vlgmr.msra.gmra.mrb[68].mxu1 %vm2060_vm4, %v2422_v17  ;;  %v2318_v60 = vpop.xlane.xlu1 %2317  ;;  %v4906_v26 = vpop.eup %4905 }
 0x529   : > { %4911 = vrcp.f32 %v2318_v60  ;;  %4434 = vmatpush3.bf16.msra.mxu1 %v1265_v12  ;;  %4435 = vmatprep.mubr.msk.bf16.mxu1 %vm4994_vm1, %v6386_v31  ;;  %v2403_v56 = vmul.f32 %v4906_v26, %v5826_v55  ;;  %v2348_v55 = vpop.xlane.xlu0 %2347 }
 0x52a   : > { %v2421_v46 = vpack.c.bf16 %v2398_v40, %v2397_v32  ;;  %4445 = vmatprep.subr.bf16.mxu1 %v6386_v31  ;;  %4913 = vrcp.f32 %v2333_v2 }
 0x52c   : > { %4418 = vmatmul.mubr.msk.bf16.vlgmr.msra.gmra.mrb[52].mxu0 %vm2060_vm4, %v2421_v46  ;;  %v2327_v0 = vpop.xlane.xlu1 %2326 }
 0x52d   : > { %4428 = vmatpush3.bf16.msra.mxu0 %v1264_v61  ;;  %4429 = vmatprep.mubr.msk.bf16.mxu0 %vm4994_vm1, %v6386_v31  ;;  %v4699_v15 = vpop.permute.xlu0 %4698 }
 0x52e   : > { %4439 = vmatprep.subr.bf16.mxu0 %v6386_v31  ;;  %v4701_v50 = vunpack.i.h.bf16 %v4699_v15  ;;  %v4700_v49 = vunpack.i.l.bf16 %v4699_v15 }
 0x52f   : > { %v4908_v4 = vpop.eup %4907 }
 0x530   : > { %v2404_v11 = vmul.f32 %v4908_v4, %v5860_v38  ;;  %v2336_v25 = vpop.xlane.xlu1 %2335  ;;  %v4910_v51 = vpop.eup %4909  ;;  %v1268_v36 = vpack.c.bf16 %v4701_v50, %v4700_v49 }
 0x531   : > { %4915 = vrcp.f32 %v2336_v25  ;;  %v2401_v13 = vmul.f32 %v4910_v51, %v5854_v42 }
 0x532   : > { %v2424_v5 = vpack.c.bf16 %v2404_v11, %v2403_v56  ;;  %4917 = vrcp.f32 %v2327_v0 }
 0x533   : > { %v4912_v28 = vpop.eup %4911 }
 0x534   : > { %v2402_v58 = vmul.f32 %v4912_v28, %v5866_v41  ;;  %v2330_v3 = vpop.xlane.xlu1 %2329  ;;  %4436 = vmatmul.mubr.msk.bf16.vlgmr.msra.gmra.mrb[72].mxu1 %vm2060_vm4, %v2424_v5  ;;  %v4914_v39 = vpop.eup %4913 }
 0x535   : > { %4919 = vrcp.f32 %v2330_v3  ;;  %4446 = vmatpush3.bf16.msra.mxu1 %v1267_v37  ;;  %4447 = vmatprep.mubr.msk.bf16.mxu1 %vm4994_vm1, %v6386_v31  ;;  %v2407_v41 = vmul.f32 %v4914_v39, %v5832_v19 }
 0x536   : > { %v2423_v38 = vpack.c.bf16 %v2402_v58, %v2401_v13  ;;  %4457 = vmatprep.subr.bf16.mxu1 %v6386_v31 }
 0x538   : > { %v2345_v14 = vpop.xlane.xlu1 %2344  ;;  %4430 = vmatmul.mubr.msk.bf16.vlgmr.msra.gmra.mrb[56].mxu0 %vm2060_vm4, %v2423_v38 }
 0x539   : > { %4440 = vmatpush3.bf16.msra.mxu0 %v1266_v23  ;;  %4441 = vmatprep.mubr.msk.bf16.mxu0 %vm4994_vm1, %v6386_v31  ;;  %4921 = vrcp.f32 %v2345_v14 }
 0x53a   : > { %4451 = vmatprep.subr.bf16.mxu0 %v6386_v31  ;;  %4923 = vrcp.f32 %v2348_v55 }
 0x53b   : > { %v4916_v42 = vpop.eup %4915 }
 0x53c   : > { %v2408_v57 = vmul.f32 %v4916_v42, %v5878_v44  ;;  %v2339_v33 = vpop.xlane.xlu1 %2338  ;;  %v4918_v21 = vpop.eup %4917 }
 0x53d   : > { %4925 = vrcp.f32 %v2339_v33  ;;  %v2405_v1 = vmul.f32 %v4918_v21, %v5872_v7 }
 0x53e   : > { %v2426_v29 = vpack.c.bf16 %v2408_v57, %v2407_v41 }
 0x53f   : > { %v4920_v18 = vpop.eup %4919 }
 0x540   : > { %v2406_v30 = vmul.f32 %v4920_v18, %v5882_v59  ;;  %v2342_v62 = vpop.xlane.xlu1 %2341  ;;  %4448 = vmatmul.mubr.msk.bf16.vlgmr.msra.gmra.mrb[76].mxu1 %vm2060_vm4, %v2426_v29  ;;  %v5965_v19 = vpop.f32.mrb[36].mxu0 }
 0x541   : > { %4927 = vrcp.f32 %v2342_v62  ;;  %4459 = vmatprep.mubr.msk.bf16.mxu1 %vm4994_vm1, %v6386_v31  ;;  %v4371_v44 = vpop.f32.mrb[37].mxu0 }
 0x542   : > { %v2425_v53 = vpack.c.bf16 %v2406_v30, %v2405_v1  ;;  %v5969_v10 = vpop.f32.mrb[38].mxu0 }
 0x543   : > { %v4922_v16 = vpop.eup %4921  ;;  %v4372_v47 = vpop.f32.mrb[39].mxu0 }
 0x544   : > { %v5971_v8 = vpop.f32.mrb[52].mxu1  ;;  %4442 = vmatmul.mubr.msk.bf16.vlgmr.msra.gmra.mrb[60].mxu0 %vm2060_vm4, %v2425_v53  ;;  %v4704_v7 = vpop.permute.xlu1 %4703  ;;  %v2411_v54 = vmul.f32 %v4922_v16, %v5888_v63 }
 0x545   : > { %4452 = vmatpush3.bf16.msra.mxu0 %v1268_v36  ;;  %v4377_v59 = vpop.f32.mrb[53].mxu1  ;;  %4453 = vmatprep.mubr.msk.bf16.mxu0 %vm4994_vm1, %v6386_v31  ;;  %v4924_v27 = vpop.eup %4923  ;;  %v4706_v52 = vunpack.i.h.bf16 %v4704_v7  ;;  %v4705_v17 = vunpack.i.l.bf16 %v4704_v7 }
 0x546   : > { %v5976_v45 = vpop.f32.mrb[54].mxu1  ;;  %v2412_v32 = vmul.f32 %v4924_v27, %v5840_v22 }
 0x547   : > { %v4378_v20 = vpop.f32.mrb[55].mxu1  ;;  %v1269_v12 = vpack.c.bf16 %v4706_v52, %v4705_v17  ;;  %v4926_v34 = vpop.eup %4925  ;;  %v4773_v52 = vld [vmem:[%s6358_s9] sm:$0xff]   ;;  %v4774_v17 = vld [vmem:[%s6358_s9 + $0x8] sm:$0xff]  }
 0x548   : > { %v5980_v40 = vpop.f32.mrb[40].mxu0  ;;  %v2428_v31 = vpack.c.bf16 %v2412_v32, %v2411_v54  ;;  %v2409_v2 = vmul.f32 %v4926_v34, %v5892_v6  ;;  %4463 = vmatprep.subr.bf16.mxu0 %v4773_v52 }
 0x549   : > { %v4383_v60 = vpop.f32.mrb[41].mxu0  ;;  %4458 = vmatpush3.bf16.msra.mxu1 %v1269_v12 }
 0x54a   : > { %v5982_v61 = vpop.f32.mrb[42].mxu0 }
 0x54b   : > { %v4928_v46 = vpop.eup %4927  ;;  %v4384_v26 = vpop.f32.mrb[43].mxu0 }
 0x54c   : > { %v2410_v0 = vmul.f32 %v4928_v46, %v5896_v35  ;;  %v5986_v4 = vpop.f32.mrb[56].mxu1  ;;  %4460 = vmatmul.mubr.msk.bf16.vlgmr.msra.gmra.mrb[80].mxu1 %vm2060_vm4, %v2428_v31 }
 0x54d   : > { %v4389_v63 = vpop.f32.mrb[57].mxu1 }
 0x54e   : > { %v5989_v9 = vpop.f32.mrb[58].mxu1  ;;  %v2427_v22 = vpack.c.bf16 %v2410_v0, %v2409_v2 }
 0x54f   : > { %v4390_v24 = vpop.f32.mrb[59].mxu1 }
 0x550   : > { %4454 = vmatmul.mubr.msk.bf16.vlgmr.msra.gmra.mrb[64].mxu0 %vm2060_vm4, %v2427_v22 }
 0x551   : > { %4464 = vmatpush3.bf16.msra.mxu0 %v4773_v52 }
 0x552   : > { %4465 = vmatprep.subr.bf16.mxu0 %v4774_v17 }
 0x555   : > { %4466 = vmatpush3.bf16.msra.mxu0 %v4774_v17 }
 0x5a9   : > { %v2686_v56 = vpop.f32.mrb[60].mxu1 }
 0x5aa   : > { %v4401_v11 = vpop.f32.mrb[61].mxu1 }
 0x5ab   : > { %v2689_v25 = vpop.f32.mrb[62].mxu1 }
 0x5ac   : > { %v4707_v51 = vpack.i.bf16 %v2689_v25, %v2686_v56  ;;  %v4402_v5 = vpop.f32.mrb[63].mxu1 }
 0x5ad   : > { %v2642_v6 = vpop.f32.mrb[44].mxu0 }
 0x5ae   : > { %4708 = vrot.lane.b32.xlu1 %v4707_v51, %s4998_s21  ;;  %v4395_v35 = vpop.f32.mrb[45].mxu0 }
 0x5af   : > { %v2645_v28 = vpop.f32.mrb[46].mxu0 }
 0x5b0   : > { %v4712_v43 = vpack.i.bf16 %v2645_v28, %v2642_v6  ;;  %v4396_v48 = vpop.f32.mrb[47].mxu0 }
 0x5b2   : > { %4713 = vrot.lane.b32.xlu1 %v4712_v43, %s4998_s21 }
 0x5b6   : > { %v2774_v37 = vpop.f32.mrb[64].mxu1 }
 0x5b7   : > { %v4413_v13 = vpop.f32.mrb[65].mxu1 }
 0x5b8   : > { %v2777_v58 = vpop.f32.mrb[66].mxu1 }
 0x5b9   : > { %v4717_v3 = vpack.i.bf16 %v2777_v58, %v2774_v37  ;;  %v4414_v55 = vpop.f32.mrb[67].mxu1 }
 0x5ba   : > { %v2730_v38 = vpop.f32.mrb[48].mxu0 }
 0x5bb   : > { %4718 = vrot.lane.b32.xlu0 %v4717_v3, %s4998_s21  ;;  %v4407_v23 = vpop.f32.mrb[49].mxu0 }
 0x5bc   : > { %v2733_v14 = vpop.f32.mrb[50].mxu0 }
 0x5bd   : > { %v4722_v39 = vpack.i.bf16 %v2733_v14, %v2730_v38  ;;  %v4408_v42 = vpop.f32.mrb[51].mxu0 }
 0x5bf   : > { %4723 = vrot.lane.b32.xlu1 %v4722_v39, %s4998_s21 }
 0x5fb   : > { %v2862_v41 = vpop.f32.mrb[68].mxu1 }
 0x5fc   : > { %v4425_v15 = vpop.f32.mrb[69].mxu1 }
 0x5fd   : > { %v2865_v57 = vpop.f32.mrb[70].mxu1 }
 0x5fe   : > { %v4727_v33 = vpack.i.bf16 %v2865_v57, %v2862_v41  ;;  %v4426_v21 = vpop.f32.mrb[71].mxu1 }
 0x5ff   : > { %v2818_v29 = vpop.f32.mrb[52].mxu0 }
 0x600   : > { %4728 = vrot.lane.b32.xlu1 %v4727_v33, %s4999_s22  ;;  %v4419_v18 = vpop.f32.mrb[53].mxu0 }
 0x601   : > { %v2821_v50 = vpop.f32.mrb[54].mxu0 }
 0x602   : > { %v4732_v49 = vpack.i.bf16 %v2821_v50, %v2818_v29  ;;  %v4420_v1 = vpop.f32.mrb[55].mxu0 }
 0x604   : > { %4733 = vrot.lane.b32.xlu1 %v4732_v49, %s4999_s22 }
 0x607   : > { %v2950_v30 = vpop.f32.mrb[72].mxu1 }
 0x608   : > { %v4437_v62 = vpop.f32.mrb[73].mxu1 }
 0x609   : > { %v2953_v44 = vpop.f32.mrb[74].mxu1 }
 0x60a   : > { %v4752_v53 = vpack.i.bf16 %v2953_v44, %v2950_v30  ;;  %v4438_v36 = vpop.f32.mrb[75].mxu1 }
 0x60b   : > { %v2906_v16 = vpop.f32.mrb[56].mxu0 }
 0x60c   : > { %v4431_v47 = vpop.f32.mrb[57].mxu0 }
 0x60d   : > { %v2909_v7 = vpop.f32.mrb[58].mxu0 }
 0x60e   : > { %v4747_v59 = vpack.i.bf16 %v2909_v7, %v2906_v16  ;;  %v4432_v27 = vpop.f32.mrb[59].mxu0 }
 0x613   : > { %v3038_v54 = vpop.f32.mrb[76].mxu1 }
 0x614   : > { %v4449_v20 = vpop.f32.mrb[77].mxu1 }
 0x615   : > { %v3041_v12 = vpop.f32.mrb[78].mxu1 }
 0x616   : > { %v4737_v34 = vpack.i.bf16 %v3041_v12, %v3038_v54  ;;  %v4450_v32 = vpop.f32.mrb[79].mxu1 }
 0x617   : > { %v2994_v60 = vpop.f32.mrb[60].mxu0 }
 0x618   : > { %4738 = vrot.lane.b32.xlu0 %v4737_v34, %s5000_s0  ;;  %v4443_v46 = vpop.f32.mrb[61].mxu0 }
 0x619   : > { %v2997_v31 = vpop.f32.mrb[62].mxu0 }
 0x61a   : > { %v4742_v2 = vpack.i.bf16 %v2997_v31, %v2994_v60  ;;  %v4444_v0 = vpop.f32.mrb[63].mxu0 }
 0x61c   : > { %4753 = vrot.lane.b32.xlu0 %v4752_v53, %s4999_s22  ;;  %4743 = vrot.lane.b32.xlu1 %v4742_v2, %s5000_s0 }
 0x61f   : > { %v3126_v26 = vpop.f32.mrb[80].mxu1 }
 0x620   : > { %4748 = vrot.lane.b32.xlu1 %v4747_v59, %s4999_s22  ;;  %v4461_v63 = vpop.f32.mrb[81].mxu1  ;;  %v4709_v35 = vpop.permute.xlu1 %4708 }
 0x621   : > { %v3129_v22 = vpop.f32.mrb[82].mxu1  ;;  %v4711_v37 = vunpack.i.h.bf16 %v4709_v35  ;;  %v4710_v13 = vunpack.i.l.bf16 %v4709_v35 }
 0x622   : > { %v4762_v24 = vpack.i.bf16 %v3129_v22, %v3126_v26  ;;  %v4462_v56 = vpop.f32.mrb[83].mxu1 }
 0x623   : > { %v3082_v11 = vpop.f32.mrb[64].mxu0  ;;  %v3232_v23 = vsel %vm1270_vm2, %v5976_v45, %v4711_v37  ;;  %v3231_v14 = vsel %vm1270_vm2, %v5971_v8, %v4710_v13 }
 0x624   : > { %v4455_v25 = vpop.f32.mrb[65].mxu0  ;;  %4763 = vrot.lane.b32.xlu0 %v4762_v24, %s5000_s0  ;;  %v4714_v28 = vpop.permute.xlu1 %4713 }
 0x625   : > { %v3085_v51 = vpop.f32.mrb[66].mxu0  ;;  %v4716_v42 = vunpack.i.h.bf16 %v4714_v28  ;;  %v4715_v41 = vunpack.i.l.bf16 %v4714_v28 }
 0x626   : > { %v4757_v5 = vpack.i.bf16 %v3085_v51, %v3082_v11  ;;  %v4456_v6 = vpop.f32.mrb[67].mxu0 }
 0x627   : > { %v3230_v8 = vsel %vm1270_vm2, %v5969_v10, %v4716_v42  ;;  %v3229_v30 = vsel %vm1270_vm2, %v5965_v19, %v4715_v41  ;;  %v4979_v42 = vld [vmem:[%s5107_s30 + $0x8] sm:$0xff] }
 0x628   : > { %4758 = vrot.lane.b32.xlu1 %v4757_v5, %s5000_s0 }
 0x62d   : > { %v4719_v58 = vpop.permute.xlu0 %4718 }
 0x62e   : > { %v4721_v27 = vunpack.i.h.bf16 %v4719_v58  ;;  %v4720_v52 = vunpack.i.l.bf16 %v4719_v58 }
 0x630   : > { %v3236_v20 = vsel %vm1270_vm2, %v5989_v9, %v4721_v27  ;;  %v3235_v12 = vsel %vm1270_vm2, %v5986_v4, %v4720_v52  ;;  %v4984_v52 = vld [vmem:[%s5107_s30 + $0x38] sm:$0xff] }
 0x631   : > { %v4724_v43 = vpop.permute.xlu1 %4723 }
 0x632   : > { %v4726_v19 = vunpack.i.h.bf16 %v4724_v43  ;;  %v4725_v34 = vunpack.i.l.bf16 %v4724_v43 }
 0x634   : > { %v3234_v63 = vsel %vm1270_vm2, %v5982_v61, %v4726_v19  ;;  %v3233_v4 = vsel %vm1270_vm2, %v5980_v40, %v4725_v34  ;;  %v4100_v40 = vld [vmem:[%s6359_s10] ss:$0 sm:$0xff] }
 0x672   : > { %v4729_v48 = vpop.permute.xlu1 %4728 }
 0x673   : > { %v4731_v3 = vunpack.i.h.bf16 %v4729_v48  ;;  %v4730_v55 = vunpack.i.l.bf16 %v4729_v48 }
 0x675   : > { %v3240_v33 = vsel %vm2060_vm4, %v3232_v23, %v4731_v3  ;;  %v3239_v21 = vsel %vm2060_vm4, %v3231_v14, %v4730_v55  ;;  %v4977_v55 = vld [vmem:[%s5107_s30] sm:$0xff]  ;;  %v4978_v14 = vld [vmem:[%s5107_s30 + $0x18] sm:$0xff] }
 0x676   : > { %v4734_v38 = vpop.permute.xlu1 %4733 }
 0x677   : > { %v4736_v29 = vunpack.i.h.bf16 %v4734_v38  ;;  %v4735_v18 = vunpack.i.l.bf16 %v4734_v38 }
 0x679   : > { %v3238_v53 = vsel %vm2060_vm4, %v3230_v8, %v4736_v29  ;;  %v3237_v36 = vsel %vm2060_vm4, %v3229_v30, %v4735_v18 }
 0x68a   : > { %v4739_v39 = vpop.permute.xlu0 %4738 }
 0x68b   : > { %v4741_v15 = vunpack.i.h.bf16 %v4739_v39  ;;  %v4740_v57 = vunpack.i.l.bf16 %v4739_v39 }
 0x68d   : > { %v3248_v50 = vsel %vm3245_vm5, %v3239_v21, %v4740_v57  ;;  %v3249_v49 = vsel %vm3245_vm5, %v3240_v33, %v4741_v15  ;;  %v4980_v57 = vld [vmem:[%s5107_s30 + $0x10] sm:$0xff] }
 0x68e   : > { %v3255_v45 = vpack.c.bf16 %v3249_v49, %v3248_v50  ;;  %v4744_v1 = vpop.permute.xlu1 %4743  ;;  %v4754_v7 = vpop.permute.xlu0 %4753 }
 0x68f   : > { %v4746_v62 = vunpack.i.h.bf16 %v4744_v1  ;;  %v4745_v44 = vunpack.i.l.bf16 %v4744_v1  ;;  %v4756_v10 = vunpack.i.h.bf16 %v4754_v7  ;;  %v4755_v17 = vunpack.i.l.bf16 %v4754_v7  ;;  %v4983_v7 = vld [vmem:[%s5107_s30 + $0x28] sm:$0xff] }
 0x691   : > { %v3247_v16 = vsel %vm3245_vm5, %v3238_v53, %v4746_v62  ;;  %v3246_v47 = vsel %vm3245_vm5, %v3237_v36, %v4745_v44  ;;  %v3244_v0 = vsel %vm2060_vm4, %v3236_v20, %v4756_v10  ;;  %v3243_v26 = vsel %vm2060_vm4, %v3235_v12, %v4755_v17  ;;  %v4981_v62 = vld [vmem:[%s5107_s30 + $0x20] sm:$0xff] }
 0x692   : > { %v3254_v59 = vpack.c.bf16 %v3247_v16, %v3246_v47  ;;  %v4749_v54 = vpop.permute.xlu1 %4748  ;;  %v4982_v16 = vld [vmem:[%s5107_s30 + $0x30] sm:$0xff] }
 0x693   : > { %v4751_v60 = vunpack.i.h.bf16 %v4749_v54  ;;  %v4750_v46 = vunpack.i.l.bf16 %v4749_v54 }
 0x694   : > { %4467 = vmatprep.mubr.msk.bf16.mxu0 %vm568_vm0, %v3254_v59 }
 0x695   : > { %4468 = vmatmul.mubr.msk.bf16.vlgmr.msra.gmra.mrb[68].mxu0 %vm568_vm0, %v3255_v45  ;;  %v3242_v51 = vsel %vm2060_vm4, %v3234_v63, %v4751_v60  ;;  %v3241_v5 = vsel %vm2060_vm4, %v3233_v4, %v4750_v46 }
 0x696   : > { %v4764_v32 = vpop.permute.xlu0 %4763 }
 0x697   : > { %v4766_v31 = vunpack.i.h.bf16 %v4764_v32  ;;  %v4765_v2 = vunpack.i.l.bf16 %v4764_v32 }
 0x699   : > { %v3253_v22 = vsel %vm3245_vm5, %v3244_v0, %v4766_v31  ;;  %v3252_v9 = vsel %vm3245_vm5, %v3243_v26, %v4765_v2 }
 0x69a   : > { %v4759_v24 = vpop.permute.xlu1 %4758  ;;  %v3257_v56 = vpack.c.bf16 %v3253_v22, %v3252_v9 }
 0x69b   : > { %v4761_v11 = vunpack.i.h.bf16 %v4759_v24  ;;  %v4760_v25 = vunpack.i.l.bf16 %v4759_v24 }
 0x69d   : > { %v3251_v6 = vsel %vm3245_vm5, %v3242_v51, %v4761_v11  ;;  %v3250_v61 = vsel %vm3245_vm5, %v3241_v5, %v4760_v25 }
 0x69e   : > { %v3256_v35 = vpack.c.bf16 %v3251_v6, %v3250_v61 }
 0x6a0   : > { %4471 = vmatprep.mubr.msk.bf16.mxu0 %vm568_vm0, %v3256_v35 }
 0x6a1   : > { %4472 = vmatmul.mubr.msk.bf16.gmra.mrb[72].mxu0 %vm568_vm0, %v3257_v56 }
 0x768   : > { %v4469_v28 = vpop.f32.mrb[68].mxu0 }
 0x769   : > { %v3327_v43 = vpop.f32.mrb[69].mxu0  ;;  %v3336_v3 = vadd.f32 %v4469_v28, %v4100_v40 }
 0x76a   : > { %v3328_v48 = vadd.f32 %v4100_v40, %v3327_v43  ;;  %v4470_v37 = vpop.f32.mrb[70].mxu0 }
 0x76b   : > { %v3339_v13 = vadd.f32 %v4470_v37, %v4100_v40  ;;  %v3330_v58 = vpop.f32.mrb[71].mxu0  ;;  %v6053_v33 = vadd.f32 %v4980_v57, %v3336_v3 }
 0x76c   : > { %v6042_v38 = vadd.f32 %v4977_v55, %v3328_v48  ;;  %v3331_v23 = vadd.f32 %v4100_v40, %v3330_v58 }
 0x76d   : > { %v6045_v39 = vadd.f32 %v4978_v14, %v3339_v13  ;;  %v3374_v50 = vsel %vm568_vm0, %v6053_v33, 0.0 }
 0x76e   : > { %v6048_v41 = vadd.f32 %v4979_v42, %v3331_v23  ;;  %v3368_v15 = vsel %vm568_vm0, %v6042_v38, 0.0 }
 0x76f   : > { %3369 = vadd.xlane.f32.xlu1 %v3368_v15  ;;  %v3377_v29 = vsel %vm568_vm0, %v6045_v39, 0.0 }
 0x770   : > { %v3371_v21 = vsel %vm568_vm0, %v6048_v41, 0.0 }
 0x771   : > { %3372 = vadd.xlane.f32.xlu0 %v3371_v21 }
 0x773   : > { %3378 = vadd.xlane.f32.xlu1 %v3377_v29 }
 0x774   : > { %v4473_v18 = vpop.f32.mrb[72].mxu0 }
 0x775   : > { %v3343_v49 = vpop.f32.mrb[73].mxu0  ;;  %3375 = vadd.xlane.f32.xlu0 %v3374_v50  ;;  %v3352_v45 = vadd.f32 %v4473_v18, %v4100_v40  ;;  %v4775_v50 = vld [vmem:[%s6362_s13] sm:$0xff]  }
 0x776   : > { %v3344_v1 = vadd.f32 %v4100_v40, %v3343_v49  ;;  %v4474_v8 = vpop.f32.mrb[74].mxu0  ;;  %4475 = vmatprep.subr.bf16.mxu1 %v4775_v50  ;;  %v4776_v49 = vld [vmem:[%s6362_s13 + $0x8] sm:$0xff]  }
 0x777   : > { %v3346_v30 = vpop.f32.mrb[75].mxu0  ;;  %v3355_v53 = vadd.f32 %v4474_v8, %v4100_v40  ;;  %v6065_v47 = vadd.f32 %v4982_v16, %v3352_v45  ;;  %4476 = vmatpush3.bf16.msra.mxu1 %v4775_v50 }
 0x778   : > { %v6062_v44 = vadd.f32 %v4981_v62, %v3344_v1  ;;  %v3347_v36 = vadd.f32 %v4100_v40, %v3346_v30  ;;  %4477 = vmatprep.subr.bf16.mxu1 %v4776_v49 }
 0x779   : > { %v6073_v10 = vadd.f32 %v4984_v52, %v3355_v53  ;;  %v3386_v54 = vsel %vm568_vm0, %v6065_v47, 0.0 }
 0x77a   : > { %v6068_v59 = vadd.f32 %v4983_v7, %v3347_v36  ;;  %v3380_v27 = vsel %vm568_vm0, %v6062_v44, 0.0 }
 0x77b   : > { %3381 = vadd.xlane.f32.xlu0 %v3380_v27  ;;  %v3389_v19 = vsel %vm568_vm0, %v6073_v10, 0.0  ;;  %4478 = vmatpush3.bf16.msra.mxu1 %v4776_v49 }
 0x77c   : > { %v3383_v17 = vsel %vm568_vm0, %v6068_v59, 0.0 }
 0x77d   : > { %3384 = vadd.xlane.f32.xlu1 %v3383_v17 }
 0x77f   : > { %3387 = vadd.xlane.f32.xlu0 %v3386_v54 }
 0x781   : > { %3390 = vadd.xlane.f32.xlu1 %v3389_v19 }
 0x7fc   : > { %v3370_v20 = vpop.xlane.xlu1 %3369 }
 0x7fd   : > { %v3392_v12 = vmul.f32 0.03125, %v3370_v20 }
 0x7fe   : > { %v3373_v34 = vpop.xlane.xlu0 %3372 }
 0x7ff   : > { %v6082_v32 = vsub.f32 %v6042_v38, %v3392_v12  ;;  %v3393_v60 = vmul.f32 0.03125, %v3373_v34  ;;  %v4107_v34 = vld [vmem:[%s6360_s11] ss:$0 sm:$0xff] }
 0x800   : > { %v3379_v46 = vpop.xlane.xlu1 %3378 }
 0x801   : > { %v6085_v31 = vsub.f32 %v6048_v41, %v3393_v60  ;;  %v3395_v2 = vmul.f32 0.03125, %v3379_v46  ;;  %v3408_v0 = vmul.f32 %v6082_v32, %v6082_v32 }
 0x802   : > { %v3376_v26 = vpop.xlane.xlu0 %3375 }
 0x803   : > { %v6090_v63 = vsub.f32 %v6045_v39, %v3395_v2  ;;  %v3394_v22 = vmul.f32 0.03125, %v3376_v26  ;;  %v3416_v9 = vsel %vm568_vm0, %v3408_v0, 0.0  ;;  %v3409_v24 = vmul.f32 %v6085_v31, %v6085_v31 }
 0x804   : > { %3417 = vadd.xlane.f32.xlu0 %v3416_v9 }
 0x805   : > { %v6096_v4 = vsub.f32 %v6053_v33, %v3394_v22  ;;  %v3419_v56 = vsel %vm568_vm0, %v3409_v24, 0.0  ;;  %v3411_v11 = vmul.f32 %v6090_v63, %v6090_v63 }
 0x806   : > { %3420 = vadd.xlane.f32.xlu1 %v3419_v56 }
 0x807   : > { %v3410_v25 = vmul.f32 %v6096_v4, %v6096_v4  ;;  %v3425_v61 = vsel %vm568_vm0, %v3411_v11, 0.0 }
 0x808   : > { %v3382_v51 = vpop.xlane.xlu0 %3381 }
 0x809   : > { %v3396_v5 = vmul.f32 0.03125, %v3382_v51  ;;  %v3422_v6 = vsel %vm568_vm0, %v3410_v25, 0.0 }
 0x80a   : > { %3423 = vadd.xlane.f32.xlu0 %v3422_v6  ;;  %3426 = vadd.xlane.f32.xlu1 %v3425_v61  ;;  %v3385_v35 = vpop.xlane.xlu1 %3384 }
 0x80b   : > { %v6106_v40 = vsub.f32 %v6062_v44, %v3396_v5  ;;  %v3397_v28 = vmul.f32 0.03125, %v3385_v35  ;;  %v4108_v5 = vld [vmem:[%s6361_s12] ss:$0 sm:$0xff] }
 0x80c   : > { %v3388_v43 = vpop.xlane.xlu0 %3387 }
 0x80d   : > { %v6109_v48 = vsub.f32 %v6068_v59, %v3397_v28  ;;  %v3398_v37 = vmul.f32 0.03125, %v3388_v43  ;;  %v3412_v13 = vmul.f32 %v6106_v40, %v6106_v40 }
 0x80e   : > { %v3391_v58 = vpop.xlane.xlu1 %3390 }
 0x80f   : > { %v6114_v3 = vsub.f32 %v6065_v47, %v3398_v37  ;;  %v3399_v55 = vmul.f32 0.03125, %v3391_v58  ;;  %v3428_v23 = vsel %vm568_vm0, %v3412_v13, 0.0  ;;  %v3413_v14 = vmul.f32 %v6109_v48, %v6109_v48 }
 0x810   : > { %3429 = vadd.xlane.f32.xlu0 %v3428_v23 }
 0x811   : > { %v6120_v42 = vsub.f32 %v6073_v10, %v3399_v55  ;;  %v3431_v15 = vsel %vm568_vm0, %v3413_v14, 0.0  ;;  %v3414_v57 = vmul.f32 %v6114_v3, %v6114_v3 }
 0x812   : > { %3432 = vadd.xlane.f32.xlu1 %v3431_v15 }
 0x813   : > { %v3434_v21 = vsel %vm568_vm0, %v3414_v57, 0.0  ;;  %v3415_v29 = vmul.f32 %v6120_v42, %v6120_v42 }
 0x814   : > { %3435 = vadd.xlane.f32.xlu0 %v3434_v21 }
 0x815   : > { %v3437_v18 = vsel %vm568_vm0, %v3415_v29, 0.0 }
 0x816   : > { %3438 = vadd.xlane.f32.xlu1 %v3437_v18 }
 0x891   : > { %v3418_v45 = vpop.xlane.xlu0 %3417 }
 0x892   : > { %v3440_v1 = vmul.f32 0.03125, %v3418_v45 }
 0x893   : > { %v3421_v8 = vpop.xlane.xlu1 %3420 }
 0x894   : > { %v3448_v30 = vadd.f32 1e-05, %v3440_v1  ;;  %v3441_v62 = vmul.f32 0.03125, %v3421_v8 }
 0x896   : > { %4929 = vrsqrt.f32 %v3448_v30  ;;  %v3449_v53 = vadd.f32 1e-05, %v3441_v62 }
 0x897   : > { %v3424_v36 = vpop.xlane.xlu0 %3423  ;;  %v3427_v16 = vpop.xlane.xlu1 %3426 }
 0x898   : > { %4931 = vrsqrt.f32 %v3449_v53  ;;  %v3442_v7 = vmul.f32 0.03125, %v3424_v36  ;;  %v3443_v27 = vmul.f32 0.03125, %v3427_v16 }
 0x89a   : > { %v3450_v52 = vadd.f32 1e-05, %v3442_v7  ;;  %v3451_v17 = vadd.f32 1e-05, %v3443_v27  ;;  %v4779_v7 = vld [vmem:[%s6364_s15 + $0x10] sm:$0xff]   ;;  %v4780_v27 = vld [vmem:[%s6364_s15 + $0x18] sm:$0xff]  }
 0x89c   : > { %4933 = vrsqrt.f32 %v3450_v52  ;;  %v4781_v52 = vld [vmem:[%s6364_s15 + $0x20] sm:$0xff]  }
 0x89d   : > { %4935 = vrsqrt.f32 %v3451_v17  ;;  %v3430_v54 = vpop.xlane.xlu0 %3429  ;;  %v4782_v17 = vld [vmem:[%s6364_s15 + $0x28] sm:$0xff]  }
 0x89e   : > { %v3444_v19 = vmul.f32 0.03125, %v3430_v54  ;;  %v4783_v54 = vld [vmem:[%s6364_s15 + $0x30] sm:$0xff]  }
 0x89f   : > { %v3433_v20 = vpop.xlane.xlu1 %3432 }
 0x8a0   : > { %v4930_v12 = vpop.eup %4929  ;;  %v3452_v60 = vadd.f32 1e-05, %v3444_v19  ;;  %v3445_v46 = vmul.f32 0.03125, %v3433_v20  ;;  %v4784_v19 = vld [vmem:[%s6364_s15 + $0x38] sm:$0xff]   ;;  %v4109_v20 = vld [vmem:[%s6363_s14] ss:$0 sm:$0xff] }
 0x8a1   : > { %v3464_v2 = vmul.f32 %v4930_v12, %v6082_v32  ;;  %v3436_v0 = vpop.xlane.xlu0 %3435 }
 0x8a2   : > { %v4932_v26 = vpop.eup %4931  ;;  %4937 = vrsqrt.f32 %v3452_v60  ;;  %v3453_v22 = vadd.f32 1e-05, %v3445_v46  ;;  %v3446_v9 = vmul.f32 0.03125, %v3436_v0 }
 0x8a3   : > { %v3465_v24 = vmul.f32 %v4932_v26, %v6085_v31  ;;  %v3439_v56 = vpop.xlane.xlu1 %3438  ;;  %v3478_v11 = vmul.f32 %v4107_v34, %v3464_v2 }
 0x8a4   : > { %4939 = vrsqrt.f32 %v3453_v22  ;;  %v3454_v25 = vadd.f32 1e-05, %v3446_v9  ;;  %v3447_v51 = vmul.f32 0.03125, %v3439_v56 }
 0x8a5   : > { %v3479_v6 = vmul.f32 %v4107_v34, %v3465_v24  ;;  %v3492_v43 = vadd.f32 %v4108_v5, %v3478_v11 }
 0x8a6   : > { %v4934_v61 = vpop.eup %4933  ;;  %4941 = vrsqrt.f32 %v3454_v25  ;;  %v3455_v32 = vadd.f32 1e-05, %v3447_v51 }
 0x8a7   : > { %v4936_v35 = vpop.eup %4935  ;;  %v3466_v28 = vmul.f32 %v4934_v61, %v6096_v4  ;;  %v3493_v37 = vadd.f32 %v4108_v5, %v3479_v6 }
 0x8a8   : > { %v3467_v31 = vmul.f32 %v4936_v35, %v6090_v63  ;;  %4943 = vrsqrt.f32 %v3455_v32 }
 0x8a9   : > { %v3480_v13 = vmul.f32 %v4107_v34, %v3466_v28  ;;  %v3500_v58 = vpack.c.bf16 %v3493_v37, %v3492_v43 }
 0x8aa   : > { %v3481_v55 = vmul.f32 %v4107_v34, %v3467_v31 }
 0x8ab   : > { %4479 = vmatprep.mubr.msk.bf16.mxu1 %vm568_vm0, %v3500_v58  ;;  %v3494_v23 = vadd.f32 %v4108_v5, %v3480_v13 }
 0x8ac   : > { %v4938_v14 = vpop.eup %4937  ;;  %v3495_v15 = vadd.f32 %v4108_v5, %v3481_v55 }
 0x8ad   : > { %v3468_v57 = vmul.f32 %v4938_v14, %v6106_v40 }
 0x8ae   : > { %v4940_v21 = vpop.eup %4939  ;;  %v3501_v29 = vpack.c.bf16 %v3495_v15, %v3494_v23 }
 0x8af   : > { %v3469_v18 = vmul.f32 %v4940_v21, %v6109_v48  ;;  %v3482_v4 = vmul.f32 %v4107_v34, %v3468_v57 }
 0x8b0   : > { %v4942_v50 = vpop.eup %4941  ;;  %4480 = vmatmul.mubr.msk.bf16.vlgmr.msra.gmra.mrb[84].mxu1 %vm568_vm0, %v3501_v29 }
 0x8b1   : > { %v3470_v63 = vmul.f32 %v4942_v50, %v6114_v3  ;;  %v3483_v49 = vmul.f32 %v4107_v34, %v3469_v18  ;;  %v3496_v8 = vadd.f32 %v4108_v5, %v3482_v4  ;;  %v4777_v3 = vld [vmem:[%s6364_s15] sm:$0xff]  }
 0x8b2   : > { %v4944_v45 = vpop.eup %4943  ;;  %4487 = vmatprep.subr.bf16.mxu0 %v4777_v3 }
 0x8b3   : > { %v3471_v1 = vmul.f32 %v4944_v45, %v6120_v42  ;;  %v3497_v30 = vadd.f32 %v4108_v5, %v3483_v49  ;;  %v3484_v62 = vmul.f32 %v4107_v34, %v3470_v63  ;;  %4488 = vmatpush3.bf16.msra.mxu0 %v4777_v3  ;;  %v4778_v42 = vld [vmem:[%s6364_s15 + $0x8] sm:$0xff]  }
 0x8b4   : > { %4489 = vmatprep.subr.bf16.mxu0 %v4778_v42 }
 0x8b5   : > { %v3502_v53 = vpack.c.bf16 %v3497_v30, %v3496_v8  ;;  %v3485_v36 = vmul.f32 %v4107_v34, %v3471_v1  ;;  %v3498_v40 = vadd.f32 %v4108_v5, %v3484_v62 }
 0x8b7   : > { %4483 = vmatprep.mubr.msk.bf16.mxu1 %vm568_vm0, %v3502_v53  ;;  %v3499_v16 = vadd.f32 %v4108_v5, %v3485_v36  ;;  %4490 = vmatpush3.bf16.msra.mxu0 %v4778_v42 }
 0x8b8   : > { %4491 = vmatprep.subr.bf16.mxu0 %v4779_v7 }
 0x8b9   : > { %v3503_v48 = vpack.c.bf16 %v3499_v16, %v3498_v40 }
 0x8bb   : > { %4484 = vmatmul.mubr.msk.bf16.gmra.mrb[88].mxu1 %vm568_vm0, %v3503_v48  ;;  %4492 = vmatpush3.bf16.msra.mxu0 %v4779_v7 }
 0x8bc   : > { %4493 = vmatprep.subr.bf16.mxu0 %v4780_v27 }
 0x8bf   : > { %4494 = vmatpush3.bf16.msra.mxu0 %v4780_v27 }
 0x8c0   : > { %4495 = vmatprep.subr.bf16.mxu0 %v4781_v52 }
 0x8c3   : > { %4496 = vmatpush3.bf16.msra.mxu0 %v4781_v52 }
 0x8c4   : > { %4497 = vmatprep.subr.bf16.mxu0 %v4782_v17 }
 0x8c7   : > { %4498 = vmatpush3.bf16.msra.mxu0 %v4782_v17 }
 0x8c8   : > { %4499 = vmatprep.subr.bf16.mxu0 %v4783_v54 }
 0x8cb   : > { %4500 = vmatpush3.bf16.msra.mxu0 %v4783_v54 }
 0x8cc   : > { %4501 = vmatprep.subr.bf16.mxu0 %v4784_v19 }
 0x8cf   : > { %4502 = vmatpush3.bf16.msra.mxu0 %v4784_v19 }
 0x983   : > { %v4481_v12 = vpop.f32.mrb[84].mxu1 }
 0x984   : > { %v6180_v34 = vadd.f32 %v4481_v12, %v4109_v20  ;;  %v3573_v60 = vpop.f32.mrb[85].mxu1 }
 0x985   : > { %v6182_v46 = vadd.f32 %v4109_v20, %v3573_v60  ;;  %v4482_v2 = vpop.f32.mrb[86].mxu1 }
 0x986   : > { %v6185_v0 = vmul.f32 0.70710677, %v6180_v34  ;;  %v6187_v26 = vadd.f32 %v4482_v2, %v4109_v20  ;;  %v3576_v22 = vpop.f32.mrb[87].mxu1 }
 0x987   : > { %v6190_v9 = vmul.f32 0.70710677, %v6182_v46  ;;  %v6192_v24 = vadd.f32 %v4109_v20, %v3576_v22 }
 0x988   : > { %v3622_v56 = vand.u32 2147483647, %v6185_v0  ;;  %v6196_v11 = vmul.f32 0.70710677, %v6187_v26  ;;  %vm3782_vm6 = vcmp.lt.f32.partialorder %v6185_v0, 0.0 }
 0x989   : > { %v3620_v25 = vand.u32 2147483647, %v6190_v9  ;;  %v6200_v51 = vmul.f32 0.70710677, %v6192_v24  ;;  %vm3780_vm7 = vcmp.lt.f32.partialorder %v6190_v9, 0.0 }
 0x98a   : > { %v3630_v5 = vmul.f32 0.3275911, %v3622_v56  ;;  %v3623_v6 = vand.u32 2147483647, %v6196_v11  ;;  %v3734_v18 = vsub.f32 0.0, %v3622_v56  ;;  %vm3783_vm8 = vcmp.lt.f32.partialorder %v6196_v11, 0.0 }
 0x98b   : > { %v3628_v61 = vmul.f32 0.3275911, %v3620_v25  ;;  %v3621_v32 = vand.u32 2147483647, %v6200_v51  ;;  %v3732_v63 = vsub.f32 0.0, %v3620_v25  ;;  %vm3781_vm9 = vcmp.lt.f32.partialorder %v6200_v51, 0.0 }
 0x98c   : > { %v3638_v35 = vadd.f32 1.0, %v3630_v5  ;;  %v3631_v28 = vmul.f32 0.3275911, %v3623_v6  ;;  %v3735_v1 = vsub.f32 0.0, %v3623_v6  ;;  %v3742_v36 = vmul.f32 %v3734_v18, %v3622_v56 }
 0x98d   : > { %v3636_v43 = vadd.f32 1.0, %v3628_v61  ;;  %v3629_v37 = vmul.f32 0.3275911, %v3621_v32  ;;  %v3733_v8 = vsub.f32 0.0, %v3621_v32  ;;  %v3740_v3 = vmul.f32 %v3732_v63, %v3620_v25 }
 0x98e   : > { %4945 = vrcp.f32 %v3638_v35  ;;  %v3639_v31 = vadd.f32 1.0, %v3631_v28  ;;  %v4485_v13 = vpop.f32.mrb[88].mxu1  ;;  %v3743_v17 = vmul.f32 %v3735_v1, %v3623_v6  ;;  %v3752_v22 = vmul.f32 1.442695, %v3742_v36 }
 0x98f   : > { %4947 = vrcp.f32 %v3636_v43  ;;  %v3589_v58 = vpop.f32.mrb[89].mxu1  ;;  %v3637_v55 = vadd.f32 1.0, %v3629_v37  ;;  %v6204_v23 = vadd.f32 %v4485_v13, %v4109_v20  ;;  %v3741_v54 = vmul.f32 %v3733_v8, %v3621_v32 }
 0x990   : > { %v6206_v14 = vadd.f32 %v4109_v20, %v3589_v58  ;;  %v4486_v15 = vpop.f32.mrb[90].mxu1  ;;  %4949 = vrcp.f32 %v3639_v31  ;;  %v6239_v5 = vmul.f32 0.5, %v6180_v34  ;;  %v3748_v6 = vmul.f32 1.442695, %v3740_v3 }
 0x991   : > { %v6208_v57 = vadd.f32 %v4486_v15, %v4109_v20  ;;  %v3592_v21 = vpop.f32.mrb[91].mxu1  ;;  %v6211_v29 = vmul.f32 0.70710677, %v6204_v23  ;;  %4951 = vrcp.f32 %v3637_v55  ;;  %v3754_v43 = vmul.f32 1.442695, %v3743_v17 }
 0x992   : > { %v6214_v4 = vmul.f32 0.70710677, %v6206_v14  ;;  %v6220_v45 = vadd.f32 %v4109_v20, %v3592_v21  ;;  %v3750_v58 = vmul.f32 1.442695, %v3741_v54 }
 0x993   : > { %v6217_v50 = vmul.f32 0.70710677, %v6208_v57  ;;  %v3626_v49 = vand.u32 2147483647, %v6211_v29  ;;  %vm3786_vm10 = vcmp.lt.f32.partialorder %v6211_v29, 0.0  ;;  %v3611_v29 = vmul.f32 0.5, %v6208_v57 }
 0x994   : > { %v3624_v30 = vand.u32 2147483647, %v6214_v4  ;;  %v6227_v7 = vmul.f32 0.70710677, %v6220_v45  ;;  %vm3784_vm12 = vcmp.lt.f32.partialorder %v6214_v4, 0.0  ;;  %v3609_v57 = vmul.f32 0.5, %v6220_v45 }
 0x995   : > { %v3627_v62 = vand.u32 2147483647, %v6217_v50  ;;  %v3634_v53 = vmul.f32 0.3275911, %v3626_v49  ;;  %v3738_v12 = vsub.f32 0.0, %v3626_v49  ;;  %vm3787_vm11 = vcmp.lt.f32.partialorder %v6217_v50, 0.0 }
 0x996   : > { %v3632_v40 = vmul.f32 0.3275911, %v3624_v30  ;;  %v6234_v56 = vand.u32 2147483647, %v6227_v7  ;;  %v3736_v32 = vsub.f32 0.0, %v3624_v30  ;;  %vm3785_vm13 = vcmp.lt.f32.partialorder %v6227_v7, 0.0 }
 0x997   : > { %v3635_v16 = vmul.f32 0.3275911, %v3627_v62  ;;  %v3642_v42 = vadd.f32 1.0, %v3634_v53  ;;  %v3746_v55 = vmul.f32 %v3738_v12, %v3626_v49  ;;  %v3739_v1 = vsub.f32 0.0, %v3627_v62  ;;  %v4116_v4 = vld [vmem:[%s6365_s16] ss:$0 sm:$0xff] }
 0x998   : > { %v6224_v48 = vpop.eup %4945  ;;  %v3640_v19 = vadd.f32 1.0, %v3632_v40  ;;  %v3633_v37 = vmul.f32 0.3275911, %v6234_v56  ;;  %v3744_v63 = vmul.f32 %v3736_v32, %v3624_v30 }
 0x999   : > { %v6229_v27 = vpop.eup %4947  ;;  %v3662_v52 = vmul.f32 1.0614054, %v6224_v48  ;;  %4953 = vrcp.f32 %v3642_v42  ;;  %v3643_v60 = vadd.f32 1.0, %v3635_v16  ;;  %v6251_v16 = vmul.f32 0.5, %v6182_v46 }
 0x99a   : > { %v3660_v20 = vmul.f32 1.0614054, %v6229_v27  ;;  %4955 = vrcp.f32 %v3640_v19  ;;  %v6236_v25 = vpop.eup %4949  ;;  %v3641_v8 = vadd.f32 1.0, %v3633_v37  ;;  %v3760_v3 = vmul.f32 1.442695, %v3746_v55 }
 0x99b   : > { %v3670_v2 = vadd.f32 -1.4531521, %v3662_v52  ;;  %v3663_v28 = vmul.f32 1.0614054, %v6236_v25  ;;  %v6244_v31 = vpop.eup %4951  ;;  %4957 = vrcp.f32 %v3643_v60  ;;  %v3756_v19 = vmul.f32 1.442695, %v3744_v63 }
 0x99c   : > { %v3668_v61 = vadd.f32 -1.4531521, %v3660_v20  ;;  %4959 = vpow2.f32 %v3752_v22  ;;  %v3661_v21 = vmul.f32 1.0614054, %v6244_v31  ;;  %v3747_v20 = vmul.f32 %v3739_v1, %v3627_v62 }
 0x99d   : > { %v3678_v35 = vmul.f32 %v6224_v48, %v3670_v2  ;;  %v3671_v34 = vadd.f32 -1.4531521, %v3663_v28  ;;  %4961 = vpow2.f32 %v3748_v6  ;;  %v6264_v6 = vmul.f32 0.5, %v6187_v26 }
 0x99e   : > { %v3676_v13 = vmul.f32 %v6229_v27, %v3668_v61  ;;  %v3669_v40 = vadd.f32 -1.4531521, %v3661_v21  ;;  %4963 = vrcp.f32 %v3641_v8  ;;  %v3762_v55 = vmul.f32 1.442695, %v3747_v20 }
 0x99f   : > { %v3686_v15 = vadd.f32 1.4214138, %v3678_v35  ;;  %v3679_v36 = vmul.f32 %v6236_v25, %v3671_v34  ;;  %4965 = vpow2.f32 %v3754_v43 }
 0x9a0   : > { %v3684_v18 = vadd.f32 1.4214138, %v3676_v13  ;;  %v3677_v30 = vmul.f32 %v6244_v31, %v3669_v40  ;;  %4967 = vpow2.f32 %v3750_v58 }
 0x9a1   : > { %v3694_v53 = vmul.f32 %v6224_v48, %v3686_v15  ;;  %v3687_v52 = vadd.f32 1.4214138, %v3679_v36  ;;  %4969 = vpow2.f32 %v3760_v3 }
 0x9a2   : > { %v3692_v49 = vmul.f32 %v6229_v27, %v3684_v18  ;;  %v3685_v2 = vadd.f32 1.4214138, %v3677_v30  ;;  %4971 = vpow2.f32 %v3756_v19 }
 0x9a3   : > { %v3702_v42 = vadd.f32 -0.28449672, %v3694_v53  ;;  %v6255_v17 = vpop.eup %4953  ;;  %v3695_v60 = vmul.f32 %v6236_v25, %v3687_v52  ;;  %v3737_v53 = vsub.f32 0.0, %v6234_v56  ;;  %4973 = vpow2.f32 %v3762_v55 }
 0x9a4   : > { %v3700_v54 = vadd.f32 -0.28449672, %v3692_v49  ;;  %v6257_v12 = vpop.eup %4955  ;;  %v3666_v22 = vmul.f32 1.0614054, %v6255_v17  ;;  %v3693_v62 = vmul.f32 %v6244_v31, %v3685_v2 }
 0x9a5   : > { %v3710_v46 = vmul.f32 %v6224_v48, %v3702_v42  ;;  %v3664_v32 = vmul.f32 1.0614054, %v6257_v12  ;;  %v3703_v28 = vadd.f32 -0.28449672, %v3695_v60  ;;  %v6268_v37 = vpop.eup %4957 }
 0x9a6   : > { %v3708_v61 = vmul.f32 %v6229_v27, %v3700_v54  ;;  %v3674_v43 = vadd.f32 -1.4531521, %v3666_v22  ;;  %v4960_v15 = vpop.eup %4959  ;;  %v3701_v21 = vadd.f32 -0.28449672, %v3693_v62  ;;  %v3667_v8 = vmul.f32 1.0614054, %v6268_v37 }
 0x9a7   : > { %v3718_v35 = vadd.f32 0.2548296, %v3710_v46  ;;  %v3672_v58 = vadd.f32 -1.4531521, %v3664_v32  ;;  %v3711_v34 = vmul.f32 %v6236_v25, %v3703_v28  ;;  %v4962_v36 = vpop.eup %4961 }
 0x9a8   : > { %v3716_v13 = vadd.f32 0.2548296, %v3708_v61  ;;  %v3682_v18 = vmul.f32 %v6255_v17, %v3674_v43  ;;  %v6280_v42 = vpop.eup %4963  ;;  %v3675_v30 = vadd.f32 -1.4531521, %v3667_v8 }
 0x9a9   : > { %v3726_v26 = vmul.f32 %v6224_v48, %v3718_v35  ;;  %v3680_v1 = vmul.f32 %v6257_v12, %v3672_v58  ;;  %v3719_v49 = vadd.f32 0.2548296, %v3711_v34  ;;  %v3709_v48 = vmul.f32 %v6244_v31, %v3701_v21  ;;  %v4966_v54 = vpop.eup %4965 }
 0x9aa   : > { %v3724_v63 = vmul.f32 %v6229_v27, %v3716_v13  ;;  %v3690_v3 = vadd.f32 1.4214138, %v3682_v18  ;;  %v4968_v2 = vpop.eup %4967  ;;  %v3683_v32 = vmul.f32 %v6268_v37, %v3675_v30  ;;  %v3665_v35 = vmul.f32 1.0614054, %v6280_v42 }
 0x9ab   : > { %v3766_v40 = vmul.f32 %v4960_v15, %v3726_v26  ;;  %v3688_v27 = vadd.f32 1.4214138, %v3680_v1  ;;  %v3727_v20 = vmul.f32 %v6236_v25, %v3719_v49  ;;  %v3717_v46 = vadd.f32 0.2548296, %v3709_v48  ;;  %v4970_v58 = vpop.eup %4969 }
 0x9ac   : > { %v3764_v52 = vmul.f32 %v4962_v36, %v3724_v63  ;;  %v3698_v60 = vmul.f32 %v6255_v17, %v3690_v3  ;;  %v3691_v25 = vadd.f32 1.4214138, %v3683_v32  ;;  %v3745_v26 = vmul.f32 %v3737_v53, %v6234_v56  ;;  %v4972_v1 = vpop.eup %4971 }
 0x9ad   : > { %v3774_v19 = vsub.f32 1.0, %v3766_v40  ;;  %v3696_v61 = vmul.f32 %v6257_v12, %v3688_v27  ;;  %v3767_v62 = vmul.f32 %v4966_v54, %v3727_v20  ;;  %v3725_v43 = vmul.f32 %v6244_v31, %v3717_v46 }
 0x9ae   : > { %v3772_v22 = vsub.f32 1.0, %v3764_v52  ;;  %v3706_v13 = vadd.f32 -0.28449672, %v3698_v60  ;;  %v3699_v36 = vmul.f32 %v6268_v37, %v3691_v25  ;;  %v3673_v3 = vadd.f32 -1.4531521, %v3665_v35 }
 0x9af   : > { %v3790_v28 = vsub.f32 0.0, %v3774_v19  ;;  %v3704_v15 = vadd.f32 -0.28449672, %v3696_v61  ;;  %v3775_v21 = vsub.f32 1.0, %v3767_v62  ;;  %v3765_v18 = vmul.f32 %v4968_v2, %v3725_v43 }
 0x9b0   : > { %v3788_v55 = vsub.f32 0.0, %v3772_v22  ;;  %v3714_v63 = vmul.f32 %v6255_v17, %v3706_v13  ;;  %v3707_v48 = vadd.f32 -0.28449672, %v3699_v36  ;;  %v3758_v54 = vmul.f32 1.442695, %v3745_v26 }
 0x9b1   : > { %v3798_v34 = vsel %vm3782_vm6, %v3790_v28, %v3774_v19  ;;  %v3712_v31 = vmul.f32 %v6257_v12, %v3704_v15  ;;  %v3791_v49 = vsub.f32 0.0, %v3775_v21  ;;  %v3773_v56 = vsub.f32 1.0, %v3765_v18  ;;  %v4974_v19 = vpop.eup %4973 }
 0x9b2   : > { %v3806_v8 = vadd.f32 1.0, %v3798_v34  ;;  %v3796_v40 = vsel %vm3780_vm7, %v3788_v55, %v3772_v22  ;;  %v3722_v53 = vadd.f32 0.2548296, %v3714_v63  ;;  %v3715_v60 = vmul.f32 %v6268_v37, %v3707_v48 }
 0x9b3   : > { %v3720_v0 = vadd.f32 0.2548296, %v3712_v31  ;;  %v3799_v52 = vsel %vm3783_vm8, %v3791_v49, %v3775_v21  ;;  %v3789_v27 = vsub.f32 0.0, %v3773_v56  ;;  %v3804_v20 = vadd.f32 1.0, %v3796_v40 }
 0x9b4   : > { %v3730_v30 = vmul.f32 %v6255_v17, %v3722_v53  ;;  %v3807_v46 = vadd.f32 1.0, %v3799_v52  ;;  %v3681_v9 = vmul.f32 %v6280_v42, %v3673_v3  ;;  %v3605_v2 = vmul.f32 0.5, %v6192_v24 }
 0x9b5   : > { %v3797_v22 = vsel %vm3781_vm9, %v3789_v27, %v3773_v56  ;;  %v3728_v11 = vmul.f32 %v6257_v12, %v3720_v0  ;;  %v3814_v32 = vmul.f32 %v3806_v8, %v6239_v5  ;;  %v3723_v28 = vadd.f32 0.2548296, %v3715_v60 }
 0x9b6   : > { %v3770_v61 = vmul.f32 %v4970_v58, %v3730_v30  ;;  %v3815_v17 = vmul.f32 %v3807_v46, %v6264_v6  ;;  %v3805_v35 = vadd.f32 1.0, %v3797_v22  ;;  %v3689_v43 = vadd.f32 1.4214138, %v3681_v9 }
 0x9b7   : > { %4975 = vpow2.f32 %v3758_v54  ;;  %v3812_v13 = vmul.f32 %v3804_v20, %v6251_v16  ;;  %v3731_v24 = vmul.f32 %v6268_v37, %v3723_v28  ;;  %v3768_v25 = vmul.f32 %v4972_v1, %v3728_v11 }
 0x9b8   : > { %v3778_v62 = vsub.f32 1.0, %v3770_v61  ;;  %v3821_v55 = vpack.c.bf16 %v3815_v17, %v3814_v32  ;;  %v3813_v15 = vmul.f32 %v3805_v35, %v3605_v2  ;;  %v3697_v58 = vmul.f32 %v6280_v42, %v3689_v43 }
 0x9b9   : > { %v3771_v12 = vmul.f32 %v4974_v19, %v3731_v24  ;;  %v3776_v21 = vsub.f32 1.0, %v3768_v25  ;;  %v3610_v1 = vmul.f32 0.5, %v6204_v23  ;;  %v3608_v30 = vmul.f32 0.5, %v6206_v14 }
 0x9ba   : > { %v3794_v51 = vsub.f32 0.0, %v3778_v62  ;;  %v3820_v26 = vpack.c.bf16 %v3813_v15, %v3812_v13  ;;  %v3705_v5 = vadd.f32 -0.28449672, %v3697_v58 }
 0x9bb   : > { %v3779_v34 = vsub.f32 1.0, %v3771_v12  ;;  %v3792_v36 = vsub.f32 0.0, %v3776_v21 }
 0x9bc   : > { %v3802_v6 = vsel %vm3786_vm10, %v3794_v51, %v3778_v62  ;;  %4503 = vmatprep.mubr.bf16.mxu0 %v3820_v26  ;;  %v3713_v18 = vmul.f32 %v6280_v42, %v3705_v5 }
 0x9bd   : > { %4504 = vmatmul.mubr.bf16.vlgmr.msra.gmra.mrb[76].mxu0 %v3821_v55  ;;  %v3795_v16 = vsub.f32 0.0, %v3779_v34  ;;  %v3810_v63 = vadd.f32 1.0, %v3802_v6  ;;  %v3800_v48 = vsel %vm3784_vm12, %v3792_v36, %v3776_v21 }
 0x9be   : > { %v3721_v37 = vadd.f32 0.2548296, %v3713_v18  ;;  %v3808_v27 = vadd.f32 1.0, %v3800_v48 }
 0x9bf   : > { %v3803_v8 = vsel %vm3787_vm11, %v3795_v16, %v3779_v34  ;;  %v3818_v56 = vmul.f32 %v3810_v63, %v3610_v1 }
 0x9c0   : > { %v3811_v40 = vadd.f32 1.0, %v3803_v8  ;;  %v3729_v49 = vmul.f32 %v6280_v42, %v3721_v37  ;;  %v3816_v42 = vmul.f32 %v3808_v27, %v3608_v30 }
 0x9c1   : > { %v4976_v31 = vpop.eup %4975 }
 0x9c2   : > { %v3819_v53 = vmul.f32 %v3811_v40, %v3611_v29  ;;  %v3769_v0 = vmul.f32 %v4976_v31, %v3729_v49 }
 0x9c4   : > { %v3777_v3 = vsub.f32 1.0, %v3769_v0  ;;  %v3823_v52 = vpack.c.bf16 %v3819_v53, %v3818_v56 }
 0x9c6   : > { %v3793_v50 = vsub.f32 0.0, %v3777_v3 }
 0x9c8   : > { %v3801_v23 = vsel %vm3785_vm13, %v3793_v50, %v3777_v3 }
 0x9c9   : > { %v3809_v54 = vadd.f32 1.0, %v3801_v23 }
 0x9cb   : > { %v3817_v19 = vmul.f32 %v3809_v54, %v3609_v57 }
 0x9cd   : > { %v3822_v20 = vpack.c.bf16 %v3817_v19, %v3816_v42 }
 0x9cf   : > { %4507 = vmatprep.mubr.bf16.mxu0 %v3822_v20 }
 0x9d0   : > { %4508 = vmatmul.mubr.bf16.gmra.mrb[80].mxu0 %v3823_v52 }
 0xa90   : > { %v4505_v46 = vpop.f32.mrb[76].mxu0 }
 0xa91   : > { %v3938_v60 = vadd.f32 %v4505_v46, %v4116_v4  ;;  %v3929_v9 = vpop.f32.mrb[77].mxu0 }
 0xa92   : > { %v3930_v7 = vadd.f32 %v4116_v4, %v3929_v9  ;;  %v4506_v2 = vpop.f32.mrb[78].mxu0 }
 0xa93   : > { %v3941_v14 = vadd.f32 %v4506_v2, %v4116_v4  ;;  %v3932_v45 = vpop.f32.mrb[79].mxu0  ;;  %v3962_v11 = vadd.f32 %v3938_v60, %v6053_v33 }
 0xa94   : > { %v3960_v22 = vadd.f32 %v3930_v7, %v6042_v38  ;;  %v3933_v61 = vadd.f32 %v4116_v4, %v3932_v45 }
 0xa95   : > { %3970 = vst.msk [vmem:[%s555_s25 + $0x10] sm:$0xff] %vm568_vm0, %v3962_v11  ;;  %v3963_v17 = vadd.f32 %v3941_v14, %v6045_v39 }
 0xa96   : > { %3968 = vst.msk [vmem:[%s555_s25] sm:$0xff] %vm568_vm0, %v3960_v22  ;;  %v3961_v32 = vadd.f32 %v3933_v61, %v6048_v41 }
 0xa97   : > { %3971 = vst.msk [vmem:[%s555_s25 + $0x18] sm:$0xff] %vm568_vm0, %v3963_v17 }
 0xa98   : > { %3969 = vst.msk [vmem:[%s555_s25 + $0x8] sm:$0xff] %vm568_vm0, %v3961_v32 }
 0xaa3   : > { %v4509_v35 = vpop.f32.mrb[80].mxu0 }
 0xaa4   : > { %v3954_v28 = vadd.f32 %v4509_v35, %v4116_v4  ;;  %v3945_v62 = vpop.f32.mrb[81].mxu0 }
 0xaa5   : > { %v3946_v43 = vadd.f32 %v4116_v4, %v3945_v62  ;;  %v4510_v38 = vpop.f32.mrb[82].mxu0 }
 0xaa6   : > { %v3957_v13 = vadd.f32 %v4510_v38, %v4116_v4  ;;  %v3948_v55 = vpop.f32.mrb[83].mxu0  ;;  %v3966_v41 = vadd.f32 %v3954_v28, %v6065_v47 }
 0xaa7   : > { %v3964_v33 = vadd.f32 %v3946_v43, %v6062_v44  ;;  %v3949_v15 = vadd.f32 %v4116_v4, %v3948_v55 }
 0xaa8   : > { %3974 = vst.msk [vmem:[%s555_s25 + $0x30] sm:$0xff] %vm568_vm0, %v3966_v41  ;;  %v3967_v24 = vadd.f32 %v3957_v13, %v6073_v10 }
 0xaa9   : > { %3972 = vst.msk [vmem:[%s555_s25 + $0x20] sm:$0xff] %vm568_vm0, %v3964_v33  ;;  %v3965_v39 = vadd.f32 %v3949_v15, %v6068_v59 }
 0xaaa   : > { %3975 = vst.msk [vmem:[%s555_s25 + $0x38] sm:$0xff] %vm568_vm0, %v3967_v24 }
 0xaab   : > { %3973 = vst.msk [vmem:[%s555_s25 + $0x28] sm:$0xff] %vm568_vm0, %v3965_v39 }
 0xaac PF: > { %s27_s24 = sadd.s32 1, %s4991_s24  }
 0xaad   : > { %p24_p4 = scmp.ge.s32.totalorder %s27_s24, 4  }
 0xaaf   :  { %26 = sbr.rel (!%p24_p4) target bundleno = 3 (0x3), region = 118 }

</bundles_post_ra>
